<compile_context>
chip_gen: v7x
topology: tpu7x:2x2x1
jax: 0.10.0
libtpu: 0.0.40
codegen_flags: <defaults>
</compile_context>

<pallas_src>
import jax
import jax.numpy as jnp
from jax.experimental import pallas as pl
from jax.experimental.pallas import tpu as pltpu

FEATURE_DIM = 1280    # efficientnetv2_s num_features
ACTION_N = 6          # synthetic action_space.n
RESIZE_HW = 300       # transforms.Resize((300, 300))
PACK_LANES = 128      # lane-dense packed head-output width


# ------------- resize-fold weights (trace-time, tiny 1D vjp) ---------------

def _resize_mean_weights(src_len, dst_len):
    """w (src_len,) such that mean(resize_1d(v, dst_len, bilinear)) == w @ v."""
    def f(v):
        return jax.image.resize(v, (dst_len,), method="bilinear")
    _, vjp = jax.vjp(f, jnp.zeros((src_len,), jnp.float32))
    (w,) = vjp(jnp.full((dst_len,), 1.0 / dst_len, jnp.float32))
    return w


# ------------------- fused preprocess + encoder stand-in -------------------

def _encode_kernel(x_ref, w_ref, proj_ref, enc_ref):
    # x_ref:    (TN, C*Pp) f32 — one row per image, channel segments along lanes
    # w_ref:    (1, Pp)    f32 — resize-folded spatial mean weights
    # proj_ref: (C, FEATURE_DIM) f32 — encoder stand-in projection
    x = x_ref[...]
    w = w_ref[...]
    c = proj_ref.shape[0]
    pp = w.shape[1]
    acc = None
    for ci in range(c):
        seg = x[:, ci * pp:(ci + 1) * pp]                   # static aligned lane slice
        pooled = jnp.sum(seg * w, axis=-1, keepdims=True)   # (TN,1) == mean(resize(frame))
        norm = pooled * 2.0 - 1.0                           # Normalize(0.5,0.5) folded
        term = norm * proj_ref[ci:ci + 1, :]                # (TN, FEATURE_DIM)
        acc = term if acc is None else acc + term
    enc_ref[...] = acc.astype(enc_ref.dtype)


def encode_pallas(x, enc_proj):
    """x: (N, F, H, W, C) f32 in [0,1]; enc_proj: (C, FEATURE_DIM) f32.

    Returns (N, FEATURE_DIM) bf16 encoding (bf16 halves the DMA into the heads).
    """
    n, f, h, w, c = x.shape
    feat = enc_proj.shape[1]
    fh, p = f * h, f * h * w

    # Fold Resize(300,300)+mean-pool into one weighted mean over original pixels
    # (resize is linear & separable) -> no 300x300 f32 HBM intermediate.
    wa = _resize_mean_weights(fh, RESIZE_HW)       # rows: F*H -> 300
    wb = _resize_mean_weights(w, RESIZE_HW)        # cols: W   -> 300
    w2d = (wa[:, None] * wb[None, :]).reshape(1, p)

    # permute(0,4,1,2,3) glue + per-channel lane segments padded to 128.
    frames = jnp.transpose(x, (0, 4, 1, 2, 3)).reshape(n, c, p)
    pp = ((p + 127) // 128) * 128
    if pp != p:
        frames = jnp.pad(frames, ((0, 0), (0, 0), (0, pp - p)))
        w2d = jnp.pad(w2d, ((0, 0), (0, pp - p)))
    x2 = frames.reshape(n, c * pp)                 # sublane dim = batch, not C

    # Batch tiling: bounded VMEM at any N, pipelined HBM reads.
    row_bytes = c * pp * 4
    if n <= 8:
        tn, n_pad = n, n
    else:
        tn = 8
        while tn * 2 <= 64 and tn * 2 <= n and tn * 2 * row_bytes <= (4 << 20):
            tn *= 2
        n_pad = -(-n // tn) * tn
    if n_pad != n:
        x2 = jnp.pad(x2, ((0, n_pad - n), (0, 0)))

    cost = pl.CostEstimate(
        flops=int(2 * n_pad * c * pp + 2 * n_pad * c * feat),
        transcendentals=0,
        bytes_accessed=int(n_pad * c * pp * 4 + pp * 4 + c * feat * 4
                           + n_pad * feat * 2),
    )
    enc = pl.pallas_call(
        _encode_kernel,
        out_shape=jax.ShapeDtypeStruct((n_pad, feat), jnp.bfloat16),
        grid=(n_pad // tn,),
        in_specs=[
            pl.BlockSpec((tn, c * pp), lambda i: (i, 0)),
            pl.BlockSpec((1, pp), lambda i: (0, 0),
                         pipeline_mode=pl.Buffered(1)),
            pl.BlockSpec((c, feat), lambda i: (0, 0),
                         pipeline_mode=pl.Buffered(1)),
        ],
        out_specs=pl.BlockSpec((tn, feat), lambda i: (i, 0)),
        compiler_params=pltpu.CompilerParams(
            dimension_semantics=("parallel",),
            vmem_limit_bytes=32 * 1024 * 1024),
        cost_estimate=cost,
    )(x2, w2d, enc_proj)
    return enc[:n]


# ----------------------- fused policy + value heads ------------------------

def _fused_heads_kernel(x_ref,
                        pw1_ref, pb1_ref, pw2_ref, pb2_ref,
                        vw1_ref, vb1_ref, vw2_ref, vb2_ref,
                        w3p_ref, w3v_ref, b3_ref,
                        out_ref):
    # bf16 activations/weights on the MXU, f32 accumulation; f32 biases.
    x = x_ref[...]                                           # (tm, 1280) bf16

    def layer(a, w_ref, b_ref):
        y = jnp.dot(a, w_ref[...], preferred_element_type=jnp.float32) + b_ref[...]
        return jnp.tanh(y).astype(jnp.bfloat16)

    hp = layer(layer(x, pw1_ref, pb1_ref), pw2_ref, pb2_ref)  # 1280->512->256
    hv = layer(layer(x, vw1_ref, vb1_ref), vw2_ref, vb2_ref)  # 1280->1024->256

    # Lane-dense packed final layer: lanes [0, ACTION_N) = logits, lane ACTION_N = value.
    out_ref[...] = (jnp.dot(hp, w3p_ref[...], preferred_element_type=jnp.float32)
                    + jnp.dot(hv, w3v_ref[...], preferred_element_type=jnp.float32)
                    + b3_ref[...])


def fused_heads_pallas(x, policy_params, value_params):
    """x: (N, D) bf16; params per head: 3x (W bf16 (in,out), b f32 (out,))."""
    n, d = x.shape
    (pw1, pb1), (pw2, pb2), (pw3, pb3) = policy_params
    (vw1, vb1), (vw2, vb2), (vw3, vb3) = value_params
    a_dim = pw3.shape[1]
    assert a_dim + 1 <= PACK_LANES

    # Pack both tiny output layers into one lane-dense (tm, 128) f32 store.
    hp_dim, hv_dim = pw3.shape[0], vw3.shape[0]
    w3p = jnp.zeros((hp_dim, PACK_LANES), jnp.bfloat16)
    w3p = w3p.at[:, :a_dim].set(pw3.astype(jnp.bfloat16))
    w3v = jnp.zeros((hv_dim, PACK_LANES), jnp.bfloat16)
    w3v = w3v.at[:, a_dim:a_dim + 1].set(vw3.astype(jnp.bfloat16))
    b3 = (jnp.zeros((1, PACK_LANES), jnp.float32)
          .at[0, :a_dim].set(pb3)
          .at[0, a_dim].set(vb3[0]))

    # Batch tiling: single tile below 128 rows; 256/512-row tiles fill the
    # 2x256x256 MXUs (v6e/v7x) and give >=2 "parallel" grid steps for both
    # v7x TensorCores at larger N.  (v5e is fine with these sizes too.)
    if n < 128:
        tm, n_pad = n, n
    else:
        tm = 512 if n >= 512 else 256
        n_pad = -(-n // tm) * tm
    if n_pad != n:
        x = jnp.pad(x, ((0, n_pad - n), (0, 0)))

    consts = (pw1, pb1.reshape(1, -1), pw2, pb2.reshape(1, -1),
              vw1, vb1.reshape(1, -1), vw2, vb2.reshape(1, -1),
              w3p, w3v, b3)

    def batch_spec(cols):
        return pl.BlockSpec((tm, cols), lambda i: (i, 0))

    def const_spec(arr):
        # Same block every grid step; Buffered(1) keeps a single VMEM-resident
        # copy instead of a dead double buffer (~4.5 MiB saved).
        return pl.BlockSpec(arr.shape, lambda i: (0, 0),
                            pipeline_mode=pl.Buffered(1))

    weight_bytes = sum(int(a.size) * a.dtype.itemsize for a in consts)
    matmul_flops = 2 * n_pad * (d * pw1.shape[1] + pw1.shape[1] * pw2.shape[1]
                                + d * vw1.shape[1] + vw1.shape[1] * vw2.shape[1]
                                + (hp_dim + hv_dim) * PACK_LANES)
    cost = pl.CostEstimate(
        flops=int(matmul_flops),
        transcendentals=int(n_pad * (pw1.shape[1] + pw2.shape[1]
                                     + vw1.shape[1] + vw2.shape[1])),
        bytes_accessed=int(n_pad * d * 2 + weight_bytes + n_pad * PACK_LANES * 4),
    )

    packed = pl.pallas_call(
        _fused_heads_kernel,
        out_shape=jax.ShapeDtypeStruct((n_pad, PACK_LANES), jnp.float32),
        grid=(n_pad // tm,),
        in_specs=[batch_spec(d)] + [const_spec(a) for a in consts],
        out_specs=batch_spec(PACK_LANES),
        compiler_params=pltpu.CompilerParams(
            dimension_semantics=("parallel",),
            vmem_limit_bytes=32 * 1024 * 1024),
        cost_estimate=cost,
    )(x, *consts)
    return packed[:n, :a_dim], packed[:n, a_dim:a_dim + 1]


# ----------------------------- parameter init ------------------------------

def xavier_uniform(key, fan_in, fan_out):
    limit = jnp.sqrt(6.0 / (fan_in + fan_out))
    return jax.random.uniform(
        key, (fan_in, fan_out), minval=-limit, maxval=limit, dtype=jnp.float32)


def make_head_params(key, dims, weight_dtype=jnp.bfloat16):
    """dims = [d0, ..., dk]; returns [(W, b)] with W (d_i, d_{i+1})."""
    params = []
    keys = jax.random.split(key, len(dims) - 1)
    for k, din, dout in zip(keys, dims[:-1], dims[1:]):
        # bf16 weight storage halves HBM/DMA bytes (kernel is weight-DMA bound);
        # accumulation stays f32 on the MXU.
        w = xavier_uniform(k, din, dout).astype(weight_dtype)  # nn.init.xavier_uniform_
        b = jnp.zeros((dout,), jnp.float32)                    # nn.init.zeros_
        params.append((w, b))
    return params


# --------------------------------- forward ---------------------------------

def nn_policy_forward(x, policy_params, value_params, enc_proj):
    # x: (N, F, H, W, C) float32 in [0, 1]
    # permute/reshape + Resize(300,300) + Normalize(0.5,0.5) + encoder stand-in
    # are fused into encode_pallas (the 300x300 tensor is never materialized).
    # TODO(synk): PIL ToPILImage/ToTensor round trip and the pretrained timm
    # encoder have no Pallas equivalent; deterministic stand-in used instead.
    encoding = encode_pallas(x, enc_proj)                      # (N, FEATURE_DIM) bf16
    action_logits, values = fused_heads_pallas(encoding, policy_params, value_params)
    return action_logits, values


# ----------------------------------- main -----------------------------------

if __name__ == "__main__":
    key = jax.random.PRNGKey(0)
    k_x, k_enc, k_pol, k_val = jax.random.split(key, 4)

    # small shapes consistent with forward(): (N, F, H, W, C)
    N, F, H, W, C = 2, 4, 16, 16, 3
    x = jax.random.uniform(k_x, (N, F, H, W, C), dtype=jnp.float32)

    # deterministic encoder stand-in projection (C -> FEATURE_DIM)
    enc_proj = jax.random.normal(k_enc, (C, FEATURE_DIM), dtype=jnp.float32) * 0.1

    policy_params = make_head_params(k_pol, [FEATURE_DIM, 512, 256, ACTION_N])
    value_params = make_head_params(k_val, [FEATURE_DIM, 1024, 256, 1])

    fwd = jax.jit(nn_policy_forward)
    action_logits, values = fwd(x, policy_params, value_params, enc_proj)
    jax.block_until_ready((action_logits, values))

    assert action_logits.shape == (N, ACTION_N)
    assert values.shape == (N, 1)
    assert bool(jnp.all(jnp.isfinite(action_logits)))
    assert bool(jnp.all(jnp.isfinite(values)))
    print("KERNEL_OK")
</pallas_src>

<mosaic_0001>
module attributes {stable_mosaic.version = 11 : i64} {
  func.func @_encode_kernel(%arg0: i32, %arg1: memref<2x3072xf32, #tpu.memory_space<vmem>>, %arg2: memref<1x1024xf32, #tpu.memory_space<vmem>>, %arg3: memref<3x1280xf32, #tpu.memory_space<vmem>>, %arg4: memref<2x1280xbf16, #tpu.memory_space<vmem>>) attributes {dimension_semantics = [#tpu.dimension_semantics<parallel>], iteration_bounds = array<i64: 1>, scalar_prefetch = 0 : i64, scratch_operands = 0 : i64, tpu.core_type = #tpu.core_type<tc>, window_params = [{transform_indices = @transform_0, window_bounds = array<i64: 2, 3072>}, {pipeline_mode = #tpu.pipeline_mode<synchronous>, transform_indices = @transform_1, window_bounds = array<i64: 1, 1024>}, {pipeline_mode = #tpu.pipeline_mode<synchronous>, transform_indices = @transform_2, window_bounds = array<i64: 3, 1280>}, {transform_indices = @transform_3, window_bounds = array<i64: 2, 1280>}]} {
    %c0 = arith.constant 0 : index
    %c0_0 = arith.constant 0 : index
    %0 = vector.load %arg1[%c0, %c0_0] : memref<2x3072xf32, #tpu.memory_space<vmem>>, vector<2x3072xf32>
    %c0_1 = arith.constant 0 : index
    %c0_2 = arith.constant 0 : index
    %1 = vector.load %arg2[%c0_1, %c0_2] : memref<1x1024xf32, #tpu.memory_space<vmem>>, vector<1x1024xf32>
    %2 = vector.extract_strided_slice %0 {offsets = [0, 0], sizes = [2, 1024], strides = [1, 1]} : vector<2x3072xf32> to vector<2x1024xf32>
    %3 = vector.broadcast %1 : vector<1x1024xf32> to vector<2x1024xf32>
    %4 = arith.mulf %2, %3 : vector<2x1024xf32>
    %cst = arith.constant dense<0.000000e+00> : vector<2xf32>
    %5 = vector.multi_reduction <add>, %4, %cst [1] : vector<2x1024xf32> to vector<2xf32>
    %6 = vector.shape_cast %5 : vector<2xf32> to vector<2x1xf32>
    %cst_3 = arith.constant 2.000000e+00 : f32
    %7 = vector.broadcast %cst_3 : f32 to vector<2x1xf32>
    %8 = arith.mulf %6, %7 : vector<2x1xf32>
    %cst_4 = arith.constant 1.000000e+00 : f32
    %9 = vector.broadcast %cst_4 : f32 to vector<2x1xf32>
    %10 = arith.subf %8, %9 : vector<2x1xf32>
    %c0_5 = arith.constant 0 : index
    %c0_6 = arith.constant 0 : index
    %11 = vector.load %arg3[%c0_5, %c0_6] : memref<3x1280xf32, #tpu.memory_space<vmem>>, vector<1x1280xf32>
    %12 = vector.broadcast %10 : vector<2x1xf32> to vector<2x1280xf32>
    %13 = vector.broadcast %11 : vector<1x1280xf32> to vector<2x1280xf32>
    %14 = arith.mulf %12, %13 : vector<2x1280xf32>
    %15 = vector.extract_strided_slice %0 {offsets = [0, 1024], sizes = [2, 1024], strides = [1, 1]} : vector<2x3072xf32> to vector<2x1024xf32>
    %16 = vector.broadcast %1 : vector<1x1024xf32> to vector<2x1024xf32>
    %17 = arith.mulf %15, %16 : vector<2x1024xf32>
    %cst_7 = arith.constant dense<0.000000e+00> : vector<2xf32>
    %18 = vector.multi_reduction <add>, %17, %cst_7 [1] : vector<2x1024xf32> to vector<2xf32>
    %19 = vector.shape_cast %18 : vector<2xf32> to vector<2x1xf32>
    %cst_8 = arith.constant 2.000000e+00 : f32
    %20 = vector.broadcast %cst_8 : f32 to vector<2x1xf32>
    %21 = arith.mulf %19, %20 : vector<2x1xf32>
    %cst_9 = arith.constant 1.000000e+00 : f32
    %22 = vector.broadcast %cst_9 : f32 to vector<2x1xf32>
    %23 = arith.subf %21, %22 : vector<2x1xf32>
    %c1 = arith.constant 1 : index
    %c0_10 = arith.constant 0 : index
    %24 = vector.load %arg3[%c1, %c0_10] : memref<3x1280xf32, #tpu.memory_space<vmem>>, vector<1x1280xf32>
    %25 = vector.broadcast %23 : vector<2x1xf32> to vector<2x1280xf32>
    %26 = vector.broadcast %24 : vector<1x1280xf32> to vector<2x1280xf32>
    %27 = arith.mulf %25, %26 : vector<2x1280xf32>
    %28 = arith.addf %14, %27 : vector<2x1280xf32>
    %29 = vector.extract_strided_slice %0 {offsets = [0, 2048], sizes = [2, 1024], strides = [1, 1]} : vector<2x3072xf32> to vector<2x1024xf32>
    %30 = vector.broadcast %1 : vector<1x1024xf32> to vector<2x1024xf32>
    %31 = arith.mulf %29, %30 : vector<2x1024xf32>
    %cst_11 = arith.constant dense<0.000000e+00> : vector<2xf32>
    %32 = vector.multi_reduction <add>, %31, %cst_11 [1] : vector<2x1024xf32> to vector<2xf32>
    %33 = vector.shape_cast %32 : vector<2xf32> to vector<2x1xf32>
    %cst_12 = arith.constant 2.000000e+00 : f32
    %34 = vector.broadcast %cst_12 : f32 to vector<2x1xf32>
    %35 = arith.mulf %33, %34 : vector<2x1xf32>
    %cst_13 = arith.constant 1.000000e+00 : f32
    %36 = vector.broadcast %cst_13 : f32 to vector<2x1xf32>
    %37 = arith.subf %35, %36 : vector<2x1xf32>
    %c2 = arith.constant 2 : index
    %c0_14 = arith.constant 0 : index
    %38 = vector.load %arg3[%c2, %c0_14] : memref<3x1280xf32, #tpu.memory_space<vmem>>, vector<1x1280xf32>
    %39 = vector.broadcast %37 : vector<2x1xf32> to vector<2x1280xf32>
    %40 = vector.broadcast %38 : vector<1x1280xf32> to vector<2x1280xf32>
    %41 = arith.mulf %39, %40 : vector<2x1280xf32>
    %42 = arith.addf %28, %41 : vector<2x1280xf32>
    %43 = arith.truncf %42 : vector<2x1280xf32> to vector<2x1280xbf16>
    %c0_15 = arith.constant 0 : index
    %c0_16 = arith.constant 0 : index
    %44 = vector.load %arg4[%c0_15, %c0_16] : memref<2x1280xbf16, #tpu.memory_space<vmem>>, vector<2x1280xbf16>
    tpu.vector_store %arg4[%c0_15, %c0_16], %43 {strides = array<i32>} : memref<2x1280xbf16, #tpu.memory_space<vmem>>, vector<2x1280xbf16>,
    return
  }
  func.func @transform_0(%arg0: i32) -> (i32, i32) {
    %c0_i32 = arith.constant 0 : i32
    %c0_i32_0 = arith.constant 0 : i32
    return %arg0, %c0_i32 : i32, i32
  }
  func.func @transform_1(%arg0: i32) -> (i32, i32) {
    %c0_i32 = arith.constant 0 : i32
    %c0_i32_0 = arith.constant 0 : i32
    %c0_i32_1 = arith.constant 0 : i32
    return %c0_i32, %c0_i32_0 : i32, i32
  }
  func.func @transform_2(%arg0: i32) -> (i32, i32) {
    %c0_i32 = arith.constant 0 : i32
    %c0_i32_0 = arith.constant 0 : i32
    %c0_i32_1 = arith.constant 0 : i32
    return %c0_i32, %c0_i32_0 : i32, i32
  }
  func.func @transform_3(%arg0: i32) -> (i32, i32) {
    %c0_i32 = arith.constant 0 : i32
    %c0_i32_0 = arith.constant 0 : i32
    return %arg0, %c0_i32 : i32, i32
  }
}

module attributes {stable_mosaic.version = 11 : i64} {
  func.func @_fused_heads_kernel(%arg0: i32, %arg1: memref<2x1280xbf16, #tpu.memory_space<vmem>>, %arg2: memref<1280x512xbf16, #tpu.memory_space<vmem>>, %arg3: memref<1x512xf32, #tpu.memory_space<vmem>>, %arg4: memref<512x256xbf16, #tpu.memory_space<vmem>>, %arg5: memref<1x256xf32, #tpu.memory_space<vmem>>, %arg6: memref<1280x1024xbf16, #tpu.memory_space<vmem>>, %arg7: memref<1x1024xf32, #tpu.memory_space<vmem>>, %arg8: memref<1024x256xbf16, #tpu.memory_space<vmem>>, %arg9: memref<1x256xf32, #tpu.memory_space<vmem>>, %arg10: memref<256x128xbf16, #tpu.memory_space<vmem>>, %arg11: memref<256x128xbf16, #tpu.memory_space<vmem>>, %arg12: memref<1x128xf32, #tpu.memory_space<vmem>>, %arg13: memref<2x128xf32, #tpu.memory_space<vmem>>) attributes {dimension_semantics = [#tpu.dimension_semantics<parallel>], iteration_bounds = array<i64: 1>, scalar_prefetch = 0 : i64, scratch_operands = 0 : i64, tpu.core_type = #tpu.core_type<tc>, window_params = [{transform_indices = @transform_0, window_bounds = array<i64: 2, 1280>}, {pipeline_mode = #tpu.pipeline_mode<synchronous>, transform_indices = @transform_1, window_bounds = array<i64: 1280, 512>}, {pipeline_mode = #tpu.pipeline_mode<synchronous>, transform_indices = @transform_2, window_bounds = array<i64: 1, 512>}, {pipeline_mode = #tpu.pipeline_mode<synchronous>, transform_indices = @transform_3, window_bounds = array<i64: 512, 256>}, {pipeline_mode = #tpu.pipeline_mode<synchronous>, transform_indices = @transform_4, window_bounds = array<i64: 1, 256>}, {pipeline_mode = #tpu.pipeline_mode<synchronous>, transform_indices = @transform_5, window_bounds = array<i64: 1280, 1024>}, {pipeline_mode = #tpu.pipeline_mode<synchronous>, transform_indices = @transform_6, window_bounds = array<i64: 1, 1024>}, {pipeline_mode = #tpu.pipeline_mode<synchronous>, transform_indices = @transform_7, window_bounds = array<i64: 1024, 256>}, {pipeline_mode = #tpu.pipeline_mode<synchronous>, transform_indices = @transform_8, window_bounds = array<i64: 1, 256>}, {pipeline_mode = #tpu.pipeline_mode<synchronous>, transform_indices = @transform_9, window_bounds = array<i64: 256, 128>}, {pipeline_mode = #tpu.pipeline_mode<synchronous>, transform_indices = @transform_10, window_bounds = array<i64: 256, 128>}, {pipeline_mode = #tpu.pipeline_mode<synchronous>, transform_indices = @transform_11, window_bounds = array<i64: 1, 128>}, {transform_indices = @transform_12, window_bounds = array<i64: 2, 128>}]} {
    %c0 = arith.constant 0 : index
    %c0_0 = arith.constant 0 : index
    %0 = vector.load %arg1[%c0, %c0_0] : memref<2x1280xbf16, #tpu.memory_space<vmem>>, vector<2x1280xbf16>
    %c0_1 = arith.constant 0 : index
    %c0_2 = arith.constant 0 : index
    %1 = vector.load %arg2[%c0_1, %c0_2] : memref<1280x512xbf16, #tpu.memory_space<vmem>>, vector<1280x512xbf16>
    %cst = arith.constant dense<0.000000e+00> : vector<2x512xf32>
    %2 = tpu.matmul %0, %1, %cst {dimension_numbers = #tpu.dot_dimension_numbers<[1], [0], [0], [1], [0, 0, 1, 1], [], []>} : vector<2x1280xbf16>, vector<1280x512xbf16>, vector<2x512xf32> -> vector<2x512xf32>
    %c0_3 = arith.constant 0 : index
    %c0_4 = arith.constant 0 : index
    %3 = vector.load %arg3[%c0_3, %c0_4] : memref<1x512xf32, #tpu.memory_space<vmem>>, vector<1x512xf32>
    %4 = vector.broadcast %3 : vector<1x512xf32> to vector<2x512xf32>
    %5 = arith.addf %2, %4 : vector<2x512xf32>
    %6 = math.tanh %5 : vector<2x512xf32>
    %7 = arith.truncf %6 : vector<2x512xf32> to vector<2x512xbf16>
    %c0_5 = arith.constant 0 : index
    %c0_6 = arith.constant 0 : index
    %8 = vector.load %arg4[%c0_5, %c0_6] : memref<512x256xbf16, #tpu.memory_space<vmem>>, vector<512x256xbf16>
    %cst_7 = arith.constant dense<0.000000e+00> : vector<2x256xf32>
    %9 = tpu.matmul %7, %8, %cst_7 {dimension_numbers = #tpu.dot_dimension_numbers<[1], [0], [0], [1], [0, 0, 1, 1], [], []>} : vector<2x512xbf16>, vector<512x256xbf16>, vector<2x256xf32> -> vector<2x256xf32>
    %c0_8 = arith.constant 0 : index
    %c0_9 = arith.constant 0 : index
    %10 = vector.load %arg5[%c0_8, %c0_9] : memref<1x256xf32, #tpu.memory_space<vmem>>, vector<1x256xf32>
    %11 = vector.broadcast %10 : vector<1x256xf32> to vector<2x256xf32>
    %12 = arith.addf %9, %11 : vector<2x256xf32>
    %13 = math.tanh %12 : vector<2x256xf32>
    %14 = arith.truncf %13 : vector<2x256xf32> to vector<2x256xbf16>
    %c0_10 = arith.constant 0 : index
    %c0_11 = arith.constant 0 : index
    %15 = vector.load %arg6[%c0_10, %c0_11] : memref<1280x1024xbf16, #tpu.memory_space<vmem>>, vector<1280x1024xbf16>
    %cst_12 = arith.constant dense<0.000000e+00> : vector<2x1024xf32>
    %16 = tpu.matmul %0, %15, %cst_12 {dimension_numbers = #tpu.dot_dimension_numbers<[1], [0], [0], [1], [0, 0, 1, 1], [], []>} : vector<2x1280xbf16>, vector<1280x1024xbf16>, vector<2x1024xf32> -> vector<2x1024xf32>
    %c0_13 = arith.constant 0 : index
    %c0_14 = arith.constant 0 : index
    %17 = vector.load %arg7[%c0_13, %c0_14] : memref<1x1024xf32, #tpu.memory_space<vmem>>, vector<1x1024xf32>
    %18 = vector.broadcast %17 : vector<1x1024xf32> to vector<2x1024xf32>
    %19 = arith.addf %16, %18 : vector<2x1024xf32>
    %20 = math.tanh %19 : vector<2x1024xf32>
    %21 = arith.truncf %20 : vector<2x1024xf32> to vector<2x1024xbf16>
    %c0_15 = arith.constant 0 : index
    %c0_16 = arith.constant 0 : index
    %22 = vector.load %arg8[%c0_15, %c0_16] : memref<1024x256xbf16, #tpu.memory_space<vmem>>, vector<1024x256xbf16>
    %cst_17 = arith.constant dense<0.000000e+00> : vector<2x256xf32>
    %23 = tpu.matmul %21, %22, %cst_17 {dimension_numbers = #tpu.dot_dimension_numbers<[1], [0], [0], [1], [0, 0, 1, 1], [], []>} : vector<2x1024xbf16>, vector<1024x256xbf16>, vector<2x256xf32> -> vector<2x256xf32>
    %c0_18 = arith.constant 0 : index
    %c0_19 = arith.constant 0 : index
    %24 = vector.load %arg9[%c0_18, %c0_19] : memref<1x256xf32, #tpu.memory_space<vmem>>, vector<1x256xf32>
    %25 = vector.broadcast %24 : vector<1x256xf32> to vector<2x256xf32>
    %26 = arith.addf %23, %25 : vector<2x256xf32>
    %27 = math.tanh %26 : vector<2x256xf32>
    %28 = arith.truncf %27 : vector<2x256xf32> to vector<2x256xbf16>
    %c0_20 = arith.constant 0 : index
    %c0_21 = arith.constant 0 : index
    %29 = vector.load %arg10[%c0_20, %c0_21] : memref<256x128xbf16, #tpu.memory_space<vmem>>, vector<256x128xbf16>
    %cst_22 = arith.constant dense<0.000000e+00> : vector<2x128xf32>
    %30 = tpu.matmul %14, %29, %cst_22 {dimension_numbers = #tpu.dot_dimension_numbers<[1], [0], [0], [1], [0, 0, 1, 1], [], []>} : vector<2x256xbf16>, vector<256x128xbf16>, vector<2x128xf32> -> vector<2x128xf32>
    %c0_23 = arith.constant 0 : index
    %c0_24 = arith.constant 0 : index
    %31 = vector.load %arg11[%c0_23, %c0_24] : memref<256x128xbf16, #tpu.memory_space<vmem>>, vector<256x128xbf16>
    %cst_25 = arith.constant dense<0.000000e+00> : vector<2x128xf32>
    %32 = tpu.matmul %28, %31, %cst_25 {dimension_numbers = #tpu.dot_dimension_numbers<[1], [0], [0], [1], [0, 0, 1, 1], [], []>} : vector<2x256xbf16>, vector<256x128xbf16>, vector<2x128xf32> -> vector<2x128xf32>
    %33 = arith.addf %30, %32 : vector<2x128xf32>
    %c0_26 = arith.constant 0 : index
    %c0_27 = arith.constant 0 : index
    %34 = vector.load %arg12[%c0_26, %c0_27] : memref<1x128xf32, #tpu.memory_space<vmem>>, vector<1x128xf32>
    %35 = vector.broadcast %34 : vector<1x128xf32> to vector<2x128xf32>
    %36 = arith.addf %33, %35 : vector<2x128xf32>
    %c0_28 = arith.constant 0 : index
    %c0_29 = arith.constant 0 : index
    %37 = vector.load %arg13[%c0_28, %c0_29] : memref<2x128xf32, #tpu.memory_space<vmem>>, vector<2x128xf32>
    tpu.vector_store %arg13[%c0_28, %c0_29], %36 {strides = array<i32>} : memref<2x128xf32, #tpu.memory_space<vmem>>, vector<2x128xf32>,
    return
  }
  func.func @transform_0(%arg0: i32) -> (i32, i32) {
    %c0_i32 = arith.constant 0 : i32
    %c0_i32_0 = arith.constant 0 : i32
    return %arg0, %c0_i32 : i32, i32
  }
  func.func @transform_1(%arg0: i32) -> (i32, i32) {
    %c0_i32 = arith.constant 0 : i32
    %c0_i32_0 = arith.constant 0 : i32
    %c0_i32_1 = arith.constant 0 : i32
    return %c0_i32, %c0_i32_0 : i32, i32
  }
  func.func @transform_2(%arg0: i32) -> (i32, i32) {
    %c0_i32 = arith.constant 0 : i32
    %c0_i32_0 = arith.constant 0 : i32
    %c0_i32_1 = arith.constant 0 : i32
    return %c0_i32, %c0_i32_0 : i32, i32
  }
  func.func @transform_3(%arg0: i32) -> (i32, i32) {
    %c0_i32 = arith.constant 0 : i32
    %c0_i32_0 = arith.constant 0 : i32
    %c0_i32_1 = arith.constant 0 : i32
    return %c0_i32, %c0_i32_0 : i32, i32
  }
  func.func @transform_4(%arg0: i32) -> (i32, i32) {
    %c0_i32 = arith.constant 0 : i32
    %c0_i32_0 = arith.constant 0 : i32
    %c0_i32_1 = arith.constant 0 : i32
    return %c0_i32, %c0_i32_0 : i32, i32
  }
  func.func @transform_5(%arg0: i32) -> (i32, i32) {
    %c0_i32 = arith.constant 0 : i32
    %c0_i32_0 = arith.constant 0 : i32
    %c0_i32_1 = arith.constant 0 : i32
    return %c0_i32, %c0_i32_0 : i32, i32
  }
  func.func @transform_6(%arg0: i32) -> (i32, i32) {
    %c0_i32 = arith.constant 0 : i32
    %c0_i32_0 = arith.constant 0 : i32
    %c0_i32_1 = arith.constant 0 : i32
    return %c0_i32, %c0_i32_0 : i32, i32
  }
  func.func @transform_7(%arg0: i32) -> (i32, i32) {
    %c0_i32 = arith.constant 0 : i32
    %c0_i32_0 = arith.constant 0 : i32
    %c0_i32_1 = arith.constant 0 : i32
    return %c0_i32, %c0_i32_0 : i32, i32
  }
  func.func @transform_8(%arg0: i32) -> (i32, i32) {
    %c0_i32 = arith.constant 0 : i32
    %c0_i32_0 = arith.constant 0 : i32
    %c0_i32_1 = arith.constant 0 : i32
    return %c0_i32, %c0_i32_0 : i32, i32
  }
  func.func @transform_9(%arg0: i32) -> (i32, i32) {
    %c0_i32 = arith.constant 0 : i32
    %c0_i32_0 = arith.constant 0 : i32
    %c0_i32_1 = arith.constant 0 : i32
    return %c0_i32, %c0_i32_0 : i32, i32
  }
  func.func @transform_10(%arg0: i32) -> (i32, i32) {
    %c0_i32 = arith.constant 0 : i32
    %c0_i32_0 = arith.constant 0 : i32
    %c0_i32_1 = arith.constant 0 : i32
    return %c0_i32, %c0_i32_0 : i32, i32
  }
  func.func @transform_11(%arg0: i32) -> (i32, i32) {
    %c0_i32 = arith.constant 0 : i32
    %c0_i32_0 = arith.constant 0 : i32
    %c0_i32_1 = arith.constant 0 : i32
    return %c0_i32, %c0_i32_0 : i32, i32
  }
  func.func @transform_12(%arg0: i32) -> (i32, i32) {
    %c0_i32 = arith.constant 0 : i32
    %c0_i32_0 = arith.constant 0 : i32
    return %arg0, %c0_i32 : i32, i32
  }
}

</mosaic_0001>

<bundles_post_ra>
// kernel: nn_policy_forward.2
= control target key start
LH: loop header
LB: loop body
LE: loop exit
PB: predicated region body
PF: predicated region fallthrough
CT: control target
= control target key end

     0   :  { %8 = vsyncpa [#allocation3], 0  ;;  %s644_s12 = smov [#allocation2]   ;;  %s843_s0 = inlined_call_operand.vmem [shape: f32[2,3072], index: 0, kind: input, shape index: {}]   ;;  %s844_s1 = inlined_call_operand.vmem [shape: f32[1,1024], index: 1, kind: input, shape index: {}]   ;;  %s845_s2 = inlined_call_operand.hbm [shape: f32[3,1280], index: 2, kind: input, shape index: {}]   ;;  %s846_s3 = inlined_call_operand.vmem [shape: bf16[2,1280], index: 3, kind: output, shape index: {}]  }
   0x1   :  { %s19_s13 = sshll.u32 %s644_s12, 4  ;;  %s620_s16 = scalar_lea.hbm %s845_s2, 640  ;;  %s20_s13 = int_to_ptr.vmem [resolvable:$true] %s19_s13 }
   0x2   :  { %p621_p0 = scmp.ne.s32.totalorder %s845_s2, %s620_s16  ;;  %p624_p1 = scmp.lt.u32.totalorder %s620_s16, %s845_s2 }
   0x4   :  { %p626_p2 = pnand %p624_p1, %p621_p0 }
   0x6   :  { %629 = shalt.err (!%p626_p2)
}
   0x7   :  { %s630_s21 = scalar_lea.vmem %s20_s13, 640  ;;  %p635_p4 = scmp.lt.s32.totalorder %s20_s13, %s20_s13 }
   0x8   :  { %p631_p3 = scmp.ne.s32.totalorder %s20_s13, %s630_s21  ;;  %p636_p5 = scmp.lt.s32.totalorder %s630_s21, %s630_s21 }
   0xa   :  { %p637_p6 = por %p636_p5, %p635_p4 }
   0xc   :  { %p638_p7 = pnand %p637_p6, %p631_p3 }
   0xe   :  { %641 = shalt.err (!%p638_p7)
}
   0xf   :  { %22 = dma.hbm_to_vmem [thread:$0]  %s845_s2, 640, %s20_s13, [#allocation3]  }
  0x10   :  { %642 = dma.done.wait [#allocation3], 640  }
  0x11   :  { %643 = vsyncadd [#allocation3], 4294966656  ;;  %v34_v0 = vlaneseq  ;;  %v645_v1 = vmov 1983009808   ;;  %v32_v13 = vld [vmem:[%s844_s1] sm:$0xff]  ;;  %v27_v32 = vld [vmem:[%s843_s0 + $0x8] sm:$0xff] }
  0x12   :  { %v69_v2 = vunpack.c.l.s4 %v645_v1  ;;  %v26_v29 = vld [vmem:[%s843_s0] sm:$0xff]  ;;  %v28_v34 = vld [vmem:[%s843_s0 + $0x10] sm:$0xff]  ;;  %v29_v37 = vld [vmem:[%s843_s0 + $0x18] sm:$0xff]  ;;  %vm148_vm0 = vcmask 1041408  }
  0x13   :  { %v679_v3 = vshrl.u32 %v34_v0, 7  ;;  %v30_v50 = vld [vmem:[%s843_s0 + $0x20] sm:$0xff]  ;;  %v31_v0 = vld [vmem:[%s843_s0 + $0x28] sm:$0xff] }
  0x14   :  { %v70_v4 = vunpack.c.0.s8 %v69_v2 }
  0x15   :  { %v682_v5 = vsub.s32 0, %v679_v3  ;;  %v685_v6 = vsub.s32 1, %v679_v3  ;;  %v688_v7 = vsub.s32 2, %v679_v3  ;;  %v691_v8 = vsub.s32 3, %v679_v3 }
  0x16   :  { %v694_v9 = vsub.s32 4, %v679_v3  ;;  %v697_v10 = vsub.s32 5, %v679_v3  ;;  %v700_v11 = vsub.s32 6, %v679_v3  ;;  %v703_v12 = vsub.s32 7, %v679_v3 }
  0x17   :  { %v709_v14 = vsub.s32 %v70_v4, %v679_v3  ;;  %v37_v15 = vrot.slane %v32_v13, %v682_v5  ;;  %v41_v16 = vrot.slane %v32_v13, %v685_v6  ;;  %v45_v17 = vrot.slane %v32_v13, %v688_v7 }
  0x18   :  { %v49_v18 = vrot.slane %v32_v13, %v691_v8  ;;  %v53_v19 = vrot.slane %v32_v13, %v694_v9  ;;  %v57_v20 = vrot.slane %v32_v13, %v697_v10  ;;  %v61_v21 = vrot.slane %v32_v13, %v700_v11 }
  0x19   :  { %v65_v22 = vrot.slane %v32_v13, %v703_v12  ;;  %v66_v23 = vcombine.low %v37_v15, %v41_v16 }
  0x1a   :  { %v67_v24 = vcombine.low %v45_v17, %v49_v18  ;;  %v83_v25 = vcombine.low %v53_v19, %v57_v20 }
  0x1b   :  { %v84_v26 = vcombine.low %v61_v21, %v65_v22  ;;  %v74_v27 = vrot.slane %v66_v23, %v709_v14 }
  0x1c   :  { %v81_v28 = vrot.slane %v67_v24, %v709_v14  ;;  %v91_v30 = vrot.slane %v83_v25, %v709_v14 }
  0x1d   :  { %v98_v31 = vrot.slane %v84_v26, %v709_v14 }
  0x1e   :  { %v82_v33 = vcombine.low %v74_v27, %v81_v28 }
  0x1f   :  { %v99_v35 = vcombine.low %v91_v30, %v98_v31 }
  0x20   :  { %v102_v36 = vmul.f32 %v82_v33, %v26_v29  ;;  %v233_v39 = vmul.f32 %v82_v33, %v28_v34  ;;  %v374_v59 = vmul.f32 %v82_v33, %v30_v50 }
  0x21   :  { %v103_v38 = vmul.f32 %v99_v35, %v27_v32  ;;  %v234_v43 = vmul.f32 %v99_v35, %v29_v37  ;;  %v375_v21 = vmul.f32 %v99_v35, %v31_v0 }
  0x22   :  { %v106_v40 = vcombine.high %v102_v36, %v102_v36  ;;  %v113_v41 = vrot.slane %v102_v36, %v709_v14  ;;  %v237_v44 = vcombine.high %v233_v39, %v233_v39  ;;  %v244_v45 = vrot.slane %v233_v39, %v709_v14 }
  0x23   :  { %v123_v42 = vcombine.high %v103_v38, %v103_v38  ;;  %v130_v48 = vrot.slane %v103_v38, %v709_v14  ;;  %v254_v52 = vcombine.high %v234_v43, %v234_v43  ;;  %v261_v63 = vrot.slane %v234_v43, %v709_v14 }
  0x24   :  { %v120_v46 = vrot.slane %v106_v40, %v709_v14  ;;  %v121_v47 = vcombine.high %v113_v41, %v113_v41  ;;  %v149_v49 = vsel %vm148_vm0, %v113_v41, 0.0  ;;  %v251_v51 = vrot.slane %v237_v44, %v709_v14 }
  0x25   :  { %v252_v56 = vcombine.high %v244_v45, %v244_v45  ;;  %v137_v57 = vrot.slane %v123_v42, %v709_v14  ;;  %v138_v60 = vcombine.high %v130_v48, %v130_v48  ;;  %v156_v2 = vsel %vm148_vm0, %v130_v48, 0.0 }
  0x26   :  { %v122_v53 = vcombine.high %v120_v46, %v120_v46  ;;  %v150_v54 = vsel %vm148_vm0, %v121_v47, 0.0  ;;  %v152_v55 = vsel %vm148_vm0, %v120_v46, 0.0  ;;  %v253_v62 = vcombine.high %v251_v51, %v251_v51 }
  0x27   :  { %v151_v58 = vadd.f32 %v150_v54, %v149_v49  ;;  %v279_v4 = vsel %vm148_vm0, %v244_v45, 0.0  ;;  %v280_v13 = vsel %vm148_vm0, %v252_v56, 0.0  ;;  %v268_v15 = vrot.slane %v254_v52, %v709_v14 }
  0x28   :  { %v154_v61 = vsel %vm148_vm0, %v122_v53, 0.0  ;;  %v269_v16 = vcombine.high %v261_v63, %v261_v63  ;;  %v281_v17 = vadd.f32 %v280_v13, %v279_v4  ;;  %v282_v18 = vsel %vm148_vm0, %v251_v51, 0.0  ;;  %v299_v4 = vld [vmem:[#allocation2 + $0x1] ss:$4 sm:$0xff] }
  0x29   :  { %v153_v1 = vadd.f32 %v152_v55, %v151_v58  ;;  %v284_v20 = vsel %vm148_vm0, %v253_v62, 0.0  ;;  %v139_v22 = vcombine.high %v137_v57, %v137_v57  ;;  %v158_v23 = vsel %vm148_vm0, %v138_v60, 0.0 }
  0x2a   :  { %v283_v24 = vadd.f32 %v282_v18, %v281_v17  ;;  %v378_v25 = vcombine.high %v374_v59, %v374_v59  ;;  %v160_v27 = vsel %vm148_vm0, %v137_v57, 0.0  ;;  %v286_v28 = vsel %vm148_vm0, %v261_v63, 0.0  ;;  %v787_v18 = vld [vmem:[#allocation2 + $0x2] ss:$4 sm:$0xff] }
  0x2b   :  { %v155_v19 = vadd.f32 %v154_v61, %v153_v1  ;;  %v385_v29 = vrot.slane %v374_v59, %v709_v14  ;;  %v270_v30 = vcombine.high %v268_v15, %v268_v15  ;;  %v288_v32 = vsel %vm148_vm0, %v269_v16, 0.0  ;;  %v777_v1 = vld [vmem:[#allocation2] ss:$4 sm:$0xff] }
  0x2c   :  { %v285_v31 = vadd.f32 %v284_v20, %v283_v24  ;;  %v392_v33 = vrot.slane %v378_v25, %v709_v14  ;;  %v395_v36 = vcombine.high %v375_v21, %v375_v21  ;;  %v402_v37 = vrot.slane %v375_v21, %v709_v14 }
  0x2d   :  { %v157_v26 = vadd.f32 %v156_v2, %v155_v19  ;;  %v393_v35 = vcombine.high %v385_v29, %v385_v29  ;;  %v162_v38 = vsel %vm148_vm0, %v139_v22, 0.0  ;;  %v420_v41 = vsel %vm148_vm0, %v385_v29, 0.0 }
  0x2e   :  { %v287_v39 = vadd.f32 %v286_v28, %v285_v31  ;;  %v394_v40 = vcombine.high %v392_v33, %v392_v33  ;;  %v290_v43 = vsel %vm148_vm0, %v268_v15, 0.0  ;;  %v423_v45 = vsel %vm148_vm0, %v392_v33, 0.0 }
  0x2f   :  { %v159_v34 = vadd.f32 %v158_v23, %v157_v26  ;;  %v421_v44 = vsel %vm148_vm0, %v393_v35, 0.0  ;;  %v292_v47 = vsel %vm148_vm0, %v270_v30, 0.0  ;;  %v409_v50 = vrot.slane %v395_v36, %v709_v14 }
  0x30   :  { %v289_v46 = vadd.f32 %v288_v32, %v287_v39  ;;  %v422_v48 = vadd.f32 %v421_v44, %v420_v41  ;;  %v410_v51 = vcombine.high %v402_v37, %v402_v37  ;;  %v425_v52 = vsel %vm148_vm0, %v394_v40, 0.0  ;;  %v442_v41 = vld [vmem:[#allocation2 + $0x22] ss:$4 sm:$0x3] }
  0x31   :  { %v161_v42 = vadd.f32 %v160_v27, %v159_v34  ;;  %v427_v55 = vsel %vm148_vm0, %v402_v37, 0.0  ;;  %v411_v58 = vcombine.high %v409_v50, %v409_v50  ;;  %v431_v61 = vsel %vm148_vm0, %v409_v50, 0.0  ;;  %v170_v34 = vld [vmem:[#allocation2 + $0x20] ss:$4 sm:$0x3] }
  0x32   :  { %v291_v53 = vadd.f32 %v290_v43, %v289_v46  ;;  %v424_v54 = vadd.f32 %v423_v45, %v422_v48  ;;  %v429_v59 = vsel %vm148_vm0, %v410_v51, 0.0  ;;  %v184_v13 = vrot.slane %v777_v1, %v688_v7  ;;  %v301_v37 = vld [vmem:[#allocation2 + $0x21] ss:$4 sm:$0x3] }
  0x33   :  { %v163_v49 = vadd.f32 %v162_v38, %v161_v42  ;;  %v433_v14 = vsel %vm148_vm0, %v411_v58, 0.0  ;;  %v188_v15 = vrot.slane %v777_v1, %v691_v8  ;;  %v192_v16 = vrot.slane %v777_v1, %v694_v9 }
  0x34   :  { %v293_v56 = vadd.f32 %v292_v47, %v291_v53  ;;  %v426_v57 = vadd.f32 %v425_v52, %v424_v54  ;;  %v196_v17 = vrot.slane %v777_v1, %v697_v10  ;;  %v646_v19 = vmov 1966171168  }
  0x35   :  { %164 = vadd.xlane.f32.xlu0 %v163_v49  ;;  %v540_v20 = vunpack.c.l.s4 %v646_v19  ;;  %v200_v21 = vrot.slane %v777_v1, %v700_v11  ;;  %v204_v22 = vrot.slane %v777_v1, %v703_v12  ;;  %v315_v23 = vrot.slane %v299_v4, %v688_v7 }
  0x36   :  { %v428_v60 = vadd.f32 %v427_v55, %v426_v57  ;;  %v319_v26 = vrot.slane %v299_v4, %v691_v8  ;;  %v323_v27 = vrot.slane %v299_v4, %v694_v9  ;;  %v327_v28 = vrot.slane %v299_v4, %v697_v10 }
  0x37   :  { %v331_v29 = vrot.slane %v299_v4, %v700_v11  ;;  %v335_v30 = vrot.slane %v299_v4, %v703_v12  ;;  %v456_v31 = vrot.slane %v787_v18, %v688_v7  ;;  %v460_v32 = vrot.slane %v787_v18, %v691_v8 }
  0x38   :  { %v430_v62 = vadd.f32 %v429_v59, %v428_v60  ;;  %v464_v33 = vrot.slane %v787_v18, %v694_v9  ;;  %v468_v35 = vrot.slane %v787_v18, %v697_v10  ;;  %v472_v36 = vrot.slane %v787_v18, %v700_v11 }
  0x39   :  { %294 = vadd.xlane.f32.xlu0 %v293_v56  ;;  %v541_v39 = vunpack.c.0.s8 %v540_v20  ;;  %v476_v40 = vrot.slane %v787_v18, %v703_v12  ;;  %v176_v7 = vrot.slane %v777_v1, %v682_v5  ;;  %v180_v8 = vrot.slane %v777_v1, %v685_v6 }
  0x3a   :  { %v432_v63 = vadd.f32 %v431_v61, %v430_v62  ;;  %v208_v42 = vrot.slane %v170_v34, %v682_v5  ;;  %v307_v10 = vrot.slane %v299_v4, %v682_v5  ;;  %v311_v11 = vrot.slane %v299_v4, %v685_v6 }
  0x3b   :  { %v212_v44 = vrot.slane %v170_v34, %v685_v6  ;;  %v339_v45 = vrot.slane %v301_v37, %v682_v5  ;;  %v343_v12 = vrot.slane %v301_v37, %v685_v6  ;;  %v448_v46 = vrot.slane %v787_v18, %v682_v5 }
  0x3c   :  { %v434_v0 = vadd.f32 %v433_v14, %v432_v63  ;;  %v452_v47 = vrot.slane %v787_v18, %v685_v6  ;;  %v480_v48 = vrot.slane %v442_v41, %v682_v5  ;;  %v484_v49 = vrot.slane %v442_v41, %v685_v6 }
  0x3d   :  { %v828_v50 = vsub.s32 %v541_v39, %v679_v3 }
  0x3e   :  { %435 = vadd.xlane.f32.xlu1 %v434_v0 }
  0xc2   :  { %v165_v2 = vpop.xlane.xlu0 %164 }
  0xc3   :  { %v166_v24 = vmul.f32 2.0, %v165_v2 }
  0xc5   :  { %v608_v9 = vadd.f32 -1.0, %v166_v24 }
  0xc6   :  { %v295_v25 = vpop.xlane.xlu0 %294 }
  0xc7   :  { %v296_v38 = vmul.f32 2.0, %v295_v25  ;;  %v223_v51 = vmul.f32 %v608_v9, %v176_v7  ;;  %v224_v52 = vmul.f32 %v608_v9, %v180_v8  ;;  %v225_v53 = vmul.f32 %v608_v9, %v184_v13 }
  0xc8   :  { %v226_v54 = vmul.f32 %v608_v9, %v188_v15  ;;  %v227_v55 = vmul.f32 %v608_v9, %v192_v16  ;;  %v228_v60 = vmul.f32 %v608_v9, %v196_v17  ;;  %v229_v1 = vmul.f32 %v608_v9, %v200_v21 }
  0xc9   :  { %v609_v43 = vadd.f32 -1.0, %v296_v38  ;;  %v230_v3 = vmul.f32 %v608_v9, %v204_v22  ;;  %v231_v2 = vmul.f32 %v608_v9, %v208_v42  ;;  %v232_v18 = vmul.f32 %v608_v9, %v212_v44 }
  0xcb   :  { %v354_v56 = vmul.f32 %v609_v43, %v307_v10  ;;  %v355_v57 = vmul.f32 %v609_v43, %v311_v11  ;;  %v356_v58 = vmul.f32 %v609_v43, %v315_v23  ;;  %v436_v59 = vpop.xlane.xlu1 %435  ;;  %v357_v61 = vmul.f32 %v609_v43, %v319_v26 }
  0xcc   :  { %v358_v62 = vmul.f32 %v609_v43, %v323_v27  ;;  %v359_v14 = vmul.f32 %v609_v43, %v327_v28  ;;  %v360_v63 = vmul.f32 %v609_v43, %v331_v29  ;;  %v361_v5 = vmul.f32 %v609_v43, %v335_v30 }
  0xcd   :  { %v362_v0 = vmul.f32 %v609_v43, %v339_v45  ;;  %v363_v6 = vmul.f32 %v609_v43, %v343_v12  ;;  %v437_v4 = vmul.f32 2.0, %v436_v59  ;;  %v364_v13 = vadd.f32 %v354_v56, %v223_v51 }
  0xce   :  { %v365_v15 = vadd.f32 %v355_v57, %v224_v52  ;;  %v366_v16 = vadd.f32 %v356_v58, %v225_v53  ;;  %v367_v19 = vadd.f32 %v357_v61, %v226_v54  ;;  %v368_v20 = vadd.f32 %v358_v62, %v227_v55 }
  0xcf   :  { %v369_v23 = vadd.f32 %v359_v14, %v228_v60  ;;  %v610_v24 = vadd.f32 -1.0, %v437_v4  ;;  %v370_v17 = vadd.f32 %v360_v63, %v229_v1  ;;  %v371_v25 = vadd.f32 %v361_v5, %v230_v3 }
  0xd0   :  { %v372_v26 = vadd.f32 %v362_v0, %v231_v2  ;;  %v373_v27 = vadd.f32 %v363_v6, %v232_v18 }
  0xd1   :  { %v495_v28 = vmul.f32 %v610_v24, %v448_v46  ;;  %v496_v29 = vmul.f32 %v610_v24, %v452_v47  ;;  %v497_v30 = vmul.f32 %v610_v24, %v456_v31  ;;  %v498_v34 = vmul.f32 %v610_v24, %v460_v32 }
  0xd2   :  { %v499_v21 = vmul.f32 %v610_v24, %v464_v33  ;;  %v500_v22 = vmul.f32 %v610_v24, %v468_v35  ;;  %v501_v37 = vmul.f32 %v610_v24, %v472_v36  ;;  %v502_v38 = vmul.f32 %v610_v24, %v476_v40 }
  0xd3   :  { %v503_v39 = vmul.f32 %v610_v24, %v480_v48  ;;  %v504_v7 = vmul.f32 %v610_v24, %v484_v49  ;;  %v505_v8 = vadd.f32 %v495_v28, %v364_v13  ;;  %v506_v9 = vadd.f32 %v496_v29, %v365_v15 }
  0xd4   :  { %v507_v41 = vadd.f32 %v497_v30, %v366_v16  ;;  %v508_v42 = vadd.f32 %v498_v34, %v367_v19  ;;  %v509_v10 = vadd.f32 %v499_v21, %v368_v20  ;;  %v510_v11 = vadd.f32 %v500_v22, %v369_v23 }
  0xd5   :  { %v511_v43 = vadd.f32 %v501_v37, %v370_v17  ;;  %v512_v44 = vadd.f32 %v502_v38, %v371_v25  ;;  %v513_v45 = vadd.f32 %v503_v39, %v372_v26  ;;  %v514_v12 = vadd.f32 %v504_v7, %v373_v27 }
  0xd6   :  { %v611_v46 = vpack.c.bf16 %v506_v9, %v505_v8  ;;  %v612_v47 = vpack.c.bf16 %v508_v42, %v507_v41  ;;  %v613_v31 = vpack.c.bf16 %v510_v11, %v509_v10 }
  0xd7   :  { %v614_v32 = vpack.c.bf16 %v512_v44, %v511_v43  ;;  %v615_v33 = vpack.c.bf16 %v514_v12, %v513_v45 }
  0xd8   :  { %v545_v35 = vrot.slane %v611_v46, %v828_v50  ;;  %v552_v36 = vrot.slane %v612_v47, %v828_v50  ;;  %v559_v40 = vrot.slane %v613_v31, %v828_v50 }
  0xd9   :  { %v566_v48 = vrot.slane %v614_v32, %v828_v50  ;;  %v591_v49 = vrot.slane %v615_v33, %v828_v50 }
  0xda   :  { %v567_v51 = vcombine.low %v545_v35, %v552_v36 }
  0xdb   :  { %v568_v52 = vcombine.low %v559_v40, %v566_v48  ;;  %616 = vst.sshfl [vmem:[%s846_s3 + $0x8] sm:$0x5 pattern:$0x73625140] %v591_v49 }
  0xdc   :  { %v575_v53 = vrot.slane %v567_v51, %v828_v50 }
  0xdd   :  { %v582_v54 = vrot.slane %v568_v52, %v828_v50 }
  0xdf   :  { %v583_v55 = vcombine.low %v575_v53, %v582_v54 }
  0xe1   :  { %601 = vst [vmem:[%s846_s3] sm:$0xff] %v583_v55 }
  0xe2   :  { %607 = vsyncpa [#allocation3], 1 }

// kernel: nn_policy_forward.3
= control target key start
LH: loop header
LB: loop body
LE: loop exit
PB: predicated region body
PF: predicated region fallthrough
CT: control target
= control target key end

     0   :  { %17 = vsyncpa [#allocation3], 0  ;;  %s11954_s0 = inlined_call_operand.vmem [shape: bf16[2,1280], index: 0, kind: input, shape index: {}]   ;;  %s11955_s1 = inlined_call_operand.hbm [shape: bf16[1280,512], index: 1, kind: input, shape index: {}]   ;;  %s11956_s2 = inlined_call_operand.hbm [shape: f32[1,512], index: 2, kind: input, shape index: {}]   ;;  %s11957_s3 = inlined_call_operand.hbm [shape: bf16[512,256], index: 3, kind: input, shape index: {}]   ;;  %s11958_s4 = inlined_call_operand.hbm [shape: f32[1,256], index: 4, kind: input, shape index: {}]   ;;  %s11959_s5 = inlined_call_operand.hbm [shape: bf16[1280,1024], index: 5, kind: input, shape index: {}]   ;;  %s11960_s6 = inlined_call_operand.hbm [shape: f32[1,1024], index: 6, kind: input, shape index: {}]   ;;  %s11961_s7 = inlined_call_operand.hbm [shape: bf16[1024,256], index: 7, kind: input, shape index: {}]   ;;  %s11962_s8 = inlined_call_operand.hbm [shape: f32[1,256], index: 8, kind: input, shape index: {}]   ;;  %s11963_s9 = inlined_call_operand.vmem [shape: bf16[256,128], index: 9, kind: input, shape index: {}]   ;;  %s11964_s10 = inlined_call_operand.vmem [shape: bf16[256,128], index: 10, kind: input, shape index: {}]   ;;  %s11965_s11 = inlined_call_operand.vmem [shape: f32[1,128], index: 11, kind: input, shape index: {}]   ;;  %s11966_s12 = inlined_call_operand.vmem [shape: f32[2,128], index: 12, kind: output, shape index: {}]  }
   0x1   :  { %18 = vsyncpa [#allocation5], 0 }
   0x2   :  { %19 = vsyncpa [#allocation8], 0 }
   0x3   :  { %20 = vsyncpa [#allocation11], 0 }
   0x4   :  { %21 = vsyncpa [#allocation14], 0  ;;  %s11483_s21 = smov [#allocation4]   ;;  %s11484_s23 = smov [#allocation7]  }
   0x5   :  { %s42_s22 = sshll.u32 %s11483_s21, 4  ;;  %s64_s24 = sshll.u32 %s11484_s23, 4  ;;  %s43_s22 = int_to_ptr.vmem [resolvable:$true] %s42_s22  ;;  %s65_s24 = int_to_ptr.vmem [resolvable:$true] %s64_s24 }
   0x6   :  { %s11297_s27 = scalar_lea.hbm %s11956_s2, 64 }
   0x7   :  { %p11298_p0 = scmp.ne.s32.totalorder %s11956_s2, %s11297_s27  ;;  %p11301_p1 = scmp.lt.u32.totalorder %s11297_s27, %s11956_s2 }
   0x9   :  { %p11303_p2 = pnand %p11301_p1, %p11298_p0 }
   0xb   :  { %11306 = shalt.err (!%p11303_p2)
}
   0xc   :  { %s11307_s14 = scalar_lea.vmem %s43_s22, 64  ;;  %p11312_p4 = scmp.lt.s32.totalorder %s43_s22, %s43_s22 }
   0xd   :  { %p11308_p3 = scmp.ne.s32.totalorder %s43_s22, %s11307_s14  ;;  %p11313_p5 = scmp.lt.s32.totalorder %s11307_s14, %s11307_s14 }
   0xf   :  { %p11314_p6 = por %p11313_p5, %p11312_p4 }
  0x11   :  { %p11315_p7 = pnand %p11314_p6, %p11308_p3 }
  0x13   :  { %11318 = shalt.err (!%p11315_p7)
}
  0x14   :  { %45 = dma.hbm_to_vmem [thread:$0]  %s11956_s2, 64, %s43_s22, [#allocation5]  }
  0x15   :  { %s11319_s19 = scalar_lea.hbm %s11958_s4, 32 }
  0x16   :  { %p11320_p8 = scmp.ne.s32.totalorder %s11958_s4, %s11319_s19  ;;  %p11323_p9 = scmp.lt.u32.totalorder %s11319_s19, %s11958_s4 }
  0x18   :  { %p11325_p10 = pnand %p11323_p9, %p11320_p8 }
  0x1a   :  { %11328 = shalt.err (!%p11325_p10)
}
  0x1b   :  { %s11329_s26 = scalar_lea.vmem %s65_s24, 32  ;;  %p11334_p12 = scmp.lt.s32.totalorder %s65_s24, %s65_s24 }
  0x1c   :  { %p11330_p11 = scmp.ne.s32.totalorder %s65_s24, %s11329_s26  ;;  %p11335_p13 = scmp.lt.s32.totalorder %s11329_s26, %s11329_s26 }
  0x1e   :  { %p11336_p0 = por %p11335_p13, %p11334_p12 }
  0x20   :  { %p11337_p1 = pnand %p11336_p0, %p11330_p11 }
  0x22   :  { %11340 = shalt.err (!%p11337_p1)
}
  0x23   :  { %67 = dma.hbm_to_vmem [thread:$0]  %s11958_s4, 32, %s65_s24, [#allocation8]  }
  0x24   :  { %s11485_s27 = smov [#allocation10]   ;;  %s11486_s29 = smov [#allocation2]  }
  0x25   :  { %s86_s28 = sshll.u32 %s11485_s27, 4  ;;  %s29_s30 = sshll.u32 %s11486_s29, 4  ;;  %s87_s28 = int_to_ptr.vmem [resolvable:$true] %s86_s28  ;;  %s11587_s30 = int_to_ptr.vmem [resolvable:$true] %s29_s30 }
  0x26   :  { %s11341_s15 = scalar_lea.hbm %s11960_s6, 128 }
  0x27   :  { %p11342_p2 = scmp.ne.s32.totalorder %s11960_s6, %s11341_s15  ;;  %p11345_p3 = scmp.lt.u32.totalorder %s11341_s15, %s11960_s6 }
  0x29   :  { %p11347_p4 = pnand %p11345_p3, %p11342_p2 }
  0x2b   :  { %11350 = shalt.err (!%p11347_p4)
}
  0x2c   :  { %s11351_s4 = scalar_lea.vmem %s87_s28, 128  ;;  %p11356_p6 = scmp.lt.s32.totalorder %s87_s28, %s87_s28 }
  0x2d   :  { %p11352_p5 = scmp.ne.s32.totalorder %s87_s28, %s11351_s4  ;;  %p11357_p7 = scmp.lt.s32.totalorder %s11351_s4, %s11351_s4 }
  0x2f   :  { %p11358_p8 = por %p11357_p7, %p11356_p6 }
  0x31   :  { %p11359_p9 = pnand %p11358_p8, %p11352_p5 }
  0x33   :  { %11362 = shalt.err (!%p11359_p9)
}
  0x34   :  { %89 = dma.hbm_to_vmem [thread:$0]  %s11960_s6, 128, %s87_s28, [#allocation11]  }
  0x35   :  { %s11363_s25 = scalar_lea.hbm %s11955_s1, 40960 }
  0x36   :  { %p11364_p10 = scmp.ne.s32.totalorder %s11955_s1, %s11363_s25  ;;  %p11367_p11 = scmp.lt.u32.totalorder %s11363_s25, %s11955_s1 }
  0x38   :  { %p11369_p12 = pnand %p11367_p11, %p11364_p10 }
  0x3a   :  { %11372 = shalt.err (!%p11369_p12)
}
  0x3b   :  { %s11373_s29 = scalar_lea.vmem %s11587_s30, 40960  ;;  %p11378_p0 = scmp.lt.s32.totalorder %s11587_s30, %s11587_s30 }
  0x3c   :  { %p11374_p13 = scmp.ne.s32.totalorder %s11587_s30, %s11373_s29  ;;  %p11379_p1 = scmp.lt.s32.totalorder %s11373_s29, %s11373_s29 }
  0x3e   :  { %p11380_p2 = por %p11379_p1, %p11378_p0 }
  0x40   :  { %p11381_p3 = pnand %p11380_p2, %p11374_p13 }
  0x42   :  { %11384 = shalt.err (!%p11381_p3)
}
  0x43   :  { %s11487_s6 = smov 256   ;;  %s11488_s28 = smov 16  }
  0x44   :  { %35 = dma.hbm_to_vmem [thread:$0]  %s11955_s1, 40960, %s11587_s30, [#allocation3], %s11487_s6, %s11487_s6, %s11488_s28  }
  0x45   :  { %s11489_s15 = smov [#allocation6]   ;;  %s11385_s19 = scalar_lea.hbm %s11957_s3, 8192 }
  0x46   :  { %s51_s16 = sshll.u32 %s11489_s15, 4  ;;  %p11386_p4 = scmp.ne.s32.totalorder %s11957_s3, %s11385_s19  ;;  %s52_s16 = int_to_ptr.vmem [resolvable:$true] %s51_s16 }
  0x47   :  { %p11389_p5 = scmp.lt.u32.totalorder %s11385_s19, %s11957_s3 }
  0x49   :  { %p11391_p6 = pnand %p11389_p5, %p11386_p4 }
  0x4b   :  { %11394 = shalt.err (!%p11391_p6)
}
  0x4c   :  { %s11395_s23 = scalar_lea.vmem %s52_s16, 8192  ;;  %p11400_p8 = scmp.lt.s32.totalorder %s52_s16, %s52_s16 }
  0x4d   :  { %p11396_p7 = scmp.ne.s32.totalorder %s52_s16, %s11395_s23  ;;  %p11401_p9 = scmp.lt.s32.totalorder %s11395_s23, %s11395_s23 }
  0x4f   :  { %p11402_p10 = por %p11401_p9, %p11400_p8 }
  0x51   :  { %p11403_p11 = pnand %p11402_p10, %p11396_p7 }
  0x53   :  { %11406 = shalt.err (!%p11403_p11)
}
  0x54   :  { %s11490_s1 = smov 128   ;;  %s11491_s30 = smov 8  }
  0x55   :  { %57 = dma.hbm_to_vmem [thread:$0]  %s11957_s3, 8192, %s52_s16, [#allocation5], %s11490_s1, %s11490_s1, %s11491_s30  }
  0x56   :  { %s11492_s2 = smov [#allocation9]   ;;  %s11407_s6 = scalar_lea.hbm %s11959_s5, 81920 }
  0x57   :  { %s73_s22 = sshll.u32 %s11492_s2, 4  ;;  %p11408_p12 = scmp.ne.s32.totalorder %s11959_s5, %s11407_s6  ;;  %s74_s22 = int_to_ptr.vmem [resolvable:$true] %s73_s22 }
  0x58   :  { %p11411_p13 = scmp.lt.u32.totalorder %s11407_s6, %s11959_s5 }
  0x5a   :  { %p11413_p0 = pnand %p11411_p13, %p11408_p12 }
  0x5c   :  { %11416 = shalt.err (!%p11413_p0)
}
  0x5d   :  { %s11417_s17 = scalar_lea.vmem %s74_s22, 81920  ;;  %p11422_p2 = scmp.lt.s32.totalorder %s74_s22, %s74_s22 }
  0x5e   :  { %p11418_p1 = scmp.ne.s32.totalorder %s74_s22, %s11417_s17  ;;  %p11423_p3 = scmp.lt.s32.totalorder %s11417_s17, %s11417_s17 }
  0x60   :  { %p11424_p4 = por %p11423_p3, %p11422_p2 }
  0x62   :  { %p11425_p5 = pnand %p11424_p4, %p11418_p1 }
  0x64   :  { %11428 = shalt.err (!%p11425_p5)
}
  0x65   :  { %s11493_s3 = smov 512   ;;  %s11494_s16 = smov 32  }
  0x66   :  { %79 = dma.hbm_to_vmem [thread:$0]  %s11959_s5, 81920, %s74_s22, [#allocation8], %s11493_s3, %s11493_s3, %s11494_s16  }
  0x67   :  { %s11495_s4 = smov [#allocation12]   ;;  %s11496_s20 = smov [#allocation13]  }
  0x68   :  { %s95_s24 = sshll.u32 %s11495_s4, 4  ;;  %s108_s21 = sshll.u32 %s11496_s20, 4  ;;  %s96_s24 = int_to_ptr.vmem [resolvable:$true] %s95_s24  ;;  %s109_s21 = int_to_ptr.vmem [resolvable:$true] %s108_s21 }
  0x69   :  { %s11429_s26 = scalar_lea.hbm %s11961_s7, 16384 }
  0x6a   :  { %p11430_p6 = scmp.ne.s32.totalorder %s11961_s7, %s11429_s26  ;;  %p11433_p7 = scmp.lt.u32.totalorder %s11429_s26, %s11961_s7 }
  0x6c   :  { %p11435_p8 = pnand %p11433_p7, %p11430_p6 }
  0x6e   :  { %11438 = shalt.err (!%p11435_p8)
}
  0x6f   :  { %s11439_s5 = scalar_lea.vmem %s96_s24, 16384  ;;  %p11444_p10 = scmp.lt.s32.totalorder %s96_s24, %s96_s24 }
  0x70   :  { %p11440_p9 = scmp.ne.s32.totalorder %s96_s24, %s11439_s5  ;;  %p11445_p11 = scmp.lt.s32.totalorder %s11439_s5, %s11439_s5 }
  0x72   :  { %p11446_p12 = por %p11445_p11, %p11444_p10 }
  0x74   :  { %p11447_p13 = pnand %p11446_p12, %p11440_p9 }
  0x76   :  { %11450 = shalt.err (!%p11447_p13)
}
  0x77   :  { %101 = dma.hbm_to_vmem [thread:$0]  %s11961_s7, 16384, %s96_s24, [#allocation11], %s11490_s1, %s11490_s1, %s11491_s30  }
  0x78   :  { %s11451_s15 = scalar_lea.hbm %s11962_s8, 32 }
  0x79   :  { %p11452_p0 = scmp.ne.s32.totalorder %s11962_s8, %s11451_s15  ;;  %p11455_p1 = scmp.lt.u32.totalorder %s11451_s15, %s11962_s8 }
  0x7b   :  { %p11457_p2 = pnand %p11455_p1, %p11452_p0 }
  0x7d   :  { %11460 = shalt.err (!%p11457_p2)
}
  0x7e   :  { %s11461_s19 = scalar_lea.vmem %s109_s21, 32  ;;  %p11466_p4 = scmp.lt.s32.totalorder %s109_s21, %s109_s21 }
  0x7f   :  { %p11462_p3 = scmp.ne.s32.totalorder %s109_s21, %s11461_s19  ;;  %p11467_p5 = scmp.lt.s32.totalorder %s11461_s19, %s11461_s19 }
  0x81   :  { %p11468_p6 = por %p11467_p5, %p11466_p4 }
  0x83   :  { %p11469_p7 = pnand %p11468_p6, %p11462_p3 }
  0x85   :  { %11472 = shalt.err (!%p11469_p7)
}
  0x86   :  { %111 = dma.hbm_to_vmem [thread:$0]  %s11962_s8, 32, %s109_s21, [#allocation14]  }
  0x87   :  { %11473 = dma.done.wait [#allocation3], 40960  }
  0x88   :  { %11474 = vsyncadd [#allocation3], 4294926336 }
  0x89   :  { %11475 = dma.done.wait [#allocation5], 8256  }
  0x8a   :  { %11476 = vsyncadd [#allocation5], 4294959040 }
  0x8b   :  { %11477 = dma.done.wait [#allocation8], 81952  }
  0x8c   :  { %11478 = vsyncadd [#allocation8], 4294885344 }
  0x8d   :  { %11479 = dma.done.wait [#allocation11], 16512  }
  0x8e   :  { %11480 = vsyncadd [#allocation11], 4294950784 }
  0x8f   :  { %11481 = dma.done.wait [#allocation14], 32  }
  0x90   :  { %11482 = vsyncadd [#allocation14], 4294967264  ;;  %v10463_v0 = vld [vmem:[#allocation2 + $0x4] ss:$16 sps:$4 sm:$0xff]   ;;  %v10465_v1 = vld [vmem:[#allocation2 + $0xc] ss:$16 sps:$4 sm:$0xff]   ;;  %v467_v36 = vlaneseq }
  0x91   :  { %2170 = vmatprep.subr.bf16.mxu0 %v10463_v0  ;;  %v10467_v2 = vld [vmem:[#allocation2] ss:$16 sps:$4 sm:$0xff]   ;;  %v10468_v3 = vld [vmem:[#allocation2 + $0x8] ss:$16 sps:$4 sm:$0xff]   ;;  %2375 = vmatprep.subr.bf16.mxu1 %v10465_v1  ;;  %v10469_v4 = vld [vmem:[#allocation2 + $0x24] ss:$16 sps:$4 sm:$0xff]  }
  0x92   :  { %2171 = vmatpush1.bf16.msra.mxu0 %v10467_v2  ;;  %2376 = vmatpush1.bf16.msra.mxu1 %v10468_v3  ;;  %v10471_v5 = vld [vmem:[#allocation2 + $0x2c] ss:$16 sps:$4 sm:$0xff]   ;;  %v10473_v6 = vld [vmem:[#allocation2 + $0x20] ss:$16 sps:$4 sm:$0xff]   ;;  %v10474_v7 = vld [vmem:[#allocation2 + $0x28] ss:$16 sps:$4 sm:$0xff]  }
  0x93   :  { %2172 = vmatprep.subr.bf16.mxu0 %v10469_v4  ;;  %2377 = vmatprep.subr.bf16.mxu1 %v10471_v5  ;;  %v10475_v8 = vld [vmem:[#allocation2 + $0x44] ss:$16 sps:$4 sm:$0xff]   ;;  %v10477_v9 = vld [vmem:[#allocation2 + $0x4c] ss:$16 sps:$4 sm:$0xff]   ;;  %v10479_v10 = vld [vmem:[#allocation2 + $0x40] ss:$16 sps:$4 sm:$0xff]  }
  0x94   :  { %v10480_v11 = vld [vmem:[#allocation2 + $0x48] ss:$16 sps:$4 sm:$0xff]   ;;  %v10481_v12 = vld [vmem:[#allocation2 + $0x64] ss:$16 sps:$4 sm:$0xff]   ;;  %v10483_v13 = vld [vmem:[#allocation2 + $0x6c] ss:$16 sps:$4 sm:$0xff]  }
  0x95   :  { %v10485_v14 = vld [vmem:[#allocation2 + $0x60] ss:$16 sps:$4 sm:$0xff]   ;;  %v10486_v15 = vld [vmem:[#allocation2 + $0x68] ss:$16 sps:$4 sm:$0xff]   ;;  %v10487_v16 = vld [vmem:[#allocation2 + $0x84] ss:$16 sps:$4 sm:$0xff]  }
  0x96   :  { %2173 = vmatpush1.bf16.msra.mxu0 %v10473_v6  ;;  %2378 = vmatpush1.bf16.msra.mxu1 %v10474_v7  ;;  %v10489_v17 = vld [vmem:[#allocation2 + $0x8c] ss:$16 sps:$4 sm:$0xff]   ;;  %v10491_v18 = vld [vmem:[#allocation2 + $0x80] ss:$16 sps:$4 sm:$0xff]   ;;  %v10492_v19 = vld [vmem:[#allocation2 + $0x88] ss:$16 sps:$4 sm:$0xff]  }
  0x97   :  { %2174 = vmatprep.subr.bf16.mxu0 %v10475_v8  ;;  %2379 = vmatprep.subr.bf16.mxu1 %v10477_v9  ;;  %v10493_v20 = vld [vmem:[#allocation2 + $0xa4] ss:$16 sps:$4 sm:$0xff]   ;;  %v10495_v21 = vld [vmem:[#allocation2 + $0xac] ss:$16 sps:$4 sm:$0xff]   ;;  %v10497_v22 = vld [vmem:[#allocation2 + $0xa0] ss:$16 sps:$4 sm:$0xff]  }
  0x98   :  { %v10498_v23 = vld [vmem:[#allocation2 + $0xa8] ss:$16 sps:$4 sm:$0xff]   ;;  %v10499_v24 = vld [vmem:[#allocation2 + $0xc4] ss:$16 sps:$4 sm:$0xff]   ;;  %v10501_v25 = vld [vmem:[#allocation2 + $0xcc] ss:$16 sps:$4 sm:$0xff]  }
  0x99   :  { %v10503_v26 = vld [vmem:[#allocation2 + $0xc0] ss:$16 sps:$4 sm:$0xff]   ;;  %v10504_v27 = vld [vmem:[#allocation2 + $0xc8] ss:$16 sps:$4 sm:$0xff]   ;;  %v10505_v28 = vld [vmem:[#allocation2 + $0xe4] ss:$16 sps:$4 sm:$0xff]  }
  0x9a   :  { %2175 = vmatpush1.bf16.msra.mxu0 %v10479_v10  ;;  %2380 = vmatpush1.bf16.msra.mxu1 %v10480_v11  ;;  %v10507_v29 = vld [vmem:[#allocation2 + $0xec] ss:$16 sps:$4 sm:$0xff]   ;;  %v10509_v30 = vld [vmem:[#allocation2 + $0xe0] ss:$16 sps:$4 sm:$0xff]   ;;  %v10510_v31 = vld [vmem:[#allocation2 + $0xe8] ss:$16 sps:$4 sm:$0xff]  }
  0x9b   :  { %2176 = vmatprep.subr.bf16.mxu0 %v10481_v12  ;;  %2381 = vmatprep.subr.bf16.mxu1 %v10483_v13  ;;  %v10511_v32 = vld [vmem:[#allocation2 + $0x104] ss:$16 sps:$4 sm:$0xff]   ;;  %v10513_v33 = vld [vmem:[#allocation2 + $0x10c] ss:$16 sps:$4 sm:$0xff]   ;;  %v10515_v34 = vld [vmem:[#allocation2 + $0x100] ss:$16 sps:$4 sm:$0xff]  }
  0x9c   :  { %v10516_v35 = vld [vmem:[#allocation2 + $0x108] ss:$16 sps:$4 sm:$0xff]   ;;  %v11497_v37 = vmov 1966171168   ;;  %v10517_v39 = vld [vmem:[#allocation2 + $0x124] ss:$16 sps:$4 sm:$0xff]  }
  0x9d   :  { %v491_v38 = vunpack.c.l.s4 %v11497_v37  ;;  %v10519_v40 = vld [vmem:[#allocation2 + $0x12c] ss:$16 sps:$4 sm:$0xff]   ;;  %v10521_v41 = vld [vmem:[#allocation2 + $0x120] ss:$16 sps:$4 sm:$0xff]   ;;  %v11672_v42 = vshrl.u32 %v467_v36, 7 }
  0x9e   :  { %2177 = vmatpush1.bf16.msra.mxu0 %v10485_v14  ;;  %2382 = vmatpush1.bf16.msra.mxu1 %v10486_v15  ;;  %v10522_v44 = vld [vmem:[#allocation2 + $0x128] ss:$16 sps:$4 sm:$0xff]   ;;  %v10523_v45 = vld [vmem:[#allocation2 + $0x144] ss:$16 sps:$4 sm:$0xff]   ;;  %v10525_v46 = vld [vmem:[#allocation2 + $0x14c] ss:$16 sps:$4 sm:$0xff]  }
  0x9f   :  { %2178 = vmatprep.subr.bf16.mxu0 %v10487_v16  ;;  %2383 = vmatprep.subr.bf16.mxu1 %v10489_v17  ;;  %v492_v43 = vunpack.c.0.s8 %v491_v38  ;;  %v10527_v47 = vld [vmem:[#allocation2 + $0x140] ss:$16 sps:$4 sm:$0xff]   ;;  %v10528_v48 = vld [vmem:[#allocation2 + $0x148] ss:$16 sps:$4 sm:$0xff]   ;;  %v10529_v50 = vld [vmem:[#allocation2 + $0x164] ss:$16 sps:$4 sm:$0xff]  }
  0xa0   :  { %v10531_v51 = vld [vmem:[#allocation2 + $0x16c] ss:$16 sps:$4 sm:$0xff]   ;;  %v11680_v52 = vld [vmem:[%s11954_s0] sm:$0xff]  ;;  %v10534_v55 = vld [vmem:[#allocation2 + $0x168] ss:$16 sps:$4 sm:$0xff]  }
  0xa1   :  { %v11675_v49 = vsub.s32 %v492_v43, %v11672_v42  ;;  %v10533_v53 = vld [vmem:[#allocation2 + $0x160] ss:$16 sps:$4 sm:$0xff]   ;;  %v10535_v56 = vld [vmem:[#allocation2 + $0x184] ss:$16 sps:$4 sm:$0xff]   ;;  %v10537_v57 = vld [vmem:[#allocation2 + $0x18c] ss:$16 sps:$4 sm:$0xff]  }
  0xa2   :  { %2179 = vmatpush1.bf16.msra.mxu0 %v10491_v18  ;;  %2384 = vmatpush1.bf16.msra.mxu1 %v10492_v19  ;;  %v10539_v59 = vld [vmem:[#allocation2 + $0x180] ss:$16 sps:$4 sm:$0xff]   ;;  %v10540_v61 = vld [vmem:[#allocation2 + $0x188] ss:$16 sps:$4 sm:$0xff]   ;;  %v10541_v62 = vld [vmem:[#allocation2 + $0x1a4] ss:$16 sps:$4 sm:$0xff]  }
  0xa3   :  { %2180 = vmatprep.subr.bf16.mxu0 %v10493_v20  ;;  %2385 = vmatprep.subr.bf16.mxu1 %v10495_v21  ;;  %v496_v54 = vrot.slane %v11680_v52, %v11675_v49  ;;  %v10543_v63 = vld [vmem:[#allocation2 + $0x1ac] ss:$16 sps:$4 sm:$0xff]   ;;  %v10545_v0 = vld [vmem:[#allocation2 + $0x1a0] ss:$16 sps:$4 sm:$0xff]   ;;  %v10546_v1 = vld [vmem:[#allocation2 + $0x1a8] ss:$16 sps:$4 sm:$0xff]  }
  0xa4   :  { %v10547_v2 = vld [vmem:[#allocation2 + $0x1c4] ss:$16 sps:$4 sm:$0xff]   ;;  %v10549_v3 = vld [vmem:[#allocation2 + $0x1cc] ss:$16 sps:$4 sm:$0xff]   ;;  %v10551_v4 = vld [vmem:[#allocation2 + $0x1c0] ss:$16 sps:$4 sm:$0xff]  }
  0xa5   :  { %v504_v58 = vcombine.high %v496_v54, %v496_v54  ;;  %v10552_v5 = vld [vmem:[#allocation2 + $0x1c8] ss:$16 sps:$4 sm:$0xff]   ;;  %v10553_v6 = vld [vmem:[#allocation2 + $0x1e4] ss:$16 sps:$4 sm:$0xff]   ;;  %v10555_v7 = vld [vmem:[#allocation2 + $0x1ec] ss:$16 sps:$4 sm:$0xff]   ;;  %v11690_v13 = vrot.slane %v496_v54, %v11675_v49 }
  0xa6   :  { %2181 = vmatpush1.bf16.msra.mxu0 %v10497_v22  ;;  %2386 = vmatpush1.bf16.msra.mxu1 %v10498_v23  ;;  %v10557_v8 = vld [vmem:[#allocation2 + $0x1e0] ss:$16 sps:$4 sm:$0xff]   ;;  %v10558_v9 = vld [vmem:[#allocation2 + $0x1e8] ss:$16 sps:$4 sm:$0xff]   ;;  %v10561_v10 = vld [vmem:[#allocation2 + $0x204] ss:$16 sps:$4 sm:$0xff]  }
  0xa7   :  { %2182 = vmatprep.subr.bf16.mxu0 %v10499_v24  ;;  %2387 = vmatprep.subr.bf16.mxu1 %v10501_v25  ;;  %v11685_v60 = vrot.slane %v504_v58, %v11675_v49  ;;  %v10564_v11 = vld [vmem:[#allocation2 + $0x20c] ss:$16 sps:$4 sm:$0xff]   ;;  %v10559_v12 = vld [vmem:[#allocation2 + $0x200] ss:$16 sps:$4 sm:$0xff]   ;;  %v10562_v14 = vld [vmem:[#allocation2 + $0x208] ss:$16 sps:$4 sm:$0xff]  }
  0xa8   :  { %v10567_v15 = vld [vmem:[#allocation2 + $0x224] ss:$16 sps:$4 sm:$0xff]   ;;  %v10570_v16 = vld [vmem:[#allocation2 + $0x22c] ss:$16 sps:$4 sm:$0xff]   ;;  %v10565_v18 = vld [vmem:[#allocation2 + $0x220] ss:$16 sps:$4 sm:$0xff]  }
  0xa9   :  { %2202 = vmatprep.mubr.bf16.mxu0 %v11685_v60  ;;  %2407 = vmatprep.mubr.bf16.mxu1 %v11685_v60  ;;  %v11694_v17 = vcombine.high %v11685_v60, %v11685_v60  ;;  %v10568_v19 = vld [vmem:[#allocation2 + $0x228] ss:$16 sps:$4 sm:$0xff]   ;;  %v10573_v20 = vld [vmem:[#allocation2 + $0x244] ss:$16 sps:$4 sm:$0xff]   ;;  %v10576_v21 = vld [vmem:[#allocation2 + $0x24c] ss:$16 sps:$4 sm:$0xff]  }
  0xaa   :  { %2183 = vmatpush1.bf16.msra.mxu0 %v10503_v26  ;;  %2388 = vmatpush1.bf16.msra.mxu1 %v10504_v27  ;;  %v10571_v22 = vld [vmem:[#allocation2 + $0x240] ss:$16 sps:$4 sm:$0xff]   ;;  %v10574_v23 = vld [vmem:[#allocation2 + $0x248] ss:$16 sps:$4 sm:$0xff]   ;;  %v10579_v24 = vld [vmem:[#allocation2 + $0x264] ss:$16 sps:$4 sm:$0xff]  }
  0xab   :  { %2184 = vmatprep.subr.bf16.mxu0 %v10505_v28  ;;  %2389 = vmatprep.subr.bf16.mxu1 %v10507_v29  ;;  %v10582_v25 = vld [vmem:[#allocation2 + $0x26c] ss:$16 sps:$4 sm:$0xff]   ;;  %v10577_v26 = vld [vmem:[#allocation2 + $0x260] ss:$16 sps:$4 sm:$0xff]   ;;  %v10580_v27 = vld [vmem:[#allocation2 + $0x268] ss:$16 sps:$4 sm:$0xff]  }
  0xac   :  { %v10585_v28 = vld [vmem:[#allocation2 + $0x284] ss:$16 sps:$4 sm:$0xff]   ;;  %v10588_v29 = vld [vmem:[#allocation2 + $0x28c] ss:$16 sps:$4 sm:$0xff]   ;;  %v10595_v38 = vld [vmem:[#allocation2 + $0x2c0] ss:$16 sps:$4 sm:$0xff]  }
  0xad   :  { %v10597_v36 = vld [vmem:[#allocation2 + $0x2c4] ss:$16 sps:$4 sm:$0xff]   ;;  %v10600_v37 = vld [vmem:[#allocation2 + $0x2cc] ss:$16 sps:$4 sm:$0xff]   ;;  %v10601_v43 = vld [vmem:[#allocation2 + $0x2e0] ss:$16 sps:$4 sm:$0xff]  }
  0xae   :  { %2185 = vmatpush1.bf16.msra.mxu0 %v10509_v30  ;;  %2390 = vmatpush1.bf16.msra.mxu1 %v10510_v31  ;;  %v10583_v30 = vld [vmem:[#allocation2 + $0x280] ss:$16 sps:$4 sm:$0xff]   ;;  %v10586_v31 = vld [vmem:[#allocation2 + $0x288] ss:$16 sps:$4 sm:$0xff]  }
  0xaf   :  { %2186 = vmatprep.subr.bf16.mxu0 %v10511_v32  ;;  %2391 = vmatprep.subr.bf16.mxu1 %v10513_v33  ;;  %v10591_v32 = vld [vmem:[#allocation2 + $0x2a4] ss:$16 sps:$4 sm:$0xff]   ;;  %v10594_v33 = vld [vmem:[#allocation2 + $0x2ac] ss:$16 sps:$4 sm:$0xff]   ;;  %v10616_v54 = vld [vmem:[#allocation2 + $0x328] ss:$16 sps:$4 sm:$0xff]  }
  0xb0   :  { %v10622_v58 = vld [vmem:[#allocation2 + $0x348] ss:$16 sps:$4 sm:$0xff]  }
  0xb2   :  { %2187 = vmatpush1.bf16.msra.mxu0 %v10515_v34  ;;  %2392 = vmatpush1.bf16.msra.mxu1 %v10516_v35  ;;  %v10589_v34 = vld [vmem:[#allocation2 + $0x2a0] ss:$16 sps:$4 sm:$0xff]   ;;  %v10592_v35 = vld [vmem:[#allocation2 + $0x2a8] ss:$16 sps:$4 sm:$0xff]  }
  0xb3   :  { %2188 = vmatprep.subr.bf16.mxu0 %v10517_v39  ;;  %2393 = vmatprep.subr.bf16.mxu1 %v10519_v40  ;;  %v10598_v39 = vld [vmem:[#allocation2 + $0x2c8] ss:$16 sps:$4 sm:$0xff]   ;;  %v10603_v40 = vld [vmem:[#allocation2 + $0x2e4] ss:$16 sps:$4 sm:$0xff]  }
  0xb6   :  { %2189 = vmatpush1.bf16.msra.mxu0 %v10521_v41  ;;  %2394 = vmatpush1.bf16.msra.mxu1 %v10522_v44  ;;  %v10606_v41 = vld [vmem:[#allocation2 + $0x2ec] ss:$16 sps:$4 sm:$0xff]   ;;  %v10604_v44 = vld [vmem:[#allocation2 + $0x2e8] ss:$16 sps:$4 sm:$0xff]  }
  0xb7   :  { %2190 = vmatprep.subr.bf16.mxu0 %v10523_v45  ;;  %2395 = vmatprep.subr.bf16.mxu1 %v10525_v46  ;;  %v10609_v45 = vld [vmem:[#allocation2 + $0x304] ss:$16 sps:$4 sm:$0xff]   ;;  %v10612_v46 = vld [vmem:[#allocation2 + $0x30c] ss:$16 sps:$4 sm:$0xff]  }
  0xba   :  { %2191 = vmatpush1.bf16.msra.mxu0 %v10527_v47  ;;  %2396 = vmatpush1.bf16.msra.mxu1 %v10528_v48  ;;  %v10607_v47 = vld [vmem:[#allocation2 + $0x300] ss:$16 sps:$4 sm:$0xff]   ;;  %v10610_v48 = vld [vmem:[#allocation2 + $0x308] ss:$16 sps:$4 sm:$0xff]  }
  0xbb   :  { %2192 = vmatprep.subr.bf16.mxu0 %v10529_v50  ;;  %2397 = vmatprep.subr.bf16.mxu1 %v10531_v51  ;;  %v10615_v50 = vld [vmem:[#allocation2 + $0x324] ss:$16 sps:$4 sm:$0xff]   ;;  %v10618_v51 = vld [vmem:[#allocation2 + $0x32c] ss:$16 sps:$4 sm:$0xff]  }
  0xbe   :  { %2193 = vmatpush1.bf16.msra.mxu0 %v10533_v53  ;;  %2398 = vmatpush1.bf16.msra.mxu1 %v10534_v55  ;;  %v10613_v53 = vld [vmem:[#allocation2 + $0x320] ss:$16 sps:$4 sm:$0xff]   ;;  %v10621_v55 = vld [vmem:[#allocation2 + $0x344] ss:$16 sps:$4 sm:$0xff]  }
  0xbf   :  { %2194 = vmatprep.subr.bf16.mxu0 %v10535_v56  ;;  %2399 = vmatprep.subr.bf16.mxu1 %v10537_v57  ;;  %v10624_v56 = vld [vmem:[#allocation2 + $0x34c] ss:$16 sps:$4 sm:$0xff]   ;;  %v10619_v57 = vld [vmem:[#allocation2 + $0x340] ss:$16 sps:$4 sm:$0xff]  }
  0xc2   :  { %2195 = vmatpush1.bf16.msra.mxu0 %v10539_v59  ;;  %2400 = vmatpush1.bf16.msra.mxu1 %v10540_v61  ;;  %v10627_v59 = vld [vmem:[#allocation2 + $0x364] ss:$16 sps:$4 sm:$0xff]   ;;  %v10630_v61 = vld [vmem:[#allocation2 + $0x36c] ss:$16 sps:$4 sm:$0xff]  }
  0xc3   :  { %2196 = vmatprep.subr.bf16.mxu0 %v10541_v62  ;;  %2401 = vmatprep.subr.bf16.mxu1 %v10543_v63  ;;  %v10625_v62 = vld [vmem:[#allocation2 + $0x360] ss:$16 sps:$4 sm:$0xff]   ;;  %v10628_v63 = vld [vmem:[#allocation2 + $0x368] ss:$16 sps:$4 sm:$0xff]  }
  0xc6   :  { %2197 = vmatpush1.bf16.msra.mxu0 %v10545_v0  ;;  %2402 = vmatpush1.bf16.msra.mxu1 %v10546_v1  ;;  %v10633_v0 = vld [vmem:[#allocation2 + $0x384] ss:$16 sps:$4 sm:$0xff]   ;;  %v10636_v1 = vld [vmem:[#allocation2 + $0x38c] ss:$16 sps:$4 sm:$0xff]  }
  0xc7   :  { %2198 = vmatprep.subr.bf16.mxu0 %v10547_v2  ;;  %2403 = vmatprep.subr.bf16.mxu1 %v10549_v3  ;;  %v10631_v2 = vld [vmem:[#allocation2 + $0x380] ss:$16 sps:$4 sm:$0xff]   ;;  %v10634_v3 = vld [vmem:[#allocation2 + $0x388] ss:$16 sps:$4 sm:$0xff]  }
  0xca   :  { %2199 = vmatpush1.bf16.msra.mxu0 %v10551_v4  ;;  %2404 = vmatpush1.bf16.msra.mxu1 %v10552_v5  ;;  %v10639_v4 = vld [vmem:[#allocation2 + $0x3a4] ss:$16 sps:$4 sm:$0xff]   ;;  %v10642_v5 = vld [vmem:[#allocation2 + $0x3ac] ss:$16 sps:$4 sm:$0xff]  }
  0xcb   :  { %2200 = vmatprep.subr.bf16.mxu0 %v10553_v6  ;;  %2405 = vmatprep.subr.bf16.mxu1 %v10555_v7  ;;  %v10637_v6 = vld [vmem:[#allocation2 + $0x3a0] ss:$16 sps:$4 sm:$0xff]   ;;  %v10640_v7 = vld [vmem:[#allocation2 + $0x3a8] ss:$16 sps:$4 sm:$0xff]  }
  0xce   :  { %2201 = vmatpush1.bf16.msra.mxu0 %v10557_v8  ;;  %2406 = vmatpush1.bf16.msra.mxu1 %v10558_v9  ;;  %v10645_v8 = vld [vmem:[#allocation2 + $0x3c4] ss:$16 sps:$4 sm:$0xff]   ;;  %v10648_v9 = vld [vmem:[#allocation2 + $0x3cc] ss:$16 sps:$4 sm:$0xff]  }
  0xcf   :  { %2211 = vmatprep.subr.bf16.mxu0 %v10561_v10  ;;  %2416 = vmatprep.subr.bf16.mxu1 %v10564_v11  ;;  %v489_v10 = vcombine.high %v11680_v52, %v11680_v52  ;;  %v10643_v11 = vld [vmem:[#allocation2 + $0x3c0] ss:$16 sps:$4 sm:$0xff]  }
  0xd1   :  { %2203 = vmatmul.mubr.bf16.vlgmr.msra.gmra.mrb[0].mxu0 %v11690_v13  ;;  %2408 = vmatmul.mubr.bf16.vlgmr.msra.gmra.mrb[0].mxu1 %v11690_v13 }
  0xd2   :  { %2212 = vmatpush1.bf16.msra.mxu0 %v10559_v12  ;;  %2417 = vmatpush1.bf16.msra.mxu1 %v10562_v14  ;;  %v10646_v12 = vld [vmem:[#allocation2 + $0x3c8] ss:$16 sps:$4 sm:$0xff]   ;;  %v10651_v14 = vld [vmem:[#allocation2 + $0x3e4] ss:$16 sps:$4 sm:$0xff]  }
  0xd3   :  { %2213 = vmatprep.subr.bf16.mxu0 %v10567_v15  ;;  %2418 = vmatprep.subr.bf16.mxu1 %v10570_v16  ;;  %v10654_v15 = vld [vmem:[#allocation2 + $0x3ec] ss:$16 sps:$4 sm:$0xff]   ;;  %v11703_v16 = vrot.slane %v489_v10, %v11675_v49  ;;  %v10729_v10 = vld [vmem:[#allocation2 + $0x584] ss:$16 sps:$4 sm:$0xff]  }
  0xd4   :  { %2243 = vmatprep.mubr.bf16.mxu0 %v11694_v17  ;;  %2448 = vmatprep.mubr.bf16.mxu1 %v11694_v17 }
  0xd5   :  { %v505_v52 = vcombine.high %v11703_v16, %v11703_v16 }
  0xd6   :  { %2214 = vmatpush1.bf16.msra.mxu0 %v10565_v18  ;;  %2419 = vmatpush1.bf16.msra.mxu1 %v10568_v19  ;;  %v10649_v18 = vld [vmem:[#allocation2 + $0x3e0] ss:$16 sps:$4 sm:$0xff]   ;;  %v10652_v19 = vld [vmem:[#allocation2 + $0x3e8] ss:$16 sps:$4 sm:$0xff]  }
  0xd7   :  { %2215 = vmatprep.subr.bf16.mxu0 %v10573_v20  ;;  %2420 = vmatprep.subr.bf16.mxu1 %v10576_v21  ;;  %v10657_v20 = vld [vmem:[#allocation2 + $0x404] ss:$16 sps:$4 sm:$0xff]   ;;  %v10660_v21 = vld [vmem:[#allocation2 + $0x40c] ss:$16 sps:$4 sm:$0xff]  }
  0xda   :  { %2216 = vmatpush1.bf16.msra.mxu0 %v10571_v22  ;;  %2421 = vmatpush1.bf16.msra.mxu1 %v10574_v23  ;;  %v10655_v22 = vld [vmem:[#allocation2 + $0x400] ss:$16 sps:$4 sm:$0xff]   ;;  %v11709_v23 = vcombine.high %v11690_v13, %v11690_v13 }
  0xdb   :  { %2217 = vmatprep.subr.bf16.mxu0 %v10579_v24  ;;  %2422 = vmatprep.subr.bf16.mxu1 %v10582_v25  ;;  %v10658_v24 = vld [vmem:[#allocation2 + $0x408] ss:$16 sps:$4 sm:$0xff]   ;;  %v10663_v25 = vld [vmem:[#allocation2 + $0x424] ss:$16 sps:$4 sm:$0xff]  }
  0xde   :  { %2218 = vmatpush1.bf16.msra.mxu0 %v10577_v26  ;;  %2423 = vmatpush1.bf16.msra.mxu1 %v10580_v27  ;;  %v10666_v26 = vld [vmem:[#allocation2 + $0x42c] ss:$16 sps:$4 sm:$0xff]   ;;  %v11712_v27 = vrot.slane %v505_v52, %v11675_v49 }
  0xdf   :  { %2219 = vmatprep.subr.bf16.mxu0 %v10585_v28  ;;  %2424 = vmatprep.subr.bf16.mxu1 %v10588_v29  ;;  %v10661_v28 = vld [vmem:[#allocation2 + $0x420] ss:$16 sps:$4 sm:$0xff]   ;;  %v10664_v29 = vld [vmem:[#allocation2 + $0x428] ss:$16 sps:$4 sm:$0xff]   ;;  %v10744_v52 = vld [vmem:[#allocation2 + $0x5cc] ss:$16 sps:$4 sm:$0xff]  }
  0xe2   :  { %2220 = vmatpush1.bf16.msra.mxu0 %v10583_v30  ;;  %2425 = vmatpush1.bf16.msra.mxu1 %v10586_v31  ;;  %v10669_v30 = vld [vmem:[#allocation2 + $0x444] ss:$16 sps:$4 sm:$0xff]   ;;  %v10672_v31 = vld [vmem:[#allocation2 + $0x44c] ss:$16 sps:$4 sm:$0xff]  }
  0xe3   :  { %2221 = vmatprep.subr.bf16.mxu0 %v10591_v32  ;;  %2426 = vmatprep.subr.bf16.mxu1 %v10594_v33  ;;  %v10667_v32 = vld [vmem:[#allocation2 + $0x440] ss:$16 sps:$4 sm:$0xff]   ;;  %v10670_v33 = vld [vmem:[#allocation2 + $0x448] ss:$16 sps:$4 sm:$0xff]  }
  0xe6   :  { %2222 = vmatpush1.bf16.msra.mxu0 %v10589_v34  ;;  %2427 = vmatpush1.bf16.msra.mxu1 %v10592_v35  ;;  %v10675_v34 = vld [vmem:[#allocation2 + $0x464] ss:$16 sps:$4 sm:$0xff]   ;;  %v10678_v35 = vld [vmem:[#allocation2 + $0x46c] ss:$16 sps:$4 sm:$0xff]  }
  0xe7   :  { %2223 = vmatprep.subr.bf16.mxu0 %v10597_v36  ;;  %2428 = vmatprep.subr.bf16.mxu1 %v10600_v37  ;;  %v10673_v36 = vld [vmem:[#allocation2 + $0x460] ss:$16 sps:$4 sm:$0xff]   ;;  %v10676_v37 = vld [vmem:[#allocation2 + $0x468] ss:$16 sps:$4 sm:$0xff]  }
  0xea   :  { %2224 = vmatpush1.bf16.msra.mxu0 %v10595_v38  ;;  %2429 = vmatpush1.bf16.msra.mxu1 %v10598_v39  ;;  %v10681_v38 = vld [vmem:[#allocation2 + $0x484] ss:$16 sps:$4 sm:$0xff]   ;;  %v10684_v39 = vld [vmem:[#allocation2 + $0x48c] ss:$16 sps:$4 sm:$0xff]  }
  0xeb   :  { %2225 = vmatprep.subr.bf16.mxu0 %v10603_v40  ;;  %2430 = vmatprep.subr.bf16.mxu1 %v10606_v41  ;;  %v10679_v40 = vld [vmem:[#allocation2 + $0x480] ss:$16 sps:$4 sm:$0xff]   ;;  %v10682_v41 = vld [vmem:[#allocation2 + $0x488] ss:$16 sps:$4 sm:$0xff]  }
  0xee   :  { %2226 = vmatpush1.bf16.msra.mxu0 %v10601_v43  ;;  %2431 = vmatpush1.bf16.msra.mxu1 %v10604_v44  ;;  %v10687_v43 = vld [vmem:[#allocation2 + $0x4a4] ss:$16 sps:$4 sm:$0xff]   ;;  %v10690_v44 = vld [vmem:[#allocation2 + $0x4ac] ss:$16 sps:$4 sm:$0xff]  }
  0xef   :  { %2227 = vmatprep.subr.bf16.mxu0 %v10609_v45  ;;  %2432 = vmatprep.subr.bf16.mxu1 %v10612_v46  ;;  %v10685_v45 = vld [vmem:[#allocation2 + $0x4a0] ss:$16 sps:$4 sm:$0xff]   ;;  %v10688_v46 = vld [vmem:[#allocation2 + $0x4a8] ss:$16 sps:$4 sm:$0xff]  }
  0xf2   :  { %2228 = vmatpush1.bf16.msra.mxu0 %v10607_v47  ;;  %2433 = vmatpush1.bf16.msra.mxu1 %v10610_v48  ;;  %v10693_v47 = vld [vmem:[#allocation2 + $0x4c4] ss:$16 sps:$4 sm:$0xff]   ;;  %v10696_v48 = vld [vmem:[#allocation2 + $0x4cc] ss:$16 sps:$4 sm:$0xff]  }
  0xf3   :  { %2229 = vmatprep.subr.bf16.mxu0 %v10615_v50  ;;  %2434 = vmatprep.subr.bf16.mxu1 %v10618_v51  ;;  %v10691_v50 = vld [vmem:[#allocation2 + $0x4c0] ss:$16 sps:$4 sm:$0xff]   ;;  %v10694_v51 = vld [vmem:[#allocation2 + $0x4c8] ss:$16 sps:$4 sm:$0xff]  }
  0xf6   :  { %2230 = vmatpush1.bf16.msra.mxu0 %v10613_v53  ;;  %2435 = vmatpush1.bf16.msra.mxu1 %v10616_v54  ;;  %v10699_v53 = vld [vmem:[#allocation2 + $0x4e4] ss:$16 sps:$4 sm:$0xff]   ;;  %v10702_v54 = vld [vmem:[#allocation2 + $0x4ec] ss:$16 sps:$4 sm:$0xff]  }
  0xf7   :  { %2231 = vmatprep.subr.bf16.mxu0 %v10621_v55  ;;  %2436 = vmatprep.subr.bf16.mxu1 %v10624_v56  ;;  %v10697_v55 = vld [vmem:[#allocation2 + $0x4e0] ss:$16 sps:$4 sm:$0xff]   ;;  %v10700_v56 = vld [vmem:[#allocation2 + $0x4e8] ss:$16 sps:$4 sm:$0xff]  }
  0xfa   :  { %2232 = vmatpush1.bf16.msra.mxu0 %v10619_v57  ;;  %2437 = vmatpush1.bf16.msra.mxu1 %v10622_v58  ;;  %v10705_v57 = vld [vmem:[#allocation2 + $0x504] ss:$16 sps:$4 sm:$0xff]   ;;  %v10708_v58 = vld [vmem:[#allocation2 + $0x50c] ss:$16 sps:$4 sm:$0xff]  }
  0xfb   :  { %2233 = vmatprep.subr.bf16.mxu0 %v10627_v59  ;;  %2438 = vmatprep.subr.bf16.mxu1 %v10630_v61  ;;  %v10703_v59 = vld [vmem:[#allocation2 + $0x500] ss:$16 sps:$4 sm:$0xff]   ;;  %v10706_v61 = vld [vmem:[#allocation2 + $0x508] ss:$16 sps:$4 sm:$0xff]  }
  0xfe   :  { %2234 = vmatpush1.bf16.msra.mxu0 %v10625_v62  ;;  %2439 = vmatpush1.bf16.msra.mxu1 %v10628_v63  ;;  %v10711_v62 = vld [vmem:[#allocation2 + $0x524] ss:$16 sps:$4 sm:$0xff]   ;;  %v10714_v63 = vld [vmem:[#allocation2 + $0x52c] ss:$16 sps:$4 sm:$0xff]  }
  0xff   :  { %2235 = vmatprep.subr.bf16.mxu0 %v10633_v0  ;;  %2440 = vmatprep.subr.bf16.mxu1 %v10636_v1  ;;  %v10709_v0 = vld [vmem:[#allocation2 + $0x520] ss:$16 sps:$4 sm:$0xff]   ;;  %v10712_v1 = vld [vmem:[#allocation2 + $0x528] ss:$16 sps:$4 sm:$0xff]  }
 0x102   :  { %2236 = vmatpush1.bf16.msra.mxu0 %v10631_v2  ;;  %2441 = vmatpush1.bf16.msra.mxu1 %v10634_v3  ;;  %v10717_v2 = vld [vmem:[#allocation2 + $0x544] ss:$16 sps:$4 sm:$0xff]   ;;  %v10720_v3 = vld [vmem:[#allocation2 + $0x54c] ss:$16 sps:$4 sm:$0xff]  }
 0x103   :  { %2237 = vmatprep.subr.bf16.mxu0 %v10639_v4  ;;  %2442 = vmatprep.subr.bf16.mxu1 %v10642_v5  ;;  %v10715_v4 = vld [vmem:[#allocation2 + $0x540] ss:$16 sps:$4 sm:$0xff]   ;;  %v10718_v5 = vld [vmem:[#allocation2 + $0x548] ss:$16 sps:$4 sm:$0xff]  }
 0x106   :  { %2238 = vmatpush1.bf16.msra.mxu0 %v10637_v6  ;;  %2443 = vmatpush1.bf16.msra.mxu1 %v10640_v7  ;;  %v10723_v6 = vld [vmem:[#allocation2 + $0x564] ss:$16 sps:$4 sm:$0xff]   ;;  %v10726_v7 = vld [vmem:[#allocation2 + $0x56c] ss:$16 sps:$4 sm:$0xff]  }
 0x107   :  { %2239 = vmatprep.subr.bf16.mxu0 %v10645_v8  ;;  %2444 = vmatprep.subr.bf16.mxu1 %v10648_v9  ;;  %v10721_v8 = vld [vmem:[#allocation2 + $0x560] ss:$16 sps:$4 sm:$0xff]   ;;  %v10724_v9 = vld [vmem:[#allocation2 + $0x568] ss:$16 sps:$4 sm:$0xff]  }
 0x10a   :  { %2240 = vmatpush1.bf16.msra.mxu0 %v10643_v11  ;;  %2445 = vmatpush1.bf16.msra.mxu1 %v10646_v12  ;;  %v10732_v11 = vld [vmem:[#allocation2 + $0x58c] ss:$16 sps:$4 sm:$0xff]   ;;  %v10727_v12 = vld [vmem:[#allocation2 + $0x580] ss:$16 sps:$4 sm:$0xff]  }
 0x10b   :  { %2241 = vmatprep.subr.bf16.mxu0 %v10651_v14  ;;  %2446 = vmatprep.subr.bf16.mxu1 %v10654_v15  ;;  %v10730_v14 = vld [vmem:[#allocation2 + $0x588] ss:$16 sps:$4 sm:$0xff]   ;;  %v10735_v15 = vld [vmem:[#allocation2 + $0x5a4] ss:$16 sps:$4 sm:$0xff]  }
 0x10e   :  { %2242 = vmatpush1.bf16.msra.mxu0 %v10649_v18  ;;  %2447 = vmatpush1.bf16.msra.mxu1 %v10652_v19  ;;  %v10738_v18 = vld [vmem:[#allocation2 + $0x5ac] ss:$16 sps:$4 sm:$0xff]   ;;  %v10733_v19 = vld [vmem:[#allocation2 + $0x5a0] ss:$16 sps:$4 sm:$0xff]  }
 0x10f   :  { %2252 = vmatprep.subr.bf16.mxu0 %v10657_v20  ;;  %2457 = vmatprep.subr.bf16.mxu1 %v10660_v21  ;;  %v10736_v20 = vld [vmem:[#allocation2 + $0x5a8] ss:$16 sps:$4 sm:$0xff]   ;;  %v10741_v21 = vld [vmem:[#allocation2 + $0x5c4] ss:$16 sps:$4 sm:$0xff]  }
 0x111   :  { %2244 = vmatmul.mubr.bf16.vlgmr.msra.gmra.mrb[0].mxu0 %v11709_v23  ;;  %2449 = vmatmul.mubr.bf16.vlgmr.msra.gmra.mrb[0].mxu1 %v11709_v23 }
 0x112   :  { %2253 = vmatpush1.bf16.msra.mxu0 %v10655_v22  ;;  %2458 = vmatpush1.bf16.msra.mxu1 %v10658_v24  ;;  %v10739_v22 = vld [vmem:[#allocation2 + $0x5c0] ss:$16 sps:$4 sm:$0xff]   ;;  %v10742_v24 = vld [vmem:[#allocation2 + $0x5c8] ss:$16 sps:$4 sm:$0xff]  }
 0x113   :  { %2254 = vmatprep.subr.bf16.mxu0 %v10663_v25  ;;  %2459 = vmatprep.subr.bf16.mxu1 %v10666_v26  ;;  %v10747_v25 = vld [vmem:[#allocation2 + $0x5e4] ss:$16 sps:$4 sm:$0xff]   ;;  %v10750_v26 = vld [vmem:[#allocation2 + $0x5ec] ss:$16 sps:$4 sm:$0xff]  }
 0x114   :  { %2284 = vmatprep.mubr.bf16.mxu0 %v11712_v27  ;;  %2489 = vmatprep.mubr.bf16.mxu1 %v11712_v27 }
 0x116   :  { %2255 = vmatpush1.bf16.msra.mxu0 %v10661_v28  ;;  %2460 = vmatpush1.bf16.msra.mxu1 %v10664_v29  ;;  %v10745_v28 = vld [vmem:[#allocation2 + $0x5e0] ss:$16 sps:$4 sm:$0xff]   ;;  %v10748_v29 = vld [vmem:[#allocation2 + $0x5e8] ss:$16 sps:$4 sm:$0xff]  }
 0x117   :  { %2256 = vmatprep.subr.bf16.mxu0 %v10669_v30  ;;  %2461 = vmatprep.subr.bf16.mxu1 %v10672_v31  ;;  %v10754_v30 = vld [vmem:[#allocation2 + $0x604] ss:$16 sps:$4 sm:$0xff]   ;;  %v10757_v31 = vld [vmem:[#allocation2 + $0x60c] ss:$16 sps:$4 sm:$0xff]  }
 0x11a   :  { %2257 = vmatpush1.bf16.msra.mxu0 %v10667_v32  ;;  %2462 = vmatpush1.bf16.msra.mxu1 %v10670_v33  ;;  %v10752_v32 = vld [vmem:[#allocation2 + $0x600] ss:$16 sps:$4 sm:$0xff]   ;;  %v11720_v33 = vrot.slane %v11703_v16, %v11675_v49  ;;  %v10761_v16 = vld [vmem:[#allocation2 + $0x628] ss:$16 sps:$4 sm:$0xff]  }
 0x11b   :  { %2258 = vmatprep.subr.bf16.mxu0 %v10675_v34  ;;  %2463 = vmatprep.subr.bf16.mxu1 %v10678_v35  ;;  %v10755_v34 = vld [vmem:[#allocation2 + $0x608] ss:$16 sps:$4 sm:$0xff]   ;;  %v10760_v35 = vld [vmem:[#allocation2 + $0x624] ss:$16 sps:$4 sm:$0xff]  }
 0x11e   :  { %2259 = vmatpush1.bf16.msra.mxu0 %v10673_v36  ;;  %2464 = vmatpush1.bf16.msra.mxu1 %v10676_v37  ;;  %v10763_v36 = vld [vmem:[#allocation2 + $0x62c] ss:$16 sps:$4 sm:$0xff]   ;;  %v11724_v37 = vcombine.high %v11712_v27, %v11712_v27 }
 0x11f   :  { %2260 = vmatprep.subr.bf16.mxu0 %v10681_v38  ;;  %2465 = vmatprep.subr.bf16.mxu1 %v10684_v39  ;;  %v10758_v38 = vld [vmem:[#allocation2 + $0x620] ss:$16 sps:$4 sm:$0xff]   ;;  %v10766_v39 = vld [vmem:[#allocation2 + $0x644] ss:$16 sps:$4 sm:$0xff]  }
 0x122   :  { %2261 = vmatpush1.bf16.msra.mxu0 %v10679_v40  ;;  %2466 = vmatpush1.bf16.msra.mxu1 %v10682_v41  ;;  %v10769_v40 = vld [vmem:[#allocation2 + $0x64c] ss:$16 sps:$4 sm:$0xff]   ;;  %v10764_v41 = vld [vmem:[#allocation2 + $0x640] ss:$16 sps:$4 sm:$0xff]  }
 0x123   :  { %2262 = vmatprep.subr.bf16.mxu0 %v10687_v43  ;;  %2467 = vmatprep.subr.bf16.mxu1 %v10690_v44  ;;  %v10767_v43 = vld [vmem:[#allocation2 + $0x648] ss:$16 sps:$4 sm:$0xff]   ;;  %v10772_v44 = vld [vmem:[#allocation2 + $0x664] ss:$16 sps:$4 sm:$0xff]  }
 0x126   :  { %2263 = vmatpush1.bf16.msra.mxu0 %v10685_v45  ;;  %2468 = vmatpush1.bf16.msra.mxu1 %v10688_v46  ;;  %v10775_v45 = vld [vmem:[#allocation2 + $0x66c] ss:$16 sps:$4 sm:$0xff]   ;;  %v10770_v46 = vld [vmem:[#allocation2 + $0x660] ss:$16 sps:$4 sm:$0xff]  }
 0x127   :  { %2264 = vmatprep.subr.bf16.mxu0 %v10693_v47  ;;  %2469 = vmatprep.subr.bf16.mxu1 %v10696_v48  ;;  %v10773_v47 = vld [vmem:[#allocation2 + $0x668] ss:$16 sps:$4 sm:$0xff]   ;;  %v10778_v48 = vld [vmem:[#allocation2 + $0x684] ss:$16 sps:$4 sm:$0xff]  }
 0x12a   :  { %2265 = vmatpush1.bf16.msra.mxu0 %v10691_v50  ;;  %2470 = vmatpush1.bf16.msra.mxu1 %v10694_v51  ;;  %v10781_v50 = vld [vmem:[#allocation2 + $0x68c] ss:$16 sps:$4 sm:$0xff]   ;;  %v10776_v51 = vld [vmem:[#allocation2 + $0x680] ss:$16 sps:$4 sm:$0xff]  }
 0x12b   :  { %2266 = vmatprep.subr.bf16.mxu0 %v10699_v53  ;;  %2471 = vmatprep.subr.bf16.mxu1 %v10702_v54  ;;  %v10779_v53 = vld [vmem:[#allocation2 + $0x688] ss:$16 sps:$4 sm:$0xff]   ;;  %v10784_v54 = vld [vmem:[#allocation2 + $0x6a4] ss:$16 sps:$4 sm:$0xff]  }
 0x12e   :  { %2267 = vmatpush1.bf16.msra.mxu0 %v10697_v55  ;;  %2472 = vmatpush1.bf16.msra.mxu1 %v10700_v56  ;;  %v10787_v55 = vld [vmem:[#allocation2 + $0x6ac] ss:$16 sps:$4 sm:$0xff]   ;;  %v10782_v56 = vld [vmem:[#allocation2 + $0x6a0] ss:$16 sps:$4 sm:$0xff]  }
 0x12f   :  { %2268 = vmatprep.subr.bf16.mxu0 %v10705_v57  ;;  %2473 = vmatprep.subr.bf16.mxu1 %v10708_v58  ;;  %v10785_v57 = vld [vmem:[#allocation2 + $0x6a8] ss:$16 sps:$4 sm:$0xff]   ;;  %v10790_v58 = vld [vmem:[#allocation2 + $0x6c4] ss:$16 sps:$4 sm:$0xff]  }
 0x132   :  { %2269 = vmatpush1.bf16.msra.mxu0 %v10703_v59  ;;  %2474 = vmatpush1.bf16.msra.mxu1 %v10706_v61  ;;  %v10793_v59 = vld [vmem:[#allocation2 + $0x6cc] ss:$16 sps:$4 sm:$0xff]   ;;  %v10788_v61 = vld [vmem:[#allocation2 + $0x6c0] ss:$16 sps:$4 sm:$0xff]  }
 0x133   :  { %2270 = vmatprep.subr.bf16.mxu0 %v10711_v62  ;;  %2475 = vmatprep.subr.bf16.mxu1 %v10714_v63  ;;  %v10791_v62 = vld [vmem:[#allocation2 + $0x6c8] ss:$16 sps:$4 sm:$0xff]   ;;  %v10796_v63 = vld [vmem:[#allocation2 + $0x6e4] ss:$16 sps:$4 sm:$0xff]  }
 0x136   :  { %2271 = vmatpush1.bf16.msra.mxu0 %v10709_v0  ;;  %2476 = vmatpush1.bf16.msra.mxu1 %v10712_v1  ;;  %v10799_v0 = vld [vmem:[#allocation2 + $0x6ec] ss:$16 sps:$4 sm:$0xff]   ;;  %v10794_v1 = vld [vmem:[#allocation2 + $0x6e0] ss:$16 sps:$4 sm:$0xff]  }
 0x137   :  { %2272 = vmatprep.subr.bf16.mxu0 %v10717_v2  ;;  %2477 = vmatprep.subr.bf16.mxu1 %v10720_v3  ;;  %v10797_v2 = vld [vmem:[#allocation2 + $0x6e8] ss:$16 sps:$4 sm:$0xff]   ;;  %v10802_v3 = vld [vmem:[#allocation2 + $0x704] ss:$16 sps:$4 sm:$0xff]  }
 0x13a   :  { %2273 = vmatpush1.bf16.msra.mxu0 %v10715_v4  ;;  %2478 = vmatpush1.bf16.msra.mxu1 %v10718_v5  ;;  %v10805_v4 = vld [vmem:[#allocation2 + $0x70c] ss:$16 sps:$4 sm:$0xff]   ;;  %v10800_v5 = vld [vmem:[#allocation2 + $0x700] ss:$16 sps:$4 sm:$0xff]  }
 0x13b   :  { %2274 = vmatprep.subr.bf16.mxu0 %v10723_v6  ;;  %2479 = vmatprep.subr.bf16.mxu1 %v10726_v7  ;;  %v10803_v6 = vld [vmem:[#allocation2 + $0x708] ss:$16 sps:$4 sm:$0xff]   ;;  %v10808_v7 = vld [vmem:[#allocation2 + $0x724] ss:$16 sps:$4 sm:$0xff]  }
 0x13e   :  { %2275 = vmatpush1.bf16.msra.mxu0 %v10721_v8  ;;  %2480 = vmatpush1.bf16.msra.mxu1 %v10724_v9  ;;  %v10811_v8 = vld [vmem:[#allocation2 + $0x72c] ss:$16 sps:$4 sm:$0xff]   ;;  %v10806_v9 = vld [vmem:[#allocation2 + $0x720] ss:$16 sps:$4 sm:$0xff]  }
 0x13f   :  { %2276 = vmatprep.subr.bf16.mxu0 %v10729_v10  ;;  %2481 = vmatprep.subr.bf16.mxu1 %v10732_v11  ;;  %v10809_v10 = vld [vmem:[#allocation2 + $0x728] ss:$16 sps:$4 sm:$0xff]   ;;  %v10814_v11 = vld [vmem:[#allocation2 + $0x744] ss:$16 sps:$4 sm:$0xff]  }
 0x142   :  { %2277 = vmatpush1.bf16.msra.mxu0 %v10727_v12  ;;  %2482 = vmatpush1.bf16.msra.mxu1 %v10730_v14  ;;  %v10817_v12 = vld [vmem:[#allocation2 + $0x74c] ss:$16 sps:$4 sm:$0xff]   ;;  %v10812_v14 = vld [vmem:[#allocation2 + $0x740] ss:$16 sps:$4 sm:$0xff]  }
 0x143   :  { %2278 = vmatprep.subr.bf16.mxu0 %v10735_v15  ;;  %2483 = vmatprep.subr.bf16.mxu1 %v10738_v18  ;;  %v10815_v15 = vld [vmem:[#allocation2 + $0x748] ss:$16 sps:$4 sm:$0xff]   ;;  %v10820_v18 = vld [vmem:[#allocation2 + $0x764] ss:$16 sps:$4 sm:$0xff]  }
 0x146   :  { %2279 = vmatpush1.bf16.msra.mxu0 %v10733_v19  ;;  %2484 = vmatpush1.bf16.msra.mxu1 %v10736_v20  ;;  %v10823_v19 = vld [vmem:[#allocation2 + $0x76c] ss:$16 sps:$4 sm:$0xff]   ;;  %v10818_v20 = vld [vmem:[#allocation2 + $0x760] ss:$16 sps:$4 sm:$0xff]  }
 0x147   :  { %2280 = vmatprep.subr.bf16.mxu0 %v10741_v21  ;;  %2485 = vmatprep.subr.bf16.mxu1 %v10744_v52  ;;  %v10821_v21 = vld [vmem:[#allocation2 + $0x768] ss:$16 sps:$4 sm:$0xff]   ;;  %v10826_v52 = vld [vmem:[#allocation2 + $0x784] ss:$16 sps:$4 sm:$0xff]  }
 0x14a   :  { %2281 = vmatpush1.bf16.msra.mxu0 %v10739_v22  ;;  %2486 = vmatpush1.bf16.msra.mxu1 %v10742_v24  ;;  %v10829_v22 = vld [vmem:[#allocation2 + $0x78c] ss:$16 sps:$4 sm:$0xff]   ;;  %v10824_v24 = vld [vmem:[#allocation2 + $0x780] ss:$16 sps:$4 sm:$0xff]  }
 0x14b   :  { %2282 = vmatprep.subr.bf16.mxu0 %v10747_v25  ;;  %2487 = vmatprep.subr.bf16.mxu1 %v10750_v26  ;;  %v10827_v25 = vld [vmem:[#allocation2 + $0x788] ss:$16 sps:$4 sm:$0xff]   ;;  %v10832_v26 = vld [vmem:[#allocation2 + $0x7a4] ss:$16 sps:$4 sm:$0xff]  }
 0x14e   :  { %2283 = vmatpush1.bf16.msra.mxu0 %v10745_v28  ;;  %2488 = vmatpush1.bf16.msra.mxu1 %v10748_v29  ;;  %v10835_v28 = vld [vmem:[#allocation2 + $0x7ac] ss:$16 sps:$4 sm:$0xff]   ;;  %v10830_v29 = vld [vmem:[#allocation2 + $0x7a0] ss:$16 sps:$4 sm:$0xff]  }
 0x14f   :  { %2293 = vmatprep.subr.bf16.mxu0 %v10754_v30  ;;  %2498 = vmatprep.subr.bf16.mxu1 %v10757_v31  ;;  %v10833_v30 = vld [vmem:[#allocation2 + $0x7a8] ss:$16 sps:$4 sm:$0xff]   ;;  %v10838_v31 = vld [vmem:[#allocation2 + $0x7c4] ss:$16 sps:$4 sm:$0xff]  }
 0x151   :  { %2285 = vmatmul.mubr.bf16.vlgmr.msra.gmra.mrb[0].mxu0 %v11720_v33  ;;  %2490 = vmatmul.mubr.bf16.vlgmr.msra.gmra.mrb[0].mxu1 %v11720_v33 }
 0x152   :  { %2294 = vmatpush1.bf16.msra.mxu0 %v10752_v32  ;;  %2499 = vmatpush1.bf16.msra.mxu1 %v10755_v34  ;;  %v10841_v32 = vld [vmem:[#allocation2 + $0x7cc] ss:$16 sps:$4 sm:$0xff]   ;;  %v10836_v34 = vld [vmem:[#allocation2 + $0x7c0] ss:$16 sps:$4 sm:$0xff]  }
 0x153   :  { %2295 = vmatprep.subr.bf16.mxu0 %v10760_v35  ;;  %2500 = vmatprep.subr.bf16.mxu1 %v10763_v36  ;;  %v10839_v35 = vld [vmem:[#allocation2 + $0x7c8] ss:$16 sps:$4 sm:$0xff]   ;;  %v10844_v36 = vld [vmem:[#allocation2 + $0x7e4] ss:$16 sps:$4 sm:$0xff]  }
 0x154   :  { %2325 = vmatprep.mubr.bf16.mxu0 %v11724_v37  ;;  %2530 = vmatprep.mubr.bf16.mxu1 %v11724_v37 }
 0x156   :  { %2296 = vmatpush1.bf16.msra.mxu0 %v10758_v38  ;;  %2501 = vmatpush1.bf16.msra.mxu1 %v10761_v16  ;;  %v10847_v38 = vld [vmem:[#allocation2 + $0x7ec] ss:$16 sps:$4 sm:$0xff]   ;;  %v11733_v16 = vld.sshfl [vmem:[%s11954_s0 + $0x8] sm:$0x11 pattern:$0x75316420] }
 0x157   :  { %2297 = vmatprep.subr.bf16.mxu0 %v10766_v39  ;;  %2502 = vmatprep.subr.bf16.mxu1 %v10769_v40  ;;  %v10842_v39 = vld [vmem:[#allocation2 + $0x7e0] ss:$16 sps:$4 sm:$0xff]   ;;  %v10845_v40 = vld [vmem:[#allocation2 + $0x7e8] ss:$16 sps:$4 sm:$0xff]  }
 0x15a   :  { %2298 = vmatpush1.bf16.msra.mxu0 %v10764_v41  ;;  %2503 = vmatpush1.bf16.msra.mxu1 %v10767_v43  ;;  %v10850_v41 = vld [vmem:[#allocation2 + $0x804] ss:$16 sps:$4 sm:$0xff]   ;;  %v10853_v43 = vld [vmem:[#allocation2 + $0x80c] ss:$16 sps:$4 sm:$0xff]  }
 0x15b   :  { %2299 = vmatprep.subr.bf16.mxu0 %v10772_v44  ;;  %2504 = vmatprep.subr.bf16.mxu1 %v10775_v45  ;;  %v10848_v44 = vld [vmem:[#allocation2 + $0x800] ss:$16 sps:$4 sm:$0xff]   ;;  %v10851_v45 = vld [vmem:[#allocation2 + $0x808] ss:$16 sps:$4 sm:$0xff]  }
 0x15e   :  { %2300 = vmatpush1.bf16.msra.mxu0 %v10770_v46  ;;  %2505 = vmatpush1.bf16.msra.mxu1 %v10773_v47  ;;  %v545_v46 = vcombine.high %v11733_v16, %v11733_v16  ;;  %v11739_v47 = vcombine.high %v11720_v33, %v11720_v33 }
 0x15f   :  { %2301 = vmatprep.subr.bf16.mxu0 %v10778_v48  ;;  %2506 = vmatprep.subr.bf16.mxu1 %v10781_v50  ;;  %v10856_v48 = vld [vmem:[#allocation2 + $0x824] ss:$16 sps:$4 sm:$0xff]   ;;  %v10859_v50 = vld [vmem:[#allocation2 + $0x82c] ss:$16 sps:$4 sm:$0xff]  }
 0x162   :  { %2302 = vmatpush1.bf16.msra.mxu0 %v10776_v51  ;;  %2507 = vmatpush1.bf16.msra.mxu1 %v10779_v53  ;;  %v10854_v51 = vld [vmem:[#allocation2 + $0x820] ss:$16 sps:$4 sm:$0xff]   ;;  %v10857_v53 = vld [vmem:[#allocation2 + $0x828] ss:$16 sps:$4 sm:$0xff]  }
 0x163   :  { %2303 = vmatprep.subr.bf16.mxu0 %v10784_v54  ;;  %2508 = vmatprep.subr.bf16.mxu1 %v10787_v55  ;;  %v11742_v54 = vrot.slane %v545_v46, %v11675_v49  ;;  %v10862_v55 = vld [vmem:[#allocation2 + $0x844] ss:$16 sps:$4 sm:$0xff]   ;;  %v10929_v46 = vld [vmem:[#allocation2 + $0x9a8] ss:$16 sps:$4 sm:$0xff]  }
 0x166   :  { %2304 = vmatpush1.bf16.msra.mxu0 %v10782_v56  ;;  %2509 = vmatpush1.bf16.msra.mxu1 %v10785_v57  ;;  %v10865_v56 = vld [vmem:[#allocation2 + $0x84c] ss:$16 sps:$4 sm:$0xff]   ;;  %v10860_v57 = vld [vmem:[#allocation2 + $0x840] ss:$16 sps:$4 sm:$0xff]  }
 0x167   :  { %2305 = vmatprep.subr.bf16.mxu0 %v10790_v58  ;;  %2510 = vmatprep.subr.bf16.mxu1 %v10793_v59  ;;  %v10863_v58 = vld [vmem:[#allocation2 + $0x848] ss:$16 sps:$4 sm:$0xff]   ;;  %v10868_v59 = vld [vmem:[#allocation2 + $0x864] ss:$16 sps:$4 sm:$0xff]  }
 0x16a   :  { %2306 = vmatpush1.bf16.msra.mxu0 %v10788_v61  ;;  %2511 = vmatpush1.bf16.msra.mxu1 %v10791_v62  ;;  %v10871_v61 = vld [vmem:[#allocation2 + $0x86c] ss:$16 sps:$4 sm:$0xff]   ;;  %v10866_v62 = vld [vmem:[#allocation2 + $0x860] ss:$16 sps:$4 sm:$0xff]  }
 0x16b   :  { %2307 = vmatprep.subr.bf16.mxu0 %v10796_v63  ;;  %2512 = vmatprep.subr.bf16.mxu1 %v10799_v0  ;;  %v10869_v63 = vld [vmem:[#allocation2 + $0x868] ss:$16 sps:$4 sm:$0xff]   ;;  %v10874_v0 = vld [vmem:[#allocation2 + $0x884] ss:$16 sps:$4 sm:$0xff]  }
 0x16e   :  { %2308 = vmatpush1.bf16.msra.mxu0 %v10794_v1  ;;  %2513 = vmatpush1.bf16.msra.mxu1 %v10797_v2  ;;  %v10877_v1 = vld [vmem:[#allocation2 + $0x88c] ss:$16 sps:$4 sm:$0xff]   ;;  %v10872_v2 = vld [vmem:[#allocation2 + $0x880] ss:$16 sps:$4 sm:$0xff]  }
 0x16f   :  { %2309 = vmatprep.subr.bf16.mxu0 %v10802_v3  ;;  %2514 = vmatprep.subr.bf16.mxu1 %v10805_v4  ;;  %v10875_v3 = vld [vmem:[#allocation2 + $0x888] ss:$16 sps:$4 sm:$0xff]   ;;  %v10880_v4 = vld [vmem:[#allocation2 + $0x8a4] ss:$16 sps:$4 sm:$0xff]  }
 0x172   :  { %2310 = vmatpush1.bf16.msra.mxu0 %v10800_v5  ;;  %2515 = vmatpush1.bf16.msra.mxu1 %v10803_v6  ;;  %v10883_v5 = vld [vmem:[#allocation2 + $0x8ac] ss:$16 sps:$4 sm:$0xff]   ;;  %v10878_v6 = vld [vmem:[#allocation2 + $0x8a0] ss:$16 sps:$4 sm:$0xff]  }
 0x173   :  { %2311 = vmatprep.subr.bf16.mxu0 %v10808_v7  ;;  %2516 = vmatprep.subr.bf16.mxu1 %v10811_v8  ;;  %v10881_v7 = vld [vmem:[#allocation2 + $0x8a8] ss:$16 sps:$4 sm:$0xff]   ;;  %v10886_v8 = vld [vmem:[#allocation2 + $0x8c4] ss:$16 sps:$4 sm:$0xff]  }
 0x176   :  { %2312 = vmatpush1.bf16.msra.mxu0 %v10806_v9  ;;  %2517 = vmatpush1.bf16.msra.mxu1 %v10809_v10  ;;  %v10889_v9 = vld [vmem:[#allocation2 + $0x8cc] ss:$16 sps:$4 sm:$0xff]   ;;  %v10884_v10 = vld [vmem:[#allocation2 + $0x8c0] ss:$16 sps:$4 sm:$0xff]  }
 0x177   :  { %2313 = vmatprep.subr.bf16.mxu0 %v10814_v11  ;;  %2518 = vmatprep.subr.bf16.mxu1 %v10817_v12  ;;  %v10887_v11 = vld [vmem:[#allocation2 + $0x8c8] ss:$16 sps:$4 sm:$0xff]   ;;  %v10892_v12 = vld [vmem:[#allocation2 + $0x8e4] ss:$16 sps:$4 sm:$0xff]  }
 0x17a   :  { %2314 = vmatpush1.bf16.msra.mxu0 %v10812_v14  ;;  %2519 = vmatpush1.bf16.msra.mxu1 %v10815_v15  ;;  %v10895_v14 = vld [vmem:[#allocation2 + $0x8ec] ss:$16 sps:$4 sm:$0xff]   ;;  %v10890_v15 = vld [vmem:[#allocation2 + $0x8e0] ss:$16 sps:$4 sm:$0xff]  }
 0x17b   :  { %2315 = vmatprep.subr.bf16.mxu0 %v10820_v18  ;;  %2520 = vmatprep.subr.bf16.mxu1 %v10823_v19  ;;  %v10893_v18 = vld [vmem:[#allocation2 + $0x8e8] ss:$16 sps:$4 sm:$0xff]   ;;  %v10898_v19 = vld [vmem:[#allocation2 + $0x904] ss:$16 sps:$4 sm:$0xff]  }
 0x17e   :  { %2316 = vmatpush1.bf16.msra.mxu0 %v10818_v20  ;;  %2521 = vmatpush1.bf16.msra.mxu1 %v10821_v21  ;;  %v10901_v20 = vld [vmem:[#allocation2 + $0x90c] ss:$16 sps:$4 sm:$0xff]   ;;  %v10896_v21 = vld [vmem:[#allocation2 + $0x900] ss:$16 sps:$4 sm:$0xff]  }
 0x17f   :  { %2317 = vmatprep.subr.bf16.mxu0 %v10826_v52  ;;  %2522 = vmatprep.subr.bf16.mxu1 %v10829_v22  ;;  %v10899_v52 = vld [vmem:[#allocation2 + $0x908] ss:$16 sps:$4 sm:$0xff]   ;;  %v10904_v22 = vld [vmem:[#allocation2 + $0x924] ss:$16 sps:$4 sm:$0xff]  }
 0x182   :  { %2318 = vmatpush1.bf16.msra.mxu0 %v10824_v24  ;;  %2523 = vmatpush1.bf16.msra.mxu1 %v10827_v25  ;;  %v10907_v24 = vld [vmem:[#allocation2 + $0x92c] ss:$16 sps:$4 sm:$0xff]   ;;  %v10902_v25 = vld [vmem:[#allocation2 + $0x920] ss:$16 sps:$4 sm:$0xff]  }
 0x183   :  { %2319 = vmatprep.subr.bf16.mxu0 %v10832_v26  ;;  %2524 = vmatprep.subr.bf16.mxu1 %v10835_v28  ;;  %v10905_v26 = vld [vmem:[#allocation2 + $0x928] ss:$16 sps:$4 sm:$0xff]   ;;  %v10910_v28 = vld [vmem:[#allocation2 + $0x944] ss:$16 sps:$4 sm:$0xff]  }
 0x186   :  { %2320 = vmatpush1.bf16.msra.mxu0 %v10830_v29  ;;  %2525 = vmatpush1.bf16.msra.mxu1 %v10833_v30  ;;  %v10913_v29 = vld [vmem:[#allocation2 + $0x94c] ss:$16 sps:$4 sm:$0xff]   ;;  %v10908_v30 = vld [vmem:[#allocation2 + $0x940] ss:$16 sps:$4 sm:$0xff]  }
 0x187   :  { %2321 = vmatprep.subr.bf16.mxu0 %v10838_v31  ;;  %2526 = vmatprep.subr.bf16.mxu1 %v10841_v32  ;;  %v10911_v31 = vld [vmem:[#allocation2 + $0x948] ss:$16 sps:$4 sm:$0xff]   ;;  %v10916_v32 = vld [vmem:[#allocation2 + $0x964] ss:$16 sps:$4 sm:$0xff]  }
 0x18a   :  { %2322 = vmatpush1.bf16.msra.mxu0 %v10836_v34  ;;  %2527 = vmatpush1.bf16.msra.mxu1 %v10839_v35  ;;  %v10919_v34 = vld [vmem:[#allocation2 + $0x96c] ss:$16 sps:$4 sm:$0xff]   ;;  %v10914_v35 = vld [vmem:[#allocation2 + $0x960] ss:$16 sps:$4 sm:$0xff]  }
 0x18b   :  { %2323 = vmatprep.subr.bf16.mxu0 %v10844_v36  ;;  %2528 = vmatprep.subr.bf16.mxu1 %v10847_v38  ;;  %v10917_v36 = vld [vmem:[#allocation2 + $0x968] ss:$16 sps:$4 sm:$0xff]   ;;  %v10922_v38 = vld [vmem:[#allocation2 + $0x984] ss:$16 sps:$4 sm:$0xff]  }
 0x18e   :  { %2324 = vmatpush1.bf16.msra.mxu0 %v10842_v39  ;;  %2529 = vmatpush1.bf16.msra.mxu1 %v10845_v40  ;;  %v10925_v39 = vld [vmem:[#allocation2 + $0x98c] ss:$16 sps:$4 sm:$0xff]   ;;  %v10920_v40 = vld [vmem:[#allocation2 + $0x980] ss:$16 sps:$4 sm:$0xff]  }
 0x18f   :  { %2334 = vmatprep.subr.bf16.mxu0 %v10850_v41  ;;  %2539 = vmatprep.subr.bf16.mxu1 %v10853_v43  ;;  %v10923_v41 = vld [vmem:[#allocation2 + $0x988] ss:$16 sps:$4 sm:$0xff]   ;;  %v10928_v43 = vld [vmem:[#allocation2 + $0x9a4] ss:$16 sps:$4 sm:$0xff]  }
 0x191   :  { %2326 = vmatmul.mubr.bf16.vlgmr.msra.gmra.mrb[0].mxu0 %v11739_v47  ;;  %2531 = vmatmul.mubr.bf16.vlgmr.msra.gmra.mrb[0].mxu1 %v11739_v47 }
 0x192   :  { %2335 = vmatpush1.bf16.msra.mxu0 %v10848_v44  ;;  %2540 = vmatpush1.bf16.msra.mxu1 %v10851_v45  ;;  %v10931_v44 = vld [vmem:[#allocation2 + $0x9ac] ss:$16 sps:$4 sm:$0xff]   ;;  %v10926_v45 = vld [vmem:[#allocation2 + $0x9a0] ss:$16 sps:$4 sm:$0xff]  }
 0x193   :  { %2336 = vmatprep.subr.bf16.mxu0 %v10856_v48  ;;  %2541 = vmatprep.subr.bf16.mxu1 %v10859_v50  ;;  %v10934_v48 = vld [vmem:[#allocation2 + $0x9c4] ss:$16 sps:$4 sm:$0xff]   ;;  %v10937_v50 = vld [vmem:[#allocation2 + $0x9cc] ss:$16 sps:$4 sm:$0xff]  }
 0x194   :  { %2366 = vmatprep.mubr.bf16.mxu0 %v11742_v54  ;;  %2571 = vmatprep.mubr.bf16.mxu1 %v11742_v54 }
 0x196   :  { %2337 = vmatpush1.bf16.msra.mxu0 %v10854_v51  ;;  %2542 = vmatpush1.bf16.msra.mxu1 %v10857_v53  ;;  %v10932_v51 = vld [vmem:[#allocation2 + $0x9c0] ss:$16 sps:$4 sm:$0xff]   ;;  %v10935_v53 = vld [vmem:[#allocation2 + $0x9c8] ss:$16 sps:$4 sm:$0xff]  }
 0x197   :  { %2338 = vmatprep.subr.bf16.mxu0 %v10862_v55  ;;  %2543 = vmatprep.subr.bf16.mxu1 %v10865_v56  ;;  %v10940_v55 = vld [vmem:[#allocation2 + $0x9e4] ss:$16 sps:$4 sm:$0xff]   ;;  %v10943_v56 = vld [vmem:[#allocation2 + $0x9ec] ss:$16 sps:$4 sm:$0xff]  }
 0x19a   :  { %2339 = vmatpush1.bf16.msra.mxu0 %v10860_v57  ;;  %2544 = vmatpush1.bf16.msra.mxu1 %v10863_v58  ;;  %v3070_v57 = vld [vmem:[#allocation9] sm:$0xff] }
 0x19b   :  { %2340 = vmatprep.subr.bf16.mxu0 %v10868_v59  ;;  %2545 = vmatprep.subr.bf16.mxu1 %v10871_v61  ;;  %v3074_v58 = vld [vmem:[#allocation9 + $0x20] sm:$0xff]  ;;  %v10938_v59 = vld [vmem:[#allocation2 + $0x9e0] ss:$16 sps:$4 sm:$0xff]  }
 0x19c   :  { %v10941_v61 = vld [vmem:[#allocation2 + $0x9e8] ss:$16 sps:$4 sm:$0xff]  }
 0x19e   :  { %2341 = vmatpush1.bf16.msra.mxu0 %v10866_v62  ;;  %2546 = vmatpush1.bf16.msra.mxu1 %v10869_v63  ;;  %v3078_v62 = vld [vmem:[#allocation9 + $0x40] sm:$0xff] }
 0x19f   :  { %2342 = vmatprep.subr.bf16.mxu0 %v10874_v0  ;;  %2547 = vmatprep.subr.bf16.mxu1 %v10877_v1  ;;  %v3082_v63 = vld [vmem:[#allocation9 + $0x60] sm:$0xff]  ;;  %v9476_v0 = vcombine.high %v3070_v57, %v3074_v58  ;;  %v11750_v1 = vrot.slane %v11733_v16, %v11675_v49 }
 0x1a0   :  { %v3098_v49 = vld [vmem:[#allocation9 + $0xe0] sm:$0xff] }
 0x1a2   :  { %2343 = vmatpush1.bf16.msra.mxu0 %v10872_v2  ;;  %2548 = vmatpush1.bf16.msra.mxu1 %v10875_v3  ;;  %v9475_v2 = vcombine.low %v3070_v57, %v3074_v58  ;;  %v9484_v3 = vcombine.high %v3078_v62, %v3082_v63  ;;  %v3166_v57 = vld [vmem:[#allocation9 + $0x300] sm:$0xff] }
 0x1a3   :  { %2344 = vmatprep.subr.bf16.mxu0 %v10880_v4  ;;  %2549 = vmatprep.subr.bf16.mxu1 %v10883_v5  ;;  %v3086_v4 = vld [vmem:[#allocation9 + $0x80] sm:$0xff] }
 0x1a4   :  { %v3090_v5 = vld [vmem:[#allocation9 + $0xa0] sm:$0xff] }
 0x1a5   :  { %v9491_v16 = vcombine.low %v3086_v4, %v3090_v5  ;;  %v3170_v58 = vld [vmem:[#allocation9 + $0x320] sm:$0xff] }
 0x1a6   :  { %2345 = vmatpush1.bf16.msra.mxu0 %v10878_v6  ;;  %2550 = vmatpush1.bf16.msra.mxu1 %v10881_v7  ;;  %v9483_v6 = vcombine.low %v3078_v62, %v3082_v63  ;;  %v9492_v7 = vcombine.high %v3086_v4, %v3090_v5  ;;  %v10952_v62 = vld [vmem:[#allocation6 + $0x24] ss:$8 sps:$4 sm:$0xff]   ;;  %v9572_v63 = vcombine.high %v3166_v57, %v3170_v58  ;;  %v10953_v4 = vld [vmem:[#allocation6 + $0x30] ss:$8 sps:$4 sm:$0xff]   ;;  %v10955_v5 = vld [vmem:[#allocation6 + $0x34] ss:$8 sps:$4 sm:$0xff]  }
 0x1a7   :  { %2346 = vmatprep.subr.bf16.mxu0 %v10886_v8  ;;  %2551 = vmatprep.subr.bf16.mxu1 %v10889_v9  ;;  %v3094_v8 = vld [vmem:[#allocation9 + $0xc0] sm:$0xff] }
 0x1a8   :  { %v9500_v9 = vcombine.high %v3094_v8, %v3098_v49 }
 0x1aa   :  { %2347 = vmatpush1.bf16.msra.mxu0 %v10884_v10  ;;  %2552 = vmatpush1.bf16.msra.mxu1 %v10887_v11  ;;  %v3102_v10 = vld [vmem:[#allocation9 + $0x100] sm:$0xff] }
 0x1ab   :  { %2348 = vmatprep.subr.bf16.mxu0 %v10892_v12  ;;  %2553 = vmatprep.subr.bf16.mxu1 %v10895_v14  ;;  %v3106_v11 = vld [vmem:[#allocation9 + $0x120] sm:$0xff]  ;;  %v9499_v12 = vcombine.low %v3094_v8, %v3098_v49 }
 0x1ac   :  { %v9508_v14 = vcombine.high %v3102_v10, %v3106_v11  ;;  %v3186_v8 = vld [vmem:[#allocation9 + $0x3a0] sm:$0xff] }
 0x1ae   :  { %2349 = vmatpush1.bf16.msra.mxu0 %v10890_v15  ;;  %2554 = vmatpush1.bf16.msra.mxu1 %v10893_v18  ;;  %v3110_v15 = vld [vmem:[#allocation9 + $0x140] sm:$0xff] }
 0x1af   :  { %2350 = vmatprep.subr.bf16.mxu0 %v10898_v19  ;;  %2555 = vmatprep.subr.bf16.mxu1 %v10901_v20  ;;  %v3114_v18 = vld [vmem:[#allocation9 + $0x160] sm:$0xff]  ;;  %v9507_v19 = vcombine.low %v3102_v10, %v3106_v11 }
 0x1b0   :  { %v9516_v20 = vcombine.high %v3110_v15, %v3114_v18  ;;  %v3190_v11 = vld [vmem:[#allocation9 + $0x3c0] sm:$0xff] }
 0x1b2   :  { %2351 = vmatpush1.bf16.msra.mxu0 %v10896_v21  ;;  %2556 = vmatpush1.bf16.msra.mxu1 %v10899_v52  ;;  %v3118_v21 = vld [vmem:[#allocation9 + $0x180] sm:$0xff] }
 0x1b3   :  { %2352 = vmatprep.subr.bf16.mxu0 %v10904_v22  ;;  %2557 = vmatprep.subr.bf16.mxu1 %v10907_v24  ;;  %v3122_v52 = vld [vmem:[#allocation9 + $0x1a0] sm:$0xff]  ;;  %v9515_v22 = vcombine.low %v3110_v15, %v3114_v18  ;;  %v10959_v15 = vld [vmem:[#allocation6 + $0x50] ss:$8 sps:$4 sm:$0xff]   ;;  %v10961_v18 = vld [vmem:[#allocation6 + $0x54] ss:$8 sps:$4 sm:$0xff]  }
 0x1b4   :  { %v9524_v24 = vcombine.high %v3118_v21, %v3122_v52 }
 0x1b6   :  { %2353 = vmatpush1.bf16.msra.mxu0 %v10902_v25  ;;  %2558 = vmatpush1.bf16.msra.mxu1 %v10905_v26  ;;  %v3126_v25 = vld [vmem:[#allocation9 + $0x1c0] sm:$0xff] }
 0x1b7   :  { %2354 = vmatprep.subr.bf16.mxu0 %v10910_v28  ;;  %2559 = vmatprep.subr.bf16.mxu1 %v10913_v29  ;;  %v3130_v26 = vld [vmem:[#allocation9 + $0x1e0] sm:$0xff]  ;;  %v9523_v28 = vcombine.low %v3118_v21, %v3122_v52 }
 0x1b8   :  { %v9532_v29 = vcombine.high %v3126_v25, %v3130_v26  ;;  %v3202_v21 = vld [vmem:[#allocation9 + $0x420] sm:$0xff] }
 0x1ba   :  { %2355 = vmatpush1.bf16.msra.mxu0 %v10908_v30  ;;  %2560 = vmatpush1.bf16.msra.mxu1 %v10911_v31  ;;  %v3134_v30 = vld [vmem:[#allocation9 + $0x200] sm:$0xff] }
 0x1bb   :  { %2356 = vmatprep.subr.bf16.mxu0 %v10916_v32  ;;  %2561 = vmatprep.subr.bf16.mxu1 %v10919_v34  ;;  %v3138_v31 = vld [vmem:[#allocation9 + $0x220] sm:$0xff]  ;;  %v9531_v32 = vcombine.low %v3126_v25, %v3130_v26 }
 0x1bc   :  { %v9540_v34 = vcombine.high %v3134_v30, %v3138_v31  ;;  %v3206_v26 = vld [vmem:[#allocation9 + $0x440] sm:$0xff] }
 0x1be   :  { %2357 = vmatpush1.bf16.msra.mxu0 %v10914_v35  ;;  %2562 = vmatpush1.bf16.msra.mxu1 %v10917_v36  ;;  %v3142_v35 = vld [vmem:[#allocation9 + $0x240] sm:$0xff] }
 0x1bf   :  { %2358 = vmatprep.subr.bf16.mxu0 %v10922_v38  ;;  %2563 = vmatprep.subr.bf16.mxu1 %v10925_v39  ;;  %v3146_v36 = vld [vmem:[#allocation9 + $0x260] sm:$0xff]  ;;  %v9539_v38 = vcombine.low %v3134_v30, %v3138_v31  ;;  %v10965_v30 = vld [vmem:[#allocation6 + $0x70] ss:$8 sps:$4 sm:$0xff]   ;;  %v10967_v31 = vld [vmem:[#allocation6 + $0x74] ss:$8 sps:$4 sm:$0xff]  }
 0x1c0   :  { %v9548_v39 = vcombine.high %v3142_v35, %v3146_v36 }
 0x1c2   :  { %2359 = vmatpush1.bf16.msra.mxu0 %v10920_v40  ;;  %2564 = vmatpush1.bf16.msra.mxu1 %v10923_v41  ;;  %v3150_v40 = vld [vmem:[#allocation9 + $0x280] sm:$0xff] }
 0x1c3   :  { %2360 = vmatprep.subr.bf16.mxu0 %v10928_v43  ;;  %2565 = vmatprep.subr.bf16.mxu1 %v10931_v44  ;;  %v3154_v41 = vld [vmem:[#allocation9 + $0x2a0] sm:$0xff]  ;;  %v9547_v43 = vcombine.low %v3142_v35, %v3146_v36 }
 0x1c4   :  { %v10944_v44 = vld [vmem:[#allocation6] ss:$8 sps:$4 sm:$0xff]  }
 0x1c5   :  { %v3218_v35 = vld [vmem:[#allocation9 + $0x4a0] sm:$0xff] }
 0x1c6   :  { %2361 = vmatpush1.bf16.msra.mxu0 %v10926_v45  ;;  %2566 = vmatpush1.bf16.msra.mxu1 %v10929_v46  ;;  %v10946_v45 = vld [vmem:[#allocation6 + $0x4] ss:$8 sps:$4 sm:$0xff]   ;;  %v9556_v46 = vcombine.high %v3150_v40, %v3154_v41 }
 0x1c7   :  { %2362 = vmatprep.subr.bf16.mxu0 %v10934_v48  ;;  %2567 = vmatprep.subr.bf16.mxu1 %v10937_v50  ;;  %v3158_v48 = vld [vmem:[#allocation9 + $0x2c0] sm:$0xff] }
 0x1c8   :  { %v3162_v50 = vld [vmem:[#allocation9 + $0x2e0] sm:$0xff] }
 0x1ca   :  { %2363 = vmatpush1.bf16.msra.mxu0 %v10932_v51  ;;  %2568 = vmatpush1.bf16.msra.mxu1 %v10935_v53  ;;  %v9555_v51 = vcombine.low %v3150_v40, %v3154_v41  ;;  %v10947_v53 = vld [vmem:[#allocation6 + $0x10] ss:$8 sps:$4 sm:$0xff]   ;;  %v3222_v41 = vld [vmem:[#allocation9 + $0x4c0] sm:$0xff] }
 0x1cb   :  { %2364 = vmatprep.subr.bf16.mxu0 %v10940_v55  ;;  %2569 = vmatprep.subr.bf16.mxu1 %v10943_v56  ;;  %v10949_v55 = vld [vmem:[#allocation6 + $0x14] ss:$8 sps:$4 sm:$0xff]   ;;  %v9564_v56 = vcombine.high %v3158_v48, %v3162_v50 }
 0x1ce   :  { %2365 = vmatpush1.bf16.msra.mxu0 %v10938_v59  ;;  %2570 = vmatpush1.bf16.msra.mxu1 %v10941_v61  ;;  %v9563_v59 = vcombine.low %v3158_v48, %v3162_v50  ;;  %v10950_v61 = vld [vmem:[#allocation6 + $0x20] ss:$8 sps:$4 sm:$0xff]  }
 0x1cf   :  { %6952 = vmatprep.subr.bf16.mxu1 %v9476_v0  ;;  %2984 = vmatprep.subr.bf16.mxu0 %v10946_v45  ;;  %v3174_v0 = vld [vmem:[#allocation9 + $0x340] sm:$0xff]  ;;  %v10971_v45 = vld [vmem:[#allocation6 + $0x90] ss:$8 sps:$4 sm:$0xff]  }
 0x1d0   :  { %v3230_v50 = vld [vmem:[#allocation9 + $0x500] sm:$0xff] }
 0x1d1   :  { %2367 = vmatmul.mubr.bf16.vlgmr.msra.gmra.mrb[0].mxu0 %v11750_v1  ;;  %2572 = vmatmul.mubr.bf16.vlgmr.msra.gmra.mrb[0].mxu1 %v11750_v1 }
 0x1d2   :  { %6953 = vmatpush1.bf16.msra.mxu1 %v9475_v2  ;;  %6984 = vmatprep.mubr.bf16.mxu1 %v11685_v60  ;;  %v3178_v2 = vld [vmem:[#allocation9 + $0x360] sm:$0xff] }
 0x1d3   :  { %6954 = vmatprep.subr.bf16.mxu1 %v9484_v3  ;;  %2985 = vmatpush1.bf16.msra.mxu0 %v10944_v44  ;;  %v9571_v3 = vcombine.low %v3166_v57, %v3170_v58  ;;  %v9579_v49 = vcombine.low %v3174_v0, %v3178_v2  ;;  %v3238_v58 = vld [vmem:[#allocation9 + $0x540] sm:$0xff] }
 0x1d4   :  { %2986 = vmatprep.subr.bf16.mxu0 %v10949_v55  ;;  %v10974_v55 = vld [vmem:[#allocation6 + $0xa0] ss:$8 sps:$4 sm:$0xff]  }
 0x1d6   :  { %6955 = vmatpush1.bf16.msra.mxu1 %v9483_v6  ;;  %v9580_v6 = vcombine.high %v3174_v0, %v3178_v2  ;;  %v3246_v2 = vld [vmem:[#allocation9 + $0x580] sm:$0xff] }
 0x1d7   :  { %6956 = vmatprep.subr.bf16.mxu1 %v9492_v7  ;;  %2987 = vmatpush1.bf16.msra.mxu0 %v10947_v53  ;;  %v3182_v7 = vld [vmem:[#allocation9 + $0x380] sm:$0xff] }
 0x1d8   :  { %2988 = vmatprep.subr.bf16.mxu0 %v10952_v62  ;;  %v9588_v10 = vcombine.high %v3182_v7, %v3186_v8  ;;  %v10977_v62 = vld [vmem:[#allocation6 + $0xb0] ss:$8 sps:$4 sm:$0xff]  }
 0x1da   :  { %6957 = vmatpush1.bf16.msra.mxu1 %v9491_v16  ;;  %v10956_v16 = vld [vmem:[#allocation6 + $0x40] ss:$8 sps:$4 sm:$0xff]  }
 0x1db   :  { %6958 = vmatprep.subr.bf16.mxu1 %v9500_v9  ;;  %2989 = vmatpush1.bf16.msra.mxu0 %v10950_v61  ;;  %v10958_v9 = vld [vmem:[#allocation6 + $0x44] ss:$8 sps:$4 sm:$0xff]  }
 0x1dc   :  { %2990 = vmatprep.subr.bf16.mxu0 %v10955_v5 }
 0x1de   :  { %6959 = vmatpush1.bf16.msra.mxu1 %v9499_v12  ;;  %v3194_v12 = vld [vmem:[#allocation9 + $0x3e0] sm:$0xff] }
 0x1df   :  { %6960 = vmatprep.subr.bf16.mxu1 %v9508_v14  ;;  %2991 = vmatpush1.bf16.msra.mxu0 %v10953_v4  ;;  %v9587_v14 = vcombine.low %v3182_v7, %v3186_v8  ;;  %v9595_v52 = vcombine.low %v3190_v11, %v3194_v12  ;;  %v3258_v7 = vld [vmem:[#allocation9 + $0x5e0] sm:$0xff] }
 0x1e0   :  { %2992 = vmatprep.subr.bf16.mxu0 %v10958_v9  ;;  %v10982_v8 = vld [vmem:[#allocation6 + $0xc4] ss:$8 sps:$4 sm:$0xff]  }
 0x1e2   :  { %6961 = vmatpush1.bf16.msra.mxu1 %v9507_v19  ;;  %v9596_v19 = vcombine.high %v3190_v11, %v3194_v12  ;;  %v3266_v11 = vld [vmem:[#allocation9 + $0x620] sm:$0xff]  ;;  %v10985_v12 = vld [vmem:[#allocation6 + $0xd4] ss:$8 sps:$4 sm:$0xff]  }
 0x1e3   :  { %6962 = vmatprep.subr.bf16.mxu1 %v9516_v20  ;;  %2993 = vmatpush1.bf16.msra.mxu0 %v10956_v16  ;;  %v3198_v20 = vld [vmem:[#allocation9 + $0x400] sm:$0xff] }
 0x1e4   :  { %2994 = vmatprep.subr.bf16.mxu0 %v10961_v18  ;;  %v9604_v25 = vcombine.high %v3198_v20, %v3202_v21  ;;  %v10980_v16 = vld [vmem:[#allocation6 + $0xc0] ss:$8 sps:$4 sm:$0xff]  }
 0x1e6   :  { %6963 = vmatpush1.bf16.msra.mxu1 %v9515_v22  ;;  %v10962_v22 = vld [vmem:[#allocation6 + $0x60] ss:$8 sps:$4 sm:$0xff]  }
 0x1e7   :  { %6964 = vmatprep.subr.bf16.mxu1 %v9524_v24  ;;  %2995 = vmatpush1.bf16.msra.mxu0 %v10959_v15  ;;  %v10964_v24 = vld [vmem:[#allocation6 + $0x64] ss:$8 sps:$4 sm:$0xff]   ;;  %v10983_v15 = vld [vmem:[#allocation6 + $0xd0] ss:$8 sps:$4 sm:$0xff]  }
 0x1e8   :  { %2996 = vmatprep.subr.bf16.mxu0 %v10964_v24 }
 0x1ea   :  { %6965 = vmatpush1.bf16.msra.mxu1 %v9523_v28  ;;  %v3210_v28 = vld [vmem:[#allocation9 + $0x460] sm:$0xff] }
 0x1eb   :  { %6966 = vmatprep.subr.bf16.mxu1 %v9532_v29  ;;  %2997 = vmatpush1.bf16.msra.mxu0 %v10962_v22  ;;  %v9603_v29 = vcombine.low %v3198_v20, %v3202_v21  ;;  %v9611_v36 = vcombine.low %v3206_v26, %v3210_v28  ;;  %v3274_v20 = vld [vmem:[#allocation9 + $0x660] sm:$0xff] }
 0x1ec   :  { %2998 = vmatprep.subr.bf16.mxu0 %v10967_v31  ;;  %v10988_v21 = vld [vmem:[#allocation6 + $0xe4] ss:$8 sps:$4 sm:$0xff]   ;;  %v10986_v22 = vld [vmem:[#allocation6 + $0xe0] ss:$8 sps:$4 sm:$0xff]  }
 0x1ee   :  { %6967 = vmatpush1.bf16.msra.mxu1 %v9531_v32  ;;  %v9612_v32 = vcombine.high %v3206_v26, %v3210_v28  ;;  %v3282_v26 = vld [vmem:[#allocation9 + $0x6a0] sm:$0xff]  ;;  %v10991_v28 = vld [vmem:[#allocation6 + $0xf4] ss:$8 sps:$4 sm:$0xff]  }
 0x1ef   :  { %6968 = vmatprep.subr.bf16.mxu1 %v9540_v34  ;;  %v3214_v34 = vld [vmem:[#allocation9 + $0x480] sm:$0xff]  ;;  %2999 = vmatpush1.bf16.msra.mxu0 %v10965_v30  ;;  %v10989_v30 = vld [vmem:[#allocation6 + $0xf0] ss:$8 sps:$4 sm:$0xff]  }
 0x1f0   :  { %v9620_v40 = vcombine.high %v3214_v34, %v3218_v35  ;;  %v9619_v44 = vcombine.low %v3214_v34, %v3218_v35  ;;  %v3290_v34 = vld [vmem:[#allocation9 + $0x6e0] sm:$0xff] }
 0x1f1   :  { %v10994_v35 = vld [vmem:[#allocation6 + $0x104] ss:$8 sps:$4 sm:$0xff]  }
 0x1f2   :  { %6969 = vmatpush1.bf16.msra.mxu1 %v9539_v38  ;;  %v10968_v38 = vld [vmem:[#allocation6 + $0x80] ss:$8 sps:$4 sm:$0xff]  }
 0x1f3   :  { %6970 = vmatprep.subr.bf16.mxu1 %v9548_v39  ;;  %v10970_v39 = vld [vmem:[#allocation6 + $0x84] ss:$8 sps:$4 sm:$0xff]  }
 0x1f4   :  { %3000 = vmatprep.subr.bf16.mxu0 %v10970_v39  ;;  %v3294_v39 = vld [vmem:[#allocation9 + $0x700] sm:$0xff] }
 0x1f5   :  { %3001 = vmatpush1.bf16.msra.mxu0 %v10968_v38 }
 0x1f6   :  { %6971 = vmatpush1.bf16.msra.mxu1 %v9547_v43  ;;  %v3226_v43 = vld [vmem:[#allocation9 + $0x4e0] sm:$0xff] }
 0x1f7   :  { %6972 = vmatprep.subr.bf16.mxu1 %v9556_v46  ;;  %v10973_v46 = vld [vmem:[#allocation6 + $0x94] ss:$8 sps:$4 sm:$0xff]   ;;  %v9628_v48 = vcombine.high %v3222_v41, %v3226_v43  ;;  %v9627_v53 = vcombine.low %v3222_v41, %v3226_v43 }
 0x1f8   :  { %3002 = vmatprep.subr.bf16.mxu0 %v10973_v46 }
 0x1f9   :  { %3003 = vmatpush1.bf16.msra.mxu0 %v10971_v45  ;;  %v3306_v45 = vld [vmem:[#allocation9 + $0x760] sm:$0xff] }
 0x1fa   :  { %6973 = vmatpush1.bf16.msra.mxu1 %v9555_v51  ;;  %v3234_v51 = vld [vmem:[#allocation9 + $0x520] sm:$0xff] }
 0x1fb   :  { %6974 = vmatprep.subr.bf16.mxu1 %v9564_v56  ;;  %v10976_v56 = vld [vmem:[#allocation6 + $0xa4] ss:$8 sps:$4 sm:$0xff]   ;;  %v9636_v57 = vcombine.high %v3230_v50, %v3234_v51  ;;  %v9635_v61 = vcombine.low %v3230_v50, %v3234_v51 }
 0x1fc   :  { %3004 = vmatprep.subr.bf16.mxu0 %v10976_v56  ;;  %v3310_v50 = vld [vmem:[#allocation9 + $0x780] sm:$0xff] }
 0x1fd   :  { %3005 = vmatpush1.bf16.msra.mxu0 %v10974_v55  ;;  %v3314_v51 = vld [vmem:[#allocation9 + $0x7a0] sm:$0xff] }
 0x1fe   :  { %6975 = vmatpush1.bf16.msra.mxu1 %v9563_v59  ;;  %v3242_v59 = vld [vmem:[#allocation9 + $0x560] sm:$0xff]  ;;  %v9716_v55 = vcombine.high %v3310_v50, %v3314_v51 }
 0x1ff   :  { %6976 = vmatprep.subr.bf16.mxu1 %v9572_v63  ;;  %v10979_v63 = vld [vmem:[#allocation6 + $0xb4] ss:$8 sps:$4 sm:$0xff]   ;;  %v9644_v0 = vcombine.high %v3238_v58, %v3242_v59  ;;  %v9643_v4 = vcombine.low %v3238_v58, %v3242_v59  ;;  %v3318_v56 = vld [vmem:[#allocation9 + $0x7c0] sm:$0xff]  ;;  %v9715_v58 = vcombine.low %v3310_v50, %v3314_v51 }
 0x200   :  { %3006 = vmatprep.subr.bf16.mxu0 %v10979_v63  ;;  %v3418_v50 = vld [vmem:[#allocation9 + $0xae0] sm:$0xff] }
 0x201   :  { %3007 = vmatpush1.bf16.msra.mxu0 %v10977_v62  ;;  %v3330_v62 = vld [vmem:[#allocation9 + $0x820] sm:$0xff] }
 0x202   :  { %6977 = vmatpush1.bf16.msra.mxu1 %v9571_v3  ;;  %v3250_v3 = vld [vmem:[#allocation9 + $0x5a0] sm:$0xff]  ;;  %3008 = vmatprep.subr.bf16.mxu0 %v10982_v8 }
 0x203   :  { %6978 = vmatprep.subr.bf16.mxu1 %v9580_v6  ;;  %v9652_v5 = vcombine.high %v3246_v2, %v3250_v3  ;;  %v3254_v6 = vld [vmem:[#allocation9 + $0x5c0] sm:$0xff] }
 0x204   :  { %v9660_v9 = vcombine.high %v3254_v6, %v3258_v7 }
 0x205   :  { %3009 = vmatpush1.bf16.msra.mxu0 %v10980_v16  ;;  %v3350_v16 = vld [vmem:[#allocation9 + $0x8c0] sm:$0xff] }
 0x206   :  { %6979 = vmatpush1.bf16.msra.mxu1 %v9579_v49  ;;  %v9651_v49 = vcombine.low %v3246_v2, %v3250_v3  ;;  %3010 = vmatprep.subr.bf16.mxu0 %v10985_v12  ;;  %v3334_v2 = vld [vmem:[#allocation9 + $0x840] sm:$0xff] }
 0x207   :  { %6980 = vmatprep.subr.bf16.mxu1 %v9588_v10  ;;  %v3262_v10 = vld [vmem:[#allocation9 + $0x600] sm:$0xff] }
 0x208   :  { %v9668_v18 = vcombine.high %v3262_v10, %v3266_v11  ;;  %v3338_v3 = vld [vmem:[#allocation9 + $0x860] sm:$0xff] }
 0x209   :  { %3011 = vmatpush1.bf16.msra.mxu0 %v10983_v15  ;;  %v9739_v8 = vcombine.low %v3334_v2, %v3338_v3  ;;  %v3358_v12 = vld [vmem:[#allocation9 + $0x900] sm:$0xff] }
 0x20a   :  { %6981 = vmatpush1.bf16.msra.mxu1 %v9587_v14  ;;  %v9659_v14 = vcombine.low %v3254_v6, %v3258_v7  ;;  %3012 = vmatprep.subr.bf16.mxu0 %v10988_v21  ;;  %v3342_v6 = vld [vmem:[#allocation9 + $0x880] sm:$0xff] }
 0x20b   :  { %6982 = vmatprep.subr.bf16.mxu1 %v9596_v19  ;;  %v3270_v19 = vld [vmem:[#allocation9 + $0x640] sm:$0xff] }
 0x20c   :  { %v9676_v24 = vcombine.high %v3270_v19, %v3274_v20  ;;  %v3346_v7 = vld [vmem:[#allocation9 + $0x8a0] sm:$0xff] }
 0x20d   :  { %3013 = vmatpush1.bf16.msra.mxu0 %v10986_v22  ;;  %v3374_v22 = vld [vmem:[#allocation9 + $0x980] sm:$0xff] }
 0x20e   :  { %6983 = vmatpush1.bf16.msra.mxu1 %v9595_v52  ;;  %v9667_v52 = vcombine.low %v3262_v10, %v3266_v11  ;;  %3014 = vmatprep.subr.bf16.mxu0 %v10991_v28  ;;  %v9747_v10 = vcombine.low %v3342_v6, %v3346_v7  ;;  %v3382_v28 = vld [vmem:[#allocation9 + $0x9c0] sm:$0xff] }
 0x20f   :  { %6993 = vmatprep.subr.bf16.mxu1 %v9604_v25  ;;  %v3278_v25 = vld [vmem:[#allocation9 + $0x680] sm:$0xff] }
 0x210   :  { %v9684_v31 = vcombine.high %v3278_v25, %v3282_v26 }
 0x211   :  { %6985 = vmatmul.mubr.bf16.vlgmr.msra.gmra.mrb[4].mxu1 %v11690_v13  ;;  %3015 = vmatpush1.bf16.msra.mxu0 %v10989_v30 }
 0x212   :  { %6994 = vmatpush1.bf16.msra.mxu1 %v9603_v29  ;;  %7025 = vmatprep.mubr.bf16.mxu1 %v11694_v17  ;;  %v9675_v29 = vcombine.low %v3270_v19, %v3274_v20  ;;  %v3366_v19 = vld [vmem:[#allocation9 + $0x940] sm:$0xff] }
 0x213   :  { %6995 = vmatprep.subr.bf16.mxu1 %v9612_v32  ;;  %v3286_v32 = vld [vmem:[#allocation9 + $0x6c0] sm:$0xff]  ;;  %3025 = vmatprep.subr.bf16.mxu0 %v10994_v35 }
 0x214   :  { %v9692_v38 = vcombine.high %v3286_v32, %v3290_v34  ;;  %v9691_v41 = vcombine.low %v3286_v32, %v3290_v34  ;;  %v3370_v20 = vld [vmem:[#allocation9 + $0x960] sm:$0xff] }
 0x215   :  { %v3390_v32 = vld [vmem:[#allocation9 + $0xa00] sm:$0xff] }
 0x216   :  { %6996 = vmatpush1.bf16.msra.mxu1 %v9611_v36  ;;  %v9683_v36 = vcombine.low %v3278_v25, %v3282_v26  ;;  %v9771_v25 = vcombine.low %v3366_v19, %v3370_v20  ;;  %v3394_v34 = vld [vmem:[#allocation9 + $0xa20] sm:$0xff] }
 0x217   :  { %6997 = vmatprep.subr.bf16.mxu1 %v9620_v40  ;;  %v3298_v40 = vld [vmem:[#allocation9 + $0x720] sm:$0xff] }
 0x218   :  { %v9700_v43 = vcombine.high %v3294_v39, %v3298_v40  ;;  %v9699_v46 = vcombine.low %v3294_v39, %v3298_v40  ;;  %v3402_v39 = vld [vmem:[#allocation9 + $0xa60] sm:$0xff]  ;;  %v9795_v40 = vcombine.low %v3390_v32, %v3394_v34 }
 0x21a   :  { %6998 = vmatpush1.bf16.msra.mxu1 %v9619_v44  ;;  %v3302_v44 = vld [vmem:[#allocation9 + $0x740] sm:$0xff] }
 0x21b   :  { %6999 = vmatprep.subr.bf16.mxu1 %v9628_v48  ;;  %v9708_v48 = vcombine.high %v3302_v44, %v3306_v45 }
 0x21e   :  { %7000 = vmatpush1.bf16.msra.mxu1 %v9627_v53  ;;  %v9707_v53 = vcombine.low %v3302_v44, %v3306_v45  ;;  %v3410_v44 = vld [vmem:[#allocation9 + $0xaa0] sm:$0xff] }
 0x21f   :  { %7001 = vmatprep.subr.bf16.mxu1 %v9636_v57  ;;  %v3322_v57 = vld [vmem:[#allocation9 + $0x7e0] sm:$0xff] }
 0x220   :  { %v9724_v59 = vcombine.high %v3318_v56, %v3322_v57  ;;  %v9723_v63 = vcombine.low %v3318_v56, %v3322_v57  ;;  %v3426_v56 = vld [vmem:[#allocation9 + $0xb20] sm:$0xff] }
 0x222   :  { %7002 = vmatpush1.bf16.msra.mxu1 %v9635_v61  ;;  %v3326_v61 = vld [vmem:[#allocation9 + $0x800] sm:$0xff] }
 0x223   :  { %7003 = vmatprep.subr.bf16.mxu1 %v9644_v0  ;;  %v9732_v0 = vcombine.high %v3326_v61, %v3330_v62 }
 0x226   :  { %7004 = vmatpush1.bf16.msra.mxu1 %v9643_v4  ;;  %v9731_v4 = vcombine.low %v3326_v61, %v3330_v62  ;;  %v3434_v61 = vld [vmem:[#allocation9 + $0xb60] sm:$0xff] }
 0x227   :  { %7005 = vmatprep.subr.bf16.mxu1 %v9652_v5  ;;  %v9740_v5 = vcombine.high %v3334_v2, %v3338_v3  ;;  %v3442_v2 = vld [vmem:[#allocation9 + $0xba0] sm:$0xff] }
 0x22a   :  { %7006 = vmatpush1.bf16.msra.mxu1 %v9651_v49  ;;  %v9748_v49 = vcombine.high %v3342_v6, %v3346_v7  ;;  %v3450_v6 = vld [vmem:[#allocation9 + $0xbe0] sm:$0xff] }
 0x22b   :  { %7007 = vmatprep.subr.bf16.mxu1 %v9660_v9  ;;  %v3354_v9 = vld [vmem:[#allocation9 + $0x8e0] sm:$0xff] }
 0x22c   :  { %v9756_v11 = vcombine.high %v3350_v16, %v3354_v9  ;;  %v9755_v15 = vcombine.low %v3350_v16, %v3354_v9  ;;  %v3458_v16 = vld [vmem:[#allocation9 + $0xc20] sm:$0xff] }
 0x22e   :  { %7008 = vmatpush1.bf16.msra.mxu1 %v9659_v14  ;;  %v3362_v14 = vld [vmem:[#allocation9 + $0x920] sm:$0xff] }
 0x22f   :  { %7009 = vmatprep.subr.bf16.mxu1 %v9668_v18  ;;  %v9764_v18 = vcombine.high %v3358_v12, %v3362_v14  ;;  %v9763_v21 = vcombine.low %v3358_v12, %v3362_v14  ;;  %v3466_v12 = vld [vmem:[#allocation9 + $0xc60] sm:$0xff] }
 0x232   :  { %7010 = vmatpush1.bf16.msra.mxu1 %v9667_v52  ;;  %v9772_v52 = vcombine.high %v3366_v19, %v3370_v20  ;;  %v3474_v19 = vld [vmem:[#allocation9 + $0xca0] sm:$0xff] }
 0x233   :  { %7011 = vmatprep.subr.bf16.mxu1 %v9676_v24  ;;  %v3378_v24 = vld [vmem:[#allocation9 + $0x9a0] sm:$0xff] }
 0x234   :  { %v9780_v26 = vcombine.high %v3374_v22, %v3378_v24  ;;  %v9779_v30 = vcombine.low %v3374_v22, %v3378_v24  ;;  %v3482_v22 = vld [vmem:[#allocation9 + $0xce0] sm:$0xff] }
 0x236   :  { %7012 = vmatpush1.bf16.msra.mxu1 %v9675_v29  ;;  %v3386_v29 = vld [vmem:[#allocation9 + $0x9e0] sm:$0xff] }
 0x237   :  { %7013 = vmatprep.subr.bf16.mxu1 %v9684_v31  ;;  %v9788_v31 = vcombine.high %v3382_v28, %v3386_v29  ;;  %v9787_v35 = vcombine.low %v3382_v28, %v3386_v29  ;;  %v3490_v28 = vld [vmem:[#allocation9 + $0xd20] sm:$0xff] }
 0x23a   :  { %7014 = vmatpush1.bf16.msra.mxu1 %v9683_v36  ;;  %v9796_v36 = vcombine.high %v3390_v32, %v3394_v34  ;;  %v3498_v32 = vld [vmem:[#allocation9 + $0xd60] sm:$0xff]  ;;  %v11762_v34 = vsub.s32 0, %v11672_v42 }
 0x23b   :  { %7015 = vmatprep.subr.bf16.mxu1 %v9692_v38  ;;  %v3398_v38 = vld [vmem:[#allocation9 + $0xa40] sm:$0xff] }
 0x23c   :  { %v9803_v45 = vcombine.low %v3398_v38, %v3402_v39 }
 0x23e   :  { %7016 = vmatpush1.bf16.msra.mxu1 %v9691_v41  ;;  %v9804_v41 = vcombine.high %v3398_v38, %v3402_v39  ;;  %v465_v38 = vld [vmem:[#allocation4] sm:$0xf]  ;;  %v11766_v39 = vsub.s32 1, %v11672_v42 }
 0x23f   :  { %7017 = vmatprep.subr.bf16.mxu1 %v9700_v43  ;;  %v3406_v43 = vld [vmem:[#allocation9 + $0xa80] sm:$0xff] }
 0x240   :  { %v9811_v51 = vcombine.low %v3406_v43, %v3410_v44 }
 0x242   :  { %7018 = vmatpush1.bf16.msra.mxu1 %v9699_v46  ;;  %v9812_v46 = vcombine.high %v3406_v43, %v3410_v44  ;;  %v3502_v43 = vld [vmem:[#allocation9 + $0xd80] sm:$0xff] }
 0x243   :  { %7019 = vmatprep.subr.bf16.mxu1 %v9708_v48  ;;  %v3414_v48 = vld [vmem:[#allocation9 + $0xac0] sm:$0xff] }
 0x244   :  { %v9819_v57 = vcombine.low %v3414_v48, %v3418_v50  ;;  %v3506_v44 = vld [vmem:[#allocation9 + $0xda0] sm:$0xff] }
 0x246   :  { %7020 = vmatpush1.bf16.msra.mxu1 %v9707_v53  ;;  %v9820_v53 = vcombine.high %v3414_v48, %v3418_v50  ;;  %v474_v48 = vrot.slane %v465_v38, %v11766_v39 }
 0x247   :  { %7021 = vmatprep.subr.bf16.mxu1 %v9716_v55  ;;  %v3422_v55 = vld [vmem:[#allocation9 + $0xb00] sm:$0xff] }
 0x248   :  { %v9827_v62 = vcombine.low %v3422_v55, %v3426_v56 }
 0x24a   :  { %7022 = vmatpush1.bf16.msra.mxu1 %v9715_v58  ;;  %v9828_v58 = vcombine.high %v3422_v55, %v3426_v56 }
 0x24b   :  { %7023 = vmatprep.subr.bf16.mxu1 %v9724_v59  ;;  %v3430_v59 = vld [vmem:[#allocation9 + $0xb40] sm:$0xff] }
 0x24c   :  { %v9835_v3 = vcombine.low %v3430_v59, %v3434_v61 }
 0x24e   :  { %7024 = vmatpush1.bf16.msra.mxu1 %v9723_v63  ;;  %v9836_v63 = vcombine.high %v3430_v59, %v3434_v61 }
 0x24f   :  { %7034 = vmatprep.subr.bf16.mxu1 %v9732_v0  ;;  %v3438_v0 = vld [vmem:[#allocation9 + $0xb80] sm:$0xff] }
 0x250   :  { %v9843_v7 = vcombine.low %v3438_v0, %v3442_v2 }
 0x251   :  { %7026 = vmatmul.mubr.bf16.vlgmr.msra.gmra.mrb[4].mxu1 %v11709_v23 }
 0x252   :  { %7035 = vmatpush1.bf16.msra.mxu1 %v9731_v4  ;;  %7066 = vmatprep.mubr.bf16.mxu1 %v11712_v27  ;;  %v9844_v4 = vcombine.high %v3438_v0, %v3442_v2 }
 0x253   :  { %7036 = vmatprep.subr.bf16.mxu1 %v9740_v5  ;;  %v3446_v5 = vld [vmem:[#allocation9 + $0xbc0] sm:$0xff] }
 0x254   :  { %v9851_v9 = vcombine.low %v3446_v5, %v3450_v6 }
 0x256   :  { %7037 = vmatpush1.bf16.msra.mxu1 %v9739_v8  ;;  %v9852_v8 = vcombine.high %v3446_v5, %v3450_v6  ;;  %v9907_v5 = vcombine.low %v3502_v43, %v3506_v44 }
 0x257   :  { %7038 = vmatprep.subr.bf16.mxu1 %v9748_v49  ;;  %v3454_v49 = vld [vmem:[#allocation9 + $0xc00] sm:$0xff] }
 0x258   :  { %v9859_v14 = vcombine.low %v3454_v49, %v3458_v16 }
 0x25a   :  { %7039 = vmatpush1.bf16.msra.mxu1 %v9747_v10  ;;  %v9860_v10 = vcombine.high %v3454_v49, %v3458_v16  ;;  %v3518_v49 = vld [vmem:[#allocation9 + $0xe00] sm:$0xff] }
 0x25b   :  { %7040 = vmatprep.subr.bf16.mxu1 %v9756_v11  ;;  %v3462_v11 = vld [vmem:[#allocation9 + $0xc40] sm:$0xff] }
 0x25c   :  { %v9867_v20 = vcombine.low %v3462_v11, %v3466_v12  ;;  %v3522_v16 = vld [vmem:[#allocation9 + $0xe20] sm:$0xff] }
 0x25e   :  { %7041 = vmatpush1.bf16.msra.mxu1 %v9755_v15  ;;  %v9868_v15 = vcombine.high %v3462_v11, %v3466_v12  ;;  %v3526_v11 = vld [vmem:[#allocation9 + $0xe40] sm:$0xff] }
 0x25f   :  { %7042 = vmatprep.subr.bf16.mxu1 %v9764_v18  ;;  %v3470_v18 = vld [vmem:[#allocation9 + $0xc80] sm:$0xff] }
 0x260   :  { %v9875_v24 = vcombine.low %v3470_v18, %v3474_v19  ;;  %v3530_v12 = vld [vmem:[#allocation9 + $0xe60] sm:$0xff] }
 0x262   :  { %7043 = vmatpush1.bf16.msra.mxu1 %v9763_v21  ;;  %v9876_v21 = vcombine.high %v3470_v18, %v3474_v19  ;;  %v3534_v18 = vld [vmem:[#allocation9 + $0xe80] sm:$0xff] }
 0x263   :  { %7044 = vmatprep.subr.bf16.mxu1 %v9772_v52  ;;  %v3478_v52 = vld [vmem:[#allocation9 + $0xcc0] sm:$0xff] }
 0x264   :  { %v9883_v29 = vcombine.low %v3478_v52, %v3482_v22  ;;  %v3538_v19 = vld [vmem:[#allocation9 + $0xea0] sm:$0xff] }
 0x266   :  { %7045 = vmatpush1.bf16.msra.mxu1 %v9771_v25  ;;  %v9884_v25 = vcombine.high %v3478_v52, %v3482_v22  ;;  %v9940_v22 = vcombine.high %v3534_v18, %v3538_v19 }
 0x267   :  { %7046 = vmatprep.subr.bf16.mxu1 %v9780_v26  ;;  %v3486_v26 = vld [vmem:[#allocation9 + $0xd00] sm:$0xff] }
 0x26a   :  { %7047 = vmatpush1.bf16.msra.mxu1 %v9779_v30  ;;  %v9892_v30 = vcombine.high %v3486_v26, %v3490_v28 }
 0x26b   :  { %7048 = vmatprep.subr.bf16.mxu1 %v9788_v31  ;;  %v3494_v31 = vld [vmem:[#allocation9 + $0xd40] sm:$0xff] }
 0x26e   :  { %7049 = vmatpush1.bf16.msra.mxu1 %v9787_v35  ;;  %v477_v35 = vsub.s32 2, %v11672_v42 }
 0x26f   :  { %7050 = vmatprep.subr.bf16.mxu1 %v9796_v36  ;;  %v9891_v36 = vcombine.low %v3486_v26, %v3490_v28  ;;  %v10992_v26 = vld [vmem:[#allocation6 + $0x100] ss:$8 sps:$4 sm:$0xff]  }
 0x270   :  { %v3542_v28 = vld [vmem:[#allocation9 + $0xec0] sm:$0xff] }
 0x272   :  { %7051 = vmatpush1.bf16.msra.mxu1 %v9795_v40  ;;  %v481_v40 = vsub.s32 3, %v11672_v42 }
 0x273   :  { %7052 = vmatprep.subr.bf16.mxu1 %v9804_v41  ;;  %v9900_v41 = vcombine.high %v3494_v31, %v3498_v32 }
 0x274   :  { %v482_v50 = vrot.slane %v465_v38, %v481_v40 }
 0x276   :  { %7053 = vmatpush1.bf16.msra.mxu1 %v9803_v45  ;;  %v470_v45 = vrot.slane %v465_v38, %v11762_v34 }
 0x277   :  { %7054 = vmatprep.subr.bf16.mxu1 %v9812_v46  ;;  %v478_v46 = vrot.slane %v465_v38, %v477_v35 }
 0x27a   :  { %7055 = vmatpush1.bf16.msra.mxu1 %v9811_v51  ;;  %v9899_v51 = vcombine.low %v3494_v31, %v3498_v32  ;;  %v10997_v31 = vld [vmem:[#allocation6 + $0x114] ss:$8 sps:$4 sm:$0xff]  }
 0x27b   :  { %7056 = vmatprep.subr.bf16.mxu1 %v9820_v53  ;;  %v9908_v53 = vcombine.high %v3502_v43, %v3506_v44  ;;  %v3550_v43 = vld [vmem:[#allocation9 + $0xf00] sm:$0xff] }
 0x27c   :  { %v3554_v44 = vld [vmem:[#allocation9 + $0xf20] sm:$0xff] }
 0x27e   :  { %7057 = vmatpush1.bf16.msra.mxu1 %v9819_v57  ;;  %v3510_v57 = vld [vmem:[#allocation9 + $0xdc0] sm:$0xff] }
 0x27f   :  { %7058 = vmatprep.subr.bf16.mxu1 %v9828_v58  ;;  %v3514_v58 = vld [vmem:[#allocation9 + $0xde0] sm:$0xff] }
 0x282   :  { %7059 = vmatpush1.bf16.msra.mxu1 %v9827_v62 }
 0x283   :  { %7060 = vmatprep.subr.bf16.mxu1 %v9836_v63 }
 0x286   :  { %7061 = vmatpush1.bf16.msra.mxu1 %v9835_v3 }
 0x287   :  { %7062 = vmatprep.subr.bf16.mxu1 %v9844_v4 }
 0x28a   :  { %7063 = vmatpush1.bf16.msra.mxu1 %v9843_v7 }
 0x28b   :  { %7064 = vmatprep.subr.bf16.mxu1 %v9852_v8  ;;  %v9916_v8 = vcombine.high %v3510_v57, %v3514_v58 }
 0x28e   :  { %7065 = vmatpush1.bf16.msra.mxu1 %v9851_v9  ;;  %v9915_v9 = vcombine.low %v3510_v57, %v3514_v58  ;;  %v11001_v58 = vld [vmem:[#allocation6 + $0x130] ss:$8 sps:$4 sm:$0xff]  }
 0x28f   :  { %7075 = vmatprep.subr.bf16.mxu1 %v9860_v10  ;;  %v9924_v10 = vcombine.high %v3518_v49, %v3522_v16 }
 0x291   :  { %7067 = vmatmul.mubr.bf16.vlgmr.msra.gmra.mrb[4].mxu1 %v11720_v33 }
 0x292   :  { %7076 = vmatpush1.bf16.msra.mxu1 %v9859_v14  ;;  %7107 = vmatprep.mubr.bf16.mxu1 %v11724_v37  ;;  %v9923_v14 = vcombine.low %v3518_v49, %v3522_v16  ;;  %v11007_v49 = vld [vmem:[#allocation6 + $0x150] ss:$8 sps:$4 sm:$0xff]   ;;  %v3582_v16 = vld [vmem:[#allocation9 + $0x1000] sm:$0xff] }
 0x293   :  { %7077 = vmatprep.subr.bf16.mxu1 %v9868_v15  ;;  %v9932_v15 = vcombine.high %v3526_v11, %v3530_v12 }
 0x296   :  { %7078 = vmatpush1.bf16.msra.mxu1 %v9867_v20 }
 0x297   :  { %7079 = vmatprep.subr.bf16.mxu1 %v9876_v21  ;;  %v9931_v21 = vcombine.low %v3526_v11, %v3530_v12 }
 0x29a   :  { %7080 = vmatpush1.bf16.msra.mxu1 %v9875_v24 }
 0x29b   :  { %7081 = vmatprep.subr.bf16.mxu1 %v9884_v25 }
 0x29e   :  { %7082 = vmatpush1.bf16.msra.mxu1 %v9883_v29  ;;  %v3546_v29 = vld [vmem:[#allocation9 + $0xee0] sm:$0xff] }
 0x29f   :  { %7083 = vmatprep.subr.bf16.mxu1 %v9892_v30  ;;  %v9948_v38 = vcombine.high %v3542_v28, %v3546_v29 }
 0x2a2   :  { %7084 = vmatpush1.bf16.msra.mxu1 %v9891_v36  ;;  %v9939_v36 = vcombine.low %v3534_v18, %v3538_v19  ;;  %v3594_v18 = vld [vmem:[#allocation9 + $0x1060] sm:$0xff]  ;;  %v11015_v19 = vld [vmem:[#allocation6 + $0x174] ss:$8 sps:$4 sm:$0xff]  }
 0x2a3   :  { %7085 = vmatprep.subr.bf16.mxu1 %v9900_v41  ;;  %v10995_v41 = vld [vmem:[#allocation6 + $0x110] ss:$8 sps:$4 sm:$0xff]  }
 0x2a4   :  { %v2368_v55 = vpop.f32.mrb[0].mxu0  ;;  %v2573_v56 = vpop.f32.mrb[0].mxu1 }
 0x2a5   :  { %v10320_v59 = vadd.f32 %v2368_v55, %v470_v45  ;;  %v11775_v61 = vadd.f32 %v2573_v56, %v478_v46  ;;  %v2370_v62 = vpop.f32.mrb[1].mxu0  ;;  %v2575_v63 = vpop.f32.mrb[1].mxu1  ;;  %v11000_v45 = vld [vmem:[#allocation6 + $0x124] ss:$8 sps:$4 sm:$0xff]   ;;  %v9947_v46 = vcombine.low %v3542_v28, %v3546_v29  ;;  %v11003_v55 = vld [vmem:[#allocation6 + $0x134] ss:$8 sps:$4 sm:$0xff]   ;;  %v9955_v56 = vcombine.low %v3550_v43, %v3554_v44 }
 0x2a6   :  { %v10321_v0 = vadd.f32 %v2370_v62, %v474_v48  ;;  %v10323_v2 = vadd.f32 %v2575_v63, %v482_v50  ;;  %v2372_v3 = vpop.f32.mrb[2].mxu0  ;;  %v2577_v4 = vpop.f32.mrb[2].mxu1  ;;  %7086 = vmatpush1.bf16.msra.mxu1 %v9899_v51  ;;  %v9956_v48 = vcombine.high %v3550_v43, %v3554_v44  ;;  %v10998_v50 = vld [vmem:[#allocation6 + $0x120] ss:$8 sps:$4 sm:$0xff]   ;;  %v11006_v63 = vld [vmem:[#allocation6 + $0x144] ss:$8 sps:$4 sm:$0xff]  }
 0x2a7   :  { %v2373_v6 = vpop.f32.mrb[3].mxu0  ;;  %v2578_v7 = vpop.f32.mrb[3].mxu1  ;;  %7087 = vmatprep.subr.bf16.mxu1 %v9908_v53  ;;  %11264 = vtanh.f32 %v10320_v59  ;;  %v3558_v51 = vld [vmem:[#allocation9 + $0xf40] sm:$0xff] }
 0x2a8   :  { %11266 = vtanh.f32 %v10321_v0  ;;  %v3562_v53 = vld [vmem:[#allocation9 + $0xf60] sm:$0xff]  ;;  %v11009_v6 = vld [vmem:[#allocation6 + $0x154] ss:$8 sps:$4 sm:$0xff]  }
 0x2a9   :  { %11268 = vtanh.f32 %v10323_v2  ;;  %v9964_v57 = vcombine.high %v3558_v51, %v3562_v53  ;;  %v3566_v59 = vld [vmem:[#allocation9 + $0xf80] sm:$0xff]  ;;  %v9963_v0 = vcombine.low %v3558_v51, %v3562_v53 }
 0x2aa   :  { %7088 = vmatpush1.bf16.msra.mxu1 %v9907_v5  ;;  %v3570_v62 = vld [vmem:[#allocation9 + $0xfa0] sm:$0xff]  ;;  %11270 = vtanh.f32 %v11775_v61  ;;  %v3075_v61 = vld [vmem:[#allocation9 + $0x28] sm:$0xff] }
 0x2ab   :  { %7089 = vmatprep.subr.bf16.mxu1 %v9916_v8  ;;  %v9972_v2 = vcombine.high %v3566_v59, %v3570_v62  ;;  %v11004_v3 = vld [vmem:[#allocation6 + $0x140] ss:$8 sps:$4 sm:$0xff]   ;;  %v9971_v7 = vcombine.low %v3566_v59, %v3570_v62 }
 0x2ac   :  { %v3574_v4 = vld [vmem:[#allocation9 + $0xfc0] sm:$0xff] }
 0x2ad   :  { %v3578_v5 = vld [vmem:[#allocation9 + $0xfe0] sm:$0xff] }
 0x2ae   :  { %7090 = vmatpush1.bf16.msra.mxu1 %v9915_v9  ;;  %v9980_v8 = vcombine.high %v3574_v4, %v3578_v5  ;;  %v3586_v9 = vld [vmem:[#allocation9 + $0x1020] sm:$0xff]  ;;  %v9979_v11 = vcombine.low %v3574_v4, %v3578_v5 }
 0x2af   :  { %7091 = vmatprep.subr.bf16.mxu1 %v9924_v10  ;;  %v11012_v10 = vld [vmem:[#allocation6 + $0x164] ss:$8 sps:$4 sm:$0xff]   ;;  %v9988_v12 = vcombine.high %v3582_v16, %v3586_v9  ;;  %v11016_v29 = vld [vmem:[#allocation6 + $0x180] ss:$8 sps:$4 sm:$0xff]  }
 0x2b0   :  { %v3614_v43 = vld [vmem:[#allocation9 + $0x1100] sm:$0xff] }
 0x2b1   :  { %v11265_v20 = vpop.eup %11264  ;;  %v3618_v44 = vld [vmem:[#allocation9 + $0x1120] sm:$0xff] }
 0x2b2   :  { %7092 = vmatpush1.bf16.msra.mxu1 %v9923_v14  ;;  %v11267_v52 = vpop.eup %11266  ;;  %v2584_v30 = vpack.c.bf16 %v11265_v20, %v11265_v20  ;;  %v11010_v14 = vld [vmem:[#allocation6 + $0x160] ss:$8 sps:$4 sm:$0xff]   ;;  %v9987_v20 = vcombine.low %v3582_v16, %v3586_v9 }
 0x2b3   :  { %7093 = vmatprep.subr.bf16.mxu1 %v9932_v15  ;;  %v11269_v24 = vpop.eup %11268  ;;  %v2585_v25 = vpack.c.bf16 %v11267_v52, %v11267_v52  ;;  %v3590_v15 = vld [vmem:[#allocation9 + $0x1040] sm:$0xff]  ;;  %v11013_v52 = vld [vmem:[#allocation6 + $0x170] ss:$8 sps:$4 sm:$0xff]  }
 0x2b4   :  { %v2587_v32 = vpack.c.bf16 %v11269_v24, %v11269_v24  ;;  %v3602_v24 = vld [vmem:[#allocation9 + $0x10a0] sm:$0xff] }
 0x2b5   :  { %3016 = vmatprep.mubr.bf16.mxu0 %v2585_v25  ;;  %v11018_v25 = vld [vmem:[#allocation6 + $0x184] ss:$8 sps:$4 sm:$0xff]  }
 0x2b6   :  { %7094 = vmatpush1.bf16.msra.mxu1 %v9931_v21  ;;  %3017 = vmatmul.mubr.bf16.vlgmr.msra.gmra.mrb[4].mxu0 %v2584_v30  ;;  %v9996_v21 = vcombine.high %v3590_v15, %v3594_v18  ;;  %v3606_v30 = vld [vmem:[#allocation9 + $0x10c0] sm:$0xff] }
 0x2b7   :  { %7095 = vmatprep.subr.bf16.mxu1 %v9940_v22  ;;  %3026 = vmatpush1.bf16.msra.mxu0 %v10992_v26  ;;  %v3598_v22 = vld [vmem:[#allocation9 + $0x1080] sm:$0xff]  ;;  %v9995_v26 = vcombine.low %v3590_v15, %v3594_v18 }
 0x2b8   :  { %3057 = vmatprep.mubr.bf16.mxu0 %v2587_v32  ;;  %3027 = vmatprep.subr.bf16.mxu0 %v10997_v31  ;;  %v10004_v28 = vcombine.high %v3598_v22, %v3602_v24  ;;  %v3610_v31 = vld [vmem:[#allocation9 + $0x10e0] sm:$0xff]  ;;  %v11021_v32 = vld [vmem:[#allocation6 + $0x194] ss:$8 sps:$4 sm:$0xff]  }
 0x2b9   :  { %v3622_v51 = vld [vmem:[#allocation9 + $0x1140] sm:$0xff] }
 0x2ba   :  { %7096 = vmatpush1.bf16.msra.mxu1 %v9939_v36  ;;  %v10003_v36 = vcombine.low %v3598_v22, %v3602_v24  ;;  %v3626_v53 = vld [vmem:[#allocation9 + $0x1160] sm:$0xff]  ;;  %v11037_v22 = vld [vmem:[#allocation6 + $0x1f0] ss:$8 sps:$4 sm:$0xff]  }
 0x2bb   :  { %7097 = vmatprep.subr.bf16.mxu1 %v9948_v38  ;;  %3028 = vmatpush1.bf16.msra.mxu0 %v10995_v41  ;;  %v10012_v38 = vcombine.high %v3606_v30, %v3610_v31  ;;  %v11019_v41 = vld [vmem:[#allocation6 + $0x190] ss:$8 sps:$4 sm:$0xff]   ;;  %v3630_v59 = vld [vmem:[#allocation9 + $0x1180] sm:$0xff] }
 0x2bc   :  { %3029 = vmatprep.subr.bf16.mxu0 %v11000_v45  ;;  %v11024_v45 = vld [vmem:[#allocation6 + $0x1a4] ss:$8 sps:$4 sm:$0xff]  }
 0x2bd   :  { %v3634_v62 = vld [vmem:[#allocation9 + $0x11a0] sm:$0xff] }
 0x2be   :  { %7098 = vmatpush1.bf16.msra.mxu1 %v9947_v46  ;;  %v10011_v46 = vcombine.low %v3606_v30, %v3610_v31  ;;  %v3638_v4 = vld [vmem:[#allocation9 + $0x11c0] sm:$0xff]  ;;  %v3079_v30 = vld [vmem:[#allocation9 + $0x48] sm:$0xff] }
 0x2bf   :  { %7099 = vmatprep.subr.bf16.mxu1 %v9956_v48  ;;  %3030 = vmatpush1.bf16.msra.mxu0 %v10998_v50  ;;  %v10020_v48 = vcombine.high %v3614_v43, %v3618_v44  ;;  %v11022_v50 = vld [vmem:[#allocation6 + $0x1a0] ss:$8 sps:$4 sm:$0xff]  }
 0x2c0   :  { %3031 = vmatprep.subr.bf16.mxu0 %v11003_v55  ;;  %v11027_v55 = vld [vmem:[#allocation6 + $0x1b4] ss:$8 sps:$4 sm:$0xff]   ;;  %v3642_v5 = vld [vmem:[#allocation9 + $0x11e0] sm:$0xff]  ;;  %v3083_v31 = vld [vmem:[#allocation9 + $0x68] sm:$0xff] }
 0x2c1   :  { %v3646_v16 = vld [vmem:[#allocation9 + $0x1200] sm:$0xff] }
 0x2c2   :  { %7100 = vmatpush1.bf16.msra.mxu1 %v9955_v56  ;;  %v10019_v56 = vcombine.low %v3614_v43, %v3618_v44  ;;  %v3650_v9 = vld [vmem:[#allocation9 + $0x1220] sm:$0xff]  ;;  %v9486_v44 = vcombine.high %v3079_v30, %v3083_v31 }
 0x2c3   :  { %7101 = vmatprep.subr.bf16.mxu1 %v9964_v57  ;;  %3032 = vmatpush1.bf16.msra.mxu0 %v11001_v58  ;;  %v10028_v57 = vcombine.high %v3622_v51, %v3626_v53  ;;  %v11025_v58 = vld [vmem:[#allocation6 + $0x1b0] ss:$8 sps:$4 sm:$0xff]   ;;  %v3654_v15 = vld [vmem:[#allocation9 + $0x1240] sm:$0xff] }
 0x2c4   :  { %3033 = vmatprep.subr.bf16.mxu0 %v11006_v63  ;;  %v11030_v63 = vld [vmem:[#allocation6 + $0x1c4] ss:$8 sps:$4 sm:$0xff]  }
 0x2c5   :  { %v3658_v18 = vld [vmem:[#allocation9 + $0x1260] sm:$0xff] }
 0x2c6   :  { %7102 = vmatpush1.bf16.msra.mxu1 %v9963_v0  ;;  %v10027_v0 = vcombine.low %v3622_v51, %v3626_v53  ;;  %v3662_v24 = vld [vmem:[#allocation9 + $0x1280] sm:$0xff]  ;;  %v9485_v51 = vcombine.low %v3079_v30, %v3083_v31  ;;  %v3127_v30 = vld [vmem:[#allocation9 + $0x1c8] sm:$0xff] }
 0x2c7   :  { %7103 = vmatprep.subr.bf16.mxu1 %v9972_v2  ;;  %3034 = vmatpush1.bf16.msra.mxu0 %v11004_v3  ;;  %v10036_v2 = vcombine.high %v3630_v59, %v3634_v62  ;;  %v11028_v3 = vld [vmem:[#allocation6 + $0x1c0] ss:$8 sps:$4 sm:$0xff]  }
 0x2c8   :  { %3035 = vmatprep.subr.bf16.mxu0 %v11009_v6  ;;  %v11033_v6 = vld [vmem:[#allocation6 + $0x1d4] ss:$8 sps:$4 sm:$0xff]   ;;  %v3678_v53 = vld [vmem:[#allocation9 + $0x1300] sm:$0xff]  ;;  %v3131_v31 = vld [vmem:[#allocation9 + $0x1e8] sm:$0xff] }
 0x2ca   :  { %7104 = vmatpush1.bf16.msra.mxu1 %v9971_v7  ;;  %v10035_v7 = vcombine.low %v3630_v59, %v3634_v62  ;;  %v3099_v59 = vld [vmem:[#allocation9 + $0xe8] sm:$0xff] }
 0x2cb   :  { %7105 = vmatprep.subr.bf16.mxu1 %v9980_v8  ;;  %3036 = vmatpush1.bf16.msra.mxu0 %v11007_v49  ;;  %v10044_v8 = vcombine.high %v3638_v4, %v3642_v5  ;;  %v11031_v49 = vld [vmem:[#allocation6 + $0x1d0] ss:$8 sps:$4 sm:$0xff]  }
 0x2cc   :  { %3037 = vmatprep.subr.bf16.mxu0 %v11012_v10  ;;  %v11036_v10 = vld [vmem:[#allocation6 + $0x1e4] ss:$8 sps:$4 sm:$0xff]  }
 0x2ce   :  { %7106 = vmatpush1.bf16.msra.mxu1 %v9979_v11  ;;  %v10043_v11 = vcombine.low %v3638_v4, %v3642_v5  ;;  %v3103_v5 = vld [vmem:[#allocation9 + $0x108] sm:$0xff] }
 0x2cf   :  { %7116 = vmatprep.subr.bf16.mxu1 %v9988_v12  ;;  %3038 = vmatpush1.bf16.msra.mxu0 %v11010_v14  ;;  %v10052_v12 = vcombine.high %v3646_v16, %v3650_v9  ;;  %v11034_v14 = vld [vmem:[#allocation6 + $0x1e0] ss:$8 sps:$4 sm:$0xff]  }
 0x2d0   :  { %3039 = vmatprep.subr.bf16.mxu0 %v11015_v19  ;;  %v11039_v19 = vld [vmem:[#allocation6 + $0x1f4] ss:$8 sps:$4 sm:$0xff]  }
 0x2d1   :  { %7108 = vmatmul.mubr.bf16.vlgmr.msra.gmra.mrb[4].mxu1 %v11739_v47 }
 0x2d2   :  { %7117 = vmatpush1.bf16.msra.mxu1 %v9987_v20  ;;  %7148 = vmatprep.mubr.bf16.mxu1 %v11742_v54  ;;  %v10051_v20 = vcombine.low %v3646_v16, %v3650_v9  ;;  %v3698_v16 = vld [vmem:[#allocation9 + $0x13a0] sm:$0xff] }
 0x2d3   :  { %7118 = vmatprep.subr.bf16.mxu1 %v9996_v21  ;;  %3040 = vmatpush1.bf16.msra.mxu0 %v11013_v52  ;;  %v3071_v21 = vld [vmem:[#allocation9 + $0x8] sm:$0xff]  ;;  %v10060_v52 = vcombine.high %v3654_v15, %v3658_v18 }
 0x2d4   :  { %3041 = vmatprep.subr.bf16.mxu0 %v11018_v25  ;;  %v3666_v25 = vld [vmem:[#allocation9 + $0x12a0] sm:$0xff] }
 0x2d6   :  { %7119 = vmatpush1.bf16.msra.mxu1 %v9995_v26  ;;  %v9478_v26 = vcombine.high %v3071_v21, %v3075_v61 }
 0x2d7   :  { %7120 = vmatprep.subr.bf16.mxu1 %v10004_v28  ;;  %3042 = vmatpush1.bf16.msra.mxu0 %v11016_v29  ;;  %v11271_v28 = vpop.eup %11270  ;;  %v10059_v29 = vcombine.low %v3654_v15, %v3658_v18  ;;  %v3702_v18 = vld [vmem:[#allocation9 + $0x13c0] sm:$0xff] }
 0x2d8   :  { %3043 = vmatprep.subr.bf16.mxu0 %v11021_v32  ;;  %v10068_v32 = vcombine.high %v3662_v24, %v3666_v25  ;;  %v2586_v43 = vpack.c.bf16 %v11271_v28, %v11271_v28 }
 0x2da   :  { %7121 = vmatpush1.bf16.msra.mxu1 %v10003_v36  ;;  %v9477_v36 = vcombine.low %v3071_v21, %v3075_v61  ;;  %v3119_v61 = vld [vmem:[#allocation9 + $0x188] sm:$0xff] }
 0x2db   :  { %7122 = vmatprep.subr.bf16.mxu1 %v10012_v38  ;;  %3044 = vmatpush1.bf16.msra.mxu0 %v11019_v41  ;;  %v3670_v38 = vld [vmem:[#allocation9 + $0x12c0] sm:$0xff] }
 0x2dc   :  { %3045 = vmatprep.subr.bf16.mxu0 %v11024_v45  ;;  %v3674_v41 = vld [vmem:[#allocation9 + $0x12e0] sm:$0xff]  ;;  %v10067_v45 = vcombine.low %v3662_v24, %v3666_v25  ;;  %v3072_v25 = vld [vmem:[#allocation9 + $0x10] sm:$0xff] }
 0x2de   :  { %7123 = vmatpush1.bf16.msra.mxu1 %v10011_v46  ;;  %v3087_v46 = vld [vmem:[#allocation9 + $0x88] sm:$0xff] }
 0x2df   :  { %7124 = vmatprep.subr.bf16.mxu1 %v10020_v48  ;;  %3046 = vmatpush1.bf16.msra.mxu0 %v11022_v50  ;;  %v3091_v48 = vld [vmem:[#allocation9 + $0xa8] sm:$0xff]  ;;  %v10076_v50 = vcombine.high %v3670_v38, %v3674_v41 }
 0x2e0   :  { %3047 = vmatprep.subr.bf16.mxu0 %v11027_v55  ;;  %v3682_v55 = vld [vmem:[#allocation9 + $0x1320] sm:$0xff] }
 0x2e1   :  { %v10084_v62 = vcombine.high %v3678_v53, %v3682_v55  ;;  %v10083_v4 = vcombine.low %v3678_v53, %v3682_v55  ;;  %v3092_v53 = vld [vmem:[#allocation9 + $0xb0] sm:$0xff] }
 0x2e2   :  { %7125 = vmatpush1.bf16.msra.mxu1 %v10019_v56  ;;  %v9494_v56 = vcombine.high %v3087_v46, %v3091_v48 }
 0x2e3   :  { %7126 = vmatprep.subr.bf16.mxu1 %v10028_v57  ;;  %3048 = vmatpush1.bf16.msra.mxu0 %v11025_v58  ;;  %v10075_v57 = vcombine.low %v3670_v38, %v3674_v41  ;;  %v3095_v58 = vld [vmem:[#allocation9 + $0xc8] sm:$0xff]  ;;  %v3080_v38 = vld [vmem:[#allocation9 + $0x50] sm:$0xff] }
 0x2e4   :  { %3049 = vmatprep.subr.bf16.mxu0 %v11030_v63  ;;  %v9493_v63 = vcombine.low %v3087_v46, %v3091_v48  ;;  %v3084_v41 = vld [vmem:[#allocation9 + $0x70] sm:$0xff]  ;;  %v3139_v46 = vld [vmem:[#allocation9 + $0x228] sm:$0xff] }
 0x2e5   :  { %v9488_v48 = vcombine.high %v3080_v38, %v3084_v41 }
 0x2e6   :  { %7127 = vmatpush1.bf16.msra.mxu1 %v10027_v0  ;;  %v3686_v0 = vld [vmem:[#allocation9 + $0x1340] sm:$0xff] }
 0x2e7   :  { %7128 = vmatprep.subr.bf16.mxu1 %v10036_v2  ;;  %3050 = vmatpush1.bf16.msra.mxu0 %v11028_v3  ;;  %v3690_v2 = vld [vmem:[#allocation9 + $0x1360] sm:$0xff]  ;;  %v9502_v3 = vcombine.high %v3095_v58, %v3099_v59 }
 0x2e8   :  { %3051 = vmatprep.subr.bf16.mxu0 %v11033_v6  ;;  %v3107_v6 = vld [vmem:[#allocation9 + $0x128] sm:$0xff] }
 0x2e9   :  { %v9510_v9 = vcombine.high %v3103_v5, %v3107_v6  ;;  %v9509_v15 = vcombine.low %v3103_v5, %v3107_v6  ;;  %v3155_v5 = vld [vmem:[#allocation9 + $0x2a8] sm:$0xff] }
 0x2ea   :  { %7129 = vmatpush1.bf16.msra.mxu1 %v10035_v7  ;;  %v10092_v7 = vcombine.high %v3686_v0, %v3690_v2 }
 0x2eb   :  { %7130 = vmatprep.subr.bf16.mxu1 %v10044_v8  ;;  %3052 = vmatpush1.bf16.msra.mxu0 %v11031_v49  ;;  %v9501_v8 = vcombine.low %v3095_v58, %v3099_v59  ;;  %v3694_v49 = vld [vmem:[#allocation9 + $0x1380] sm:$0xff]  ;;  %v3147_v58 = vld [vmem:[#allocation9 + $0x268] sm:$0xff] }
 0x2ec   :  { %3053 = vmatprep.subr.bf16.mxu0 %v11036_v10  ;;  %v10091_v10 = vcombine.low %v3686_v0, %v3690_v2  ;;  %v10099_v21 = vcombine.low %v3694_v49, %v3698_v16  ;;  %v3100_v0 = vld [vmem:[#allocation9 + $0xf0] sm:$0xff] }
 0x2ee   :  { %7131 = vmatpush1.bf16.msra.mxu1 %v10043_v11  ;;  %v3111_v11 = vld [vmem:[#allocation9 + $0x148] sm:$0xff] }
 0x2ef   :  { %7132 = vmatprep.subr.bf16.mxu1 %v10052_v12  ;;  %3054 = vmatpush1.bf16.msra.mxu0 %v11034_v14  ;;  %v3115_v12 = vld [vmem:[#allocation9 + $0x168] sm:$0xff]  ;;  %v10100_v14 = vcombine.high %v3694_v49, %v3698_v16  ;;  %v3108_v49 = vld [vmem:[#allocation9 + $0x130] sm:$0xff] }
 0x2f0   :  { %3055 = vmatprep.subr.bf16.mxu0 %v11039_v19  ;;  %v3706_v19 = vld [vmem:[#allocation9 + $0x13e0] sm:$0xff]  ;;  %v9517_v24 = vcombine.low %v3111_v11, %v3115_v12 }
 0x2f2   :  { %7133 = vmatpush1.bf16.msra.mxu1 %v10051_v20  ;;  %v9518_v20 = vcombine.high %v3111_v11, %v3115_v12  ;;  %v3163_v11 = vld [vmem:[#allocation9 + $0x2e8] sm:$0xff] }
 0x2f3   :  { %7134 = vmatprep.subr.bf16.mxu1 %v10060_v52  ;;  %3056 = vmatpush1.bf16.msra.mxu0 %v11037_v22  ;;  %v3123_v52 = vld [vmem:[#allocation9 + $0x1a8] sm:$0xff]  ;;  %v10108_v22 = vcombine.high %v3702_v18, %v3706_v19 }
 0x2f4   :  { %7157 = vmatprep.subr.bf16.mxu0 %v9478_v26  ;;  %v3076_v26 = vld [vmem:[#allocation9 + $0x30] sm:$0xff]  ;;  %v9526_v28 = vcombine.high %v3119_v61, %v3123_v52 }
 0x2f6   :  { %7135 = vmatpush1.bf16.msra.mxu1 %v10059_v29  ;;  %3058 = vmatmul.mubr.bf16.vlgmr.msra.gmra.mrb[4].mxu0 %v2586_v43  ;;  %v10107_v29 = vcombine.low %v3702_v18, %v3706_v19  ;;  %v9534_v43 = vcombine.high %v3127_v30, %v3131_v31  ;;  %v3116_v18 = vld [vmem:[#allocation9 + $0x170] sm:$0xff] }
 0x2f7   :  { %7136 = vmatprep.subr.bf16.mxu1 %v10068_v32  ;;  %7158 = vmatpush1.bf16.msra.mxu0 %v9477_v36  ;;  %v9480_v32 = vcombine.high %v3072_v25, %v3076_v26  ;;  %v9525_v36 = vcombine.low %v3119_v61, %v3123_v52  ;;  %v3171_v61 = vld [vmem:[#allocation9 + $0x328] sm:$0xff] }
 0x2f8   :  { %7189 = vmatprep.mubr.bf16.mxu0 %v11685_v60  ;;  %7159 = vmatprep.subr.bf16.mxu0 %v9486_v44  ;;  %v9479_v44 = vcombine.low %v3072_v25, %v3076_v26  ;;  %v3124_v25 = vld [vmem:[#allocation9 + $0x1b0] sm:$0xff] }
 0x2fa   :  { %7137 = vmatpush1.bf16.msra.mxu1 %v10067_v45  ;;  %v3135_v45 = vld [vmem:[#allocation9 + $0x208] sm:$0xff] }
 0x2fb   :  { %7138 = vmatprep.subr.bf16.mxu1 %v10076_v50  ;;  %7160 = vmatpush1.bf16.msra.mxu0 %v9485_v51  ;;  %v9533_v50 = vcombine.low %v3127_v30, %v3131_v31  ;;  %v3088_v51 = vld [vmem:[#allocation9 + $0x90] sm:$0xff]  ;;  %v9542_v55 = vcombine.high %v3135_v45, %v3139_v46  ;;  %v3179_v30 = vld [vmem:[#allocation9 + $0x368] sm:$0xff] }
 0x2fc   :  { %7161 = vmatprep.subr.bf16.mxu0 %v9494_v56  ;;  %v9487_v56 = vcombine.low %v3080_v38, %v3084_v41  ;;  %v9496_v59 = vcombine.high %v3088_v51, %v3092_v53  ;;  %v3132_v38 = vld [vmem:[#allocation9 + $0x1f0] sm:$0xff] }
 0x2fe   :  { %7139 = vmatpush1.bf16.msra.mxu1 %v10075_v57  ;;  %v3143_v57 = vld [vmem:[#allocation9 + $0x248] sm:$0xff] }
 0x2ff   :  { %7140 = vmatprep.subr.bf16.mxu1 %v10084_v62  ;;  %7162 = vmatpush1.bf16.msra.mxu0 %v9493_v63  ;;  %v9541_v62 = vcombine.low %v3135_v45, %v3139_v46  ;;  %v3096_v63 = vld [vmem:[#allocation9 + $0xd0] sm:$0xff]  ;;  %v9550_v2 = vcombine.high %v3143_v57, %v3147_v58  ;;  %v3187_v45 = vld [vmem:[#allocation9 + $0x3a8] sm:$0xff] }
 0x300   :  { %7163 = vmatprep.subr.bf16.mxu0 %v9502_v3  ;;  %v9495_v3 = vcombine.low %v3088_v51, %v3092_v53  ;;  %v9504_v6 = vcombine.high %v3096_v63, %v3100_v0  ;;  %v3140_v51 = vld [vmem:[#allocation9 + $0x230] sm:$0xff] }
 0x302   :  { %7141 = vmatpush1.bf16.msra.mxu1 %v10083_v4  ;;  %v3151_v4 = vld [vmem:[#allocation9 + $0x288] sm:$0xff] }
 0x303   :  { %7142 = vmatprep.subr.bf16.mxu1 %v10092_v7  ;;  %7164 = vmatpush1.bf16.msra.mxu0 %v9501_v8  ;;  %v9549_v7 = vcombine.low %v3143_v57, %v3147_v58  ;;  %v3104_v8 = vld [vmem:[#allocation9 + $0x110] sm:$0xff]  ;;  %v9558_v16 = vcombine.high %v3151_v4, %v3155_v5  ;;  %v3195_v57 = vld [vmem:[#allocation9 + $0x3e8] sm:$0xff] }
 0x304   :  { %7165 = vmatprep.subr.bf16.mxu0 %v9510_v9  ;;  %v9503_v9 = vcombine.low %v3096_v63, %v3100_v0  ;;  %v9512_v12 = vcombine.high %v3104_v8, %v3108_v49  ;;  %v3148_v63 = vld [vmem:[#allocation9 + $0x270] sm:$0xff] }
 0x306   :  { %7143 = vmatpush1.bf16.msra.mxu1 %v10091_v10  ;;  %v3159_v10 = vld [vmem:[#allocation9 + $0x2c8] sm:$0xff] }
 0x307   :  { %7144 = vmatprep.subr.bf16.mxu1 %v10100_v14  ;;  %7166 = vmatpush1.bf16.msra.mxu0 %v9509_v15  ;;  %v9557_v14 = vcombine.low %v3151_v4, %v3155_v5  ;;  %v3112_v15 = vld [vmem:[#allocation9 + $0x150] sm:$0xff]  ;;  %v9566_v19 = vcombine.high %v3159_v10, %v3163_v11  ;;  %v3203_v4 = vld [vmem:[#allocation9 + $0x428] sm:$0xff] }
 0x308   :  { %7167 = vmatprep.subr.bf16.mxu0 %v9518_v20  ;;  %v9511_v20 = vcombine.low %v3104_v8, %v3108_v49  ;;  %v9520_v52 = vcombine.high %v3112_v15, %v3116_v18  ;;  %v3156_v8 = vld [vmem:[#allocation9 + $0x2b0] sm:$0xff] }
 0x30a   :  { %7145 = vmatpush1.bf16.msra.mxu1 %v10099_v21  ;;  %v3167_v21 = vld [vmem:[#allocation9 + $0x308] sm:$0xff] }
 0x30b   :  { %7146 = vmatprep.subr.bf16.mxu1 %v10108_v22  ;;  %7168 = vmatpush1.bf16.msra.mxu0 %v9517_v24  ;;  %v9565_v22 = vcombine.low %v3159_v10, %v3163_v11  ;;  %v3120_v24 = vld [vmem:[#allocation9 + $0x190] sm:$0xff]  ;;  %v9574_v26 = vcombine.high %v3167_v21, %v3171_v61  ;;  %v3211_v10 = vld [vmem:[#allocation9 + $0x468] sm:$0xff] }
 0x30c   :  { %7169 = vmatprep.subr.bf16.mxu0 %v9526_v28  ;;  %v9519_v28 = vcombine.low %v3112_v15, %v3116_v18  ;;  %v9528_v31 = vcombine.high %v3120_v24, %v3124_v25  ;;  %v3164_v15 = vld [vmem:[#allocation9 + $0x2f0] sm:$0xff] }
 0x30e   :  { %7147 = vmatpush1.bf16.msra.mxu1 %v10107_v29  ;;  %v3175_v29 = vld [vmem:[#allocation9 + $0x348] sm:$0xff] }
 0x30f   :  { %7362 = vmatprep.subr.bf16.mxu1 %v9480_v32  ;;  %7170 = vmatpush1.bf16.msra.mxu0 %v9525_v36  ;;  %v9573_v32 = vcombine.low %v3167_v21, %v3171_v61  ;;  %v3128_v36 = vld [vmem:[#allocation9 + $0x1d0] sm:$0xff]  ;;  %v9582_v41 = vcombine.high %v3175_v29, %v3179_v30  ;;  %v3219_v21 = vld [vmem:[#allocation9 + $0x4a8] sm:$0xff] }
 0x310   :  { %7171 = vmatprep.subr.bf16.mxu0 %v9534_v43  ;;  %v9527_v43 = vcombine.low %v3120_v24, %v3124_v25  ;;  %v9536_v46 = vcombine.high %v3128_v36, %v3132_v38  ;;  %v3172_v24 = vld [vmem:[#allocation9 + $0x330] sm:$0xff] }
 0x311   :  { %7149 = vmatmul.mubr.bf16.vlgmr.msra.gmra.mrb[4].mxu1 %v11750_v1 }
 0x312   :  { %7363 = vmatpush1.bf16.msra.mxu1 %v9479_v44  ;;  %7394 = vmatprep.mubr.bf16.mxu1 %v11685_v60  ;;  %v3183_v44 = vld [vmem:[#allocation9 + $0x388] sm:$0xff] }
 0x313   :  { %7364 = vmatprep.subr.bf16.mxu1 %v9488_v48  ;;  %7172 = vmatpush1.bf16.msra.mxu0 %v9533_v50  ;;  %v9581_v48 = vcombine.low %v3175_v29, %v3179_v30  ;;  %v3136_v50 = vld [vmem:[#allocation9 + $0x210] sm:$0xff]  ;;  %v9590_v53 = vcombine.high %v3183_v44, %v3187_v45  ;;  %v3227_v29 = vld [vmem:[#allocation9 + $0x4e8] sm:$0xff] }
 0x314   :  { %7173 = vmatprep.subr.bf16.mxu0 %v9542_v55  ;;  %v9535_v55 = vcombine.low %v3128_v36, %v3132_v38  ;;  %v9544_v58 = vcombine.high %v3136_v50, %v3140_v51  ;;  %v3180_v36 = vld [vmem:[#allocation9 + $0x370] sm:$0xff] }
 0x316   :  { %7365 = vmatpush1.bf16.msra.mxu1 %v9487_v56  ;;  %v3191_v56 = vld [vmem:[#allocation9 + $0x3c8] sm:$0xff] }
 0x317   :  { %7366 = vmatprep.subr.bf16.mxu1 %v9496_v59  ;;  %7174 = vmatpush1.bf16.msra.mxu0 %v9541_v62  ;;  %v9589_v59 = vcombine.low %v3183_v44, %v3187_v45  ;;  %v3144_v62 = vld [vmem:[#allocation9 + $0x250] sm:$0xff]  ;;  %v9598_v0 = vcombine.high %v3191_v56, %v3195_v57  ;;  %v3235_v44 = vld [vmem:[#allocation9 + $0x528] sm:$0xff] }
 0x318   :  { %7175 = vmatprep.subr.bf16.mxu0 %v9550_v2  ;;  %v9543_v2 = vcombine.low %v3136_v50, %v3140_v51  ;;  %v9552_v5 = vcombine.high %v3144_v62, %v3148_v63  ;;  %v3188_v50 = vld [vmem:[#allocation9 + $0x3b0] sm:$0xff] }
 0x31a   :  { %7367 = vmatpush1.bf16.msra.mxu1 %v9495_v3  ;;  %v3199_v3 = vld [vmem:[#allocation9 + $0x408] sm:$0xff] }
 0x31b   :  { %7368 = vmatprep.subr.bf16.mxu1 %v9504_v6  ;;  %7176 = vmatpush1.bf16.msra.mxu0 %v9549_v7  ;;  %v9597_v6 = vcombine.low %v3191_v56, %v3195_v57  ;;  %v3152_v7 = vld [vmem:[#allocation9 + $0x290] sm:$0xff]  ;;  %v9606_v49 = vcombine.high %v3199_v3, %v3203_v4  ;;  %v3243_v56 = vld [vmem:[#allocation9 + $0x568] sm:$0xff] }
 0x31c   :  { %7177 = vmatprep.subr.bf16.mxu0 %v9558_v16  ;;  %v9551_v16 = vcombine.low %v3144_v62, %v3148_v63  ;;  %v9560_v11 = vcombine.high %v3152_v7, %v3156_v8  ;;  %v3196_v62 = vld [vmem:[#allocation9 + $0x3f0] sm:$0xff] }
 0x31e   :  { %7369 = vmatpush1.bf16.msra.mxu1 %v9503_v9  ;;  %v3207_v9 = vld [vmem:[#allocation9 + $0x448] sm:$0xff] }
 0x31f   :  { %7370 = vmatprep.subr.bf16.mxu1 %v9512_v12  ;;  %7178 = vmatpush1.bf16.msra.mxu0 %v9557_v14  ;;  %v9605_v12 = vcombine.low %v3199_v3, %v3203_v4  ;;  %v3160_v14 = vld [vmem:[#allocation9 + $0x2d0] sm:$0xff]  ;;  %v9614_v18 = vcombine.high %v3207_v9, %v3211_v10  ;;  %v3251_v3 = vld [vmem:[#allocation9 + $0x5a8] sm:$0xff] }
 0x320   :  { %7179 = vmatprep.subr.bf16.mxu0 %v9566_v19  ;;  %v9559_v19 = vcombine.low %v3152_v7, %v3156_v8  ;;  %v9568_v61 = vcombine.high %v3160_v14, %v3164_v15  ;;  %v3204_v7 = vld [vmem:[#allocation9 + $0x430] sm:$0xff] }
 0x322   :  { %7371 = vmatpush1.bf16.msra.mxu1 %v9511_v20  ;;  %v3215_v20 = vld [vmem:[#allocation9 + $0x488] sm:$0xff] }
 0x323   :  { %7372 = vmatprep.subr.bf16.mxu1 %v9520_v52  ;;  %7180 = vmatpush1.bf16.msra.mxu0 %v9565_v22  ;;  %v9613_v52 = vcombine.low %v3207_v9, %v3211_v10  ;;  %v3168_v22 = vld [vmem:[#allocation9 + $0x310] sm:$0xff]  ;;  %v9622_v25 = vcombine.high %v3215_v20, %v3219_v21  ;;  %v3259_v9 = vld [vmem:[#allocation9 + $0x5e8] sm:$0xff] }
 0x324   :  { %7181 = vmatprep.subr.bf16.mxu0 %v9574_v26  ;;  %v9567_v26 = vcombine.low %v3160_v14, %v3164_v15  ;;  %v9576_v30 = vcombine.high %v3168_v22, %v3172_v24  ;;  %v3212_v14 = vld [vmem:[#allocation9 + $0x470] sm:$0xff] }
 0x326   :  { %7373 = vmatpush1.bf16.msra.mxu1 %v9519_v28  ;;  %v3223_v28 = vld [vmem:[#allocation9 + $0x4c8] sm:$0xff] }
 0x327   :  { %7374 = vmatprep.subr.bf16.mxu1 %v9528_v31  ;;  %7182 = vmatpush1.bf16.msra.mxu0 %v9573_v32  ;;  %v9621_v31 = vcombine.low %v3215_v20, %v3219_v21  ;;  %v3176_v32 = vld [vmem:[#allocation9 + $0x350] sm:$0xff]  ;;  %v9630_v38 = vcombine.high %v3223_v28, %v3227_v29  ;;  %v3267_v20 = vld [vmem:[#allocation9 + $0x628] sm:$0xff] }
 0x328   :  { %7183 = vmatprep.subr.bf16.mxu0 %v9582_v41  ;;  %v9575_v41 = vcombine.low %v3168_v22, %v3172_v24  ;;  %v9584_v45 = vcombine.high %v3176_v32, %v3180_v36  ;;  %v3220_v22 = vld [vmem:[#allocation9 + $0x4b0] sm:$0xff] }
 0x32a   :  { %7375 = vmatpush1.bf16.msra.mxu1 %v9527_v43  ;;  %v3231_v43 = vld [vmem:[#allocation9 + $0x508] sm:$0xff] }
 0x32b   :  { %7376 = vmatprep.subr.bf16.mxu1 %v9536_v46  ;;  %7184 = vmatpush1.bf16.msra.mxu0 %v9581_v48  ;;  %v9629_v46 = vcombine.low %v3223_v28, %v3227_v29  ;;  %v3184_v48 = vld [vmem:[#allocation9 + $0x390] sm:$0xff]  ;;  %v9638_v51 = vcombine.high %v3231_v43, %v3235_v44  ;;  %v3275_v28 = vld [vmem:[#allocation9 + $0x668] sm:$0xff] }
 0x32c   :  { %7185 = vmatprep.subr.bf16.mxu0 %v9590_v53  ;;  %v9583_v53 = vcombine.low %v3176_v32, %v3180_v36  ;;  %v9592_v57 = vcombine.high %v3184_v48, %v3188_v50  ;;  %v3228_v32 = vld [vmem:[#allocation9 + $0x4f0] sm:$0xff] }
 0x32e   :  { %7377 = vmatpush1.bf16.msra.mxu1 %v9535_v55  ;;  %v3239_v55 = vld [vmem:[#allocation9 + $0x548] sm:$0xff] }
 0x32f   :  { %7378 = vmatprep.subr.bf16.mxu1 %v9544_v58  ;;  %7186 = vmatpush1.bf16.msra.mxu0 %v9589_v59  ;;  %v9637_v58 = vcombine.low %v3231_v43, %v3235_v44  ;;  %v3192_v59 = vld [vmem:[#allocation9 + $0x3d0] sm:$0xff]  ;;  %v9646_v63 = vcombine.high %v3239_v55, %v3243_v56  ;;  %v3283_v43 = vld [vmem:[#allocation9 + $0x6a8] sm:$0xff] }
 0x330   :  { %7187 = vmatprep.subr.bf16.mxu0 %v9598_v0  ;;  %v9591_v0 = vcombine.low %v3184_v48, %v3188_v50  ;;  %v9600_v4 = vcombine.high %v3192_v59, %v3196_v62  ;;  %v3236_v48 = vld [vmem:[#allocation9 + $0x530] sm:$0xff] }
 0x332   :  { %7379 = vmatpush1.bf16.msra.mxu1 %v9543_v2  ;;  %v3247_v2 = vld [vmem:[#allocation9 + $0x588] sm:$0xff] }
 0x333   :  { %7380 = vmatprep.subr.bf16.mxu1 %v9552_v5  ;;  %7188 = vmatpush1.bf16.msra.mxu0 %v9597_v6  ;;  %v9645_v5 = vcombine.low %v3239_v55, %v3243_v56  ;;  %v3200_v6 = vld [vmem:[#allocation9 + $0x410] sm:$0xff]  ;;  %v9654_v8 = vcombine.high %v3247_v2, %v3251_v3  ;;  %v3291_v55 = vld [vmem:[#allocation9 + $0x6e8] sm:$0xff] }
 0x334   :  { %7198 = vmatprep.subr.bf16.mxu0 %v9606_v49  ;;  %v9599_v49 = vcombine.low %v3192_v59, %v3196_v62  ;;  %v9608_v10 = vcombine.high %v3200_v6, %v3204_v7  ;;  %v3244_v59 = vld [vmem:[#allocation9 + $0x570] sm:$0xff] }
 0x336   :  { %7381 = vmatpush1.bf16.msra.mxu1 %v9551_v16  ;;  %7190 = vmatmul.mubr.bf16.vlgmr.msra.gmra.mrb[8].mxu0 %v11690_v13  ;;  %v3255_v16 = vld [vmem:[#allocation9 + $0x5c8] sm:$0xff] }
 0x337   :  { %7382 = vmatprep.subr.bf16.mxu1 %v9560_v11  ;;  %7199 = vmatpush1.bf16.msra.mxu0 %v9605_v12  ;;  %v9653_v11 = vcombine.low %v3247_v2, %v3251_v3  ;;  %v3208_v12 = vld [vmem:[#allocation9 + $0x450] sm:$0xff]  ;;  %v9662_v15 = vcombine.high %v3255_v16, %v3259_v9  ;;  %v3299_v2 = vld [vmem:[#allocation9 + $0x728] sm:$0xff] }
 0x338   :  { %7230 = vmatprep.mubr.bf16.mxu0 %v11694_v17  ;;  %7200 = vmatprep.subr.bf16.mxu0 %v9614_v18  ;;  %v9607_v18 = vcombine.low %v3200_v6, %v3204_v7  ;;  %v9616_v21 = vcombine.high %v3208_v12, %v3212_v14  ;;  %v3252_v6 = vld [vmem:[#allocation9 + $0x5b0] sm:$0xff] }
 0x33a   :  { %7383 = vmatpush1.bf16.msra.mxu1 %v9559_v19  ;;  %v3263_v19 = vld [vmem:[#allocation9 + $0x608] sm:$0xff] }
 0x33b   :  { %7384 = vmatprep.subr.bf16.mxu1 %v9568_v61  ;;  %7201 = vmatpush1.bf16.msra.mxu0 %v9613_v52  ;;  %v9661_v61 = vcombine.low %v3255_v16, %v3259_v9  ;;  %v3216_v52 = vld [vmem:[#allocation9 + $0x490] sm:$0xff]  ;;  %v9670_v24 = vcombine.high %v3263_v19, %v3267_v20  ;;  %v3307_v16 = vld [vmem:[#allocation9 + $0x768] sm:$0xff] }
 0x33c   :  { %7202 = vmatprep.subr.bf16.mxu0 %v9622_v25  ;;  %v9615_v25 = vcombine.low %v3208_v12, %v3212_v14  ;;  %v9624_v29 = vcombine.high %v3216_v52, %v3220_v22  ;;  %v3260_v12 = vld [vmem:[#allocation9 + $0x5f0] sm:$0xff] }
 0x33e   :  { %7385 = vmatpush1.bf16.msra.mxu1 %v9567_v26  ;;  %v3271_v26 = vld [vmem:[#allocation9 + $0x648] sm:$0xff] }
 0x33f   :  { %7386 = vmatprep.subr.bf16.mxu1 %v9576_v30  ;;  %7203 = vmatpush1.bf16.msra.mxu0 %v9621_v31  ;;  %v9669_v30 = vcombine.low %v3263_v19, %v3267_v20  ;;  %v3224_v31 = vld [vmem:[#allocation9 + $0x4d0] sm:$0xff]  ;;  %v9678_v36 = vcombine.high %v3271_v26, %v3275_v28  ;;  %v3315_v19 = vld [vmem:[#allocation9 + $0x7a8] sm:$0xff] }
 0x340   :  { %7204 = vmatprep.subr.bf16.mxu0 %v9630_v38  ;;  %v9623_v38 = vcombine.low %v3216_v52, %v3220_v22  ;;  %v9632_v44 = vcombine.high %v3224_v31, %v3228_v32  ;;  %v3268_v52 = vld [vmem:[#allocation9 + $0x630] sm:$0xff] }
 0x342   :  { %7387 = vmatpush1.bf16.msra.mxu1 %v9575_v41  ;;  %v3279_v41 = vld [vmem:[#allocation9 + $0x688] sm:$0xff] }
 0x343   :  { %7388 = vmatprep.subr.bf16.mxu1 %v9584_v45  ;;  %7205 = vmatpush1.bf16.msra.mxu0 %v9629_v46  ;;  %v9677_v45 = vcombine.low %v3271_v26, %v3275_v28  ;;  %v3232_v46 = vld [vmem:[#allocation9 + $0x510] sm:$0xff]  ;;  %v9686_v50 = vcombine.high %v3279_v41, %v3283_v43  ;;  %v3323_v26 = vld [vmem:[#allocation9 + $0x7e8] sm:$0xff] }
 0x344   :  { %7206 = vmatprep.subr.bf16.mxu0 %v9638_v51  ;;  %v9631_v51 = vcombine.low %v3224_v31, %v3228_v32  ;;  %v9640_v56 = vcombine.high %v3232_v46, %v3236_v48  ;;  %v3276_v31 = vld [vmem:[#allocation9 + $0x670] sm:$0xff] }
 0x346   :  { %7389 = vmatpush1.bf16.msra.mxu1 %v9583_v53  ;;  %v3287_v53 = vld [vmem:[#allocation9 + $0x6c8] sm:$0xff] }
 0x347   :  { %7390 = vmatprep.subr.bf16.mxu1 %v9592_v57  ;;  %7207 = vmatpush1.bf16.msra.mxu0 %v9637_v58  ;;  %v9685_v57 = vcombine.low %v3279_v41, %v3283_v43  ;;  %v3240_v58 = vld [vmem:[#allocation9 + $0x550] sm:$0xff]  ;;  %v9694_v62 = vcombine.high %v3287_v53, %v3291_v55  ;;  %v3331_v41 = vld [vmem:[#allocation9 + $0x828] sm:$0xff] }
 0x348   :  { %7208 = vmatprep.subr.bf16.mxu0 %v9646_v63  ;;  %v9639_v63 = vcombine.low %v3232_v46, %v3236_v48  ;;  %v9648_v3 = vcombine.high %v3240_v58, %v3244_v59  ;;  %v3284_v46 = vld [vmem:[#allocation9 + $0x6b0] sm:$0xff] }
 0x34a   :  { %7391 = vmatpush1.bf16.msra.mxu1 %v9591_v0  ;;  %v3295_v0 = vld [vmem:[#allocation9 + $0x708] sm:$0xff] }
 0x34b   :  { %7392 = vmatprep.subr.bf16.mxu1 %v9600_v4  ;;  %7209 = vmatpush1.bf16.msra.mxu0 %v9645_v5  ;;  %v9693_v4 = vcombine.low %v3287_v53, %v3291_v55  ;;  %v3248_v5 = vld [vmem:[#allocation9 + $0x590] sm:$0xff]  ;;  %v9702_v7 = vcombine.high %v3295_v0, %v3299_v2  ;;  %v3339_v53 = vld [vmem:[#allocation9 + $0x868] sm:$0xff] }
 0x34c   :  { %7210 = vmatprep.subr.bf16.mxu0 %v9654_v8  ;;  %v9647_v8 = vcombine.low %v3240_v58, %v3244_v59  ;;  %v9656_v9 = vcombine.high %v3248_v5, %v3252_v6  ;;  %v3292_v58 = vld [vmem:[#allocation9 + $0x6f0] sm:$0xff] }
 0x34e   :  { %7393 = vmatpush1.bf16.msra.mxu1 %v9599_v49  ;;  %v3303_v49 = vld [vmem:[#allocation9 + $0x748] sm:$0xff] }
 0x34f   :  { %7403 = vmatprep.subr.bf16.mxu1 %v9608_v10  ;;  %7211 = vmatpush1.bf16.msra.mxu0 %v9653_v11  ;;  %v9701_v10 = vcombine.low %v3295_v0, %v3299_v2  ;;  %v3256_v11 = vld [vmem:[#allocation9 + $0x5d0] sm:$0xff]  ;;  %v9710_v14 = vcombine.high %v3303_v49, %v3307_v16  ;;  %v3347_v0 = vld [vmem:[#allocation9 + $0x8a8] sm:$0xff] }
 0x350   :  { %7212 = vmatprep.subr.bf16.mxu0 %v9662_v15  ;;  %v9655_v15 = vcombine.low %v3248_v5, %v3252_v6  ;;  %v9664_v20 = vcombine.high %v3256_v11, %v3260_v12  ;;  %v3300_v5 = vld [vmem:[#allocation9 + $0x730] sm:$0xff] }
 0x351   :  { %7395 = vmatmul.mubr.bf16.vlgmr.msra.gmra.mrb[8].mxu1 %v11690_v13 }
 0x352   :  { %7404 = vmatpush1.bf16.msra.mxu1 %v9607_v18  ;;  %7435 = vmatprep.mubr.bf16.mxu1 %v11694_v17  ;;  %v3311_v18 = vld [vmem:[#allocation9 + $0x788] sm:$0xff] }
 0x353   :  { %7405 = vmatprep.subr.bf16.mxu1 %v9616_v21  ;;  %7213 = vmatpush1.bf16.msra.mxu0 %v9661_v61  ;;  %v9709_v21 = vcombine.low %v3303_v49, %v3307_v16  ;;  %v3264_v61 = vld [vmem:[#allocation9 + $0x610] sm:$0xff]  ;;  %v9718_v22 = vcombine.high %v3311_v18, %v3315_v19  ;;  %v3355_v49 = vld [vmem:[#allocation9 + $0x8e8] sm:$0xff] }
 0x354   :  { %7214 = vmatprep.subr.bf16.mxu0 %v9670_v24  ;;  %v9663_v24 = vcombine.low %v3256_v11, %v3260_v12  ;;  %v9672_v28 = vcombine.high %v3264_v61, %v3268_v52  ;;  %v3308_v11 = vld [vmem:[#allocation9 + $0x770] sm:$0xff] }
 0x356   :  { %7406 = vmatpush1.bf16.msra.mxu1 %v9615_v25  ;;  %v3319_v25 = vld [vmem:[#allocation9 + $0x7c8] sm:$0xff] }
 0x357   :  { %7407 = vmatprep.subr.bf16.mxu1 %v9624_v29  ;;  %7215 = vmatpush1.bf16.msra.mxu0 %v9669_v30  ;;  %v9717_v29 = vcombine.low %v3311_v18, %v3315_v19  ;;  %v3272_v30 = vld [vmem:[#allocation9 + $0x650] sm:$0xff]  ;;  %v9726_v32 = vcombine.high %v3319_v25, %v3323_v26  ;;  %v3363_v18 = vld [vmem:[#allocation9 + $0x928] sm:$0xff] }
 0x358   :  { %7216 = vmatprep.subr.bf16.mxu0 %v9678_v36  ;;  %v9671_v36 = vcombine.low %v3264_v61, %v3268_v52  ;;  %v9680_v43 = vcombine.high %v3272_v30, %v3276_v31  ;;  %v3316_v61 = vld [vmem:[#allocation9 + $0x7b0] sm:$0xff] }
 0x35a   :  { %7408 = vmatpush1.bf16.msra.mxu1 %v9623_v38  ;;  %v3327_v38 = vld [vmem:[#allocation9 + $0x808] sm:$0xff] }
 0x35b   :  { %7409 = vmatprep.subr.bf16.mxu1 %v9632_v44  ;;  %7217 = vmatpush1.bf16.msra.mxu0 %v9677_v45  ;;  %v9725_v44 = vcombine.low %v3319_v25, %v3323_v26  ;;  %v3280_v45 = vld [vmem:[#allocation9 + $0x690] sm:$0xff]  ;;  %v9734_v48 = vcombine.high %v3327_v38, %v3331_v41  ;;  %v3371_v25 = vld [vmem:[#allocation9 + $0x968] sm:$0xff] }
 0x35c   :  { %7218 = vmatprep.subr.bf16.mxu0 %v9686_v50  ;;  %v9679_v50 = vcombine.low %v3272_v30, %v3276_v31  ;;  %v9688_v55 = vcombine.high %v3280_v45, %v3284_v46  ;;  %v3324_v30 = vld [vmem:[#allocation9 + $0x7f0] sm:$0xff] }
 0x35e   :  { %7410 = vmatpush1.bf16.msra.mxu1 %v9631_v51  ;;  %v3335_v51 = vld [vmem:[#allocation9 + $0x848] sm:$0xff] }
 0x35f   :  { %7411 = vmatprep.subr.bf16.mxu1 %v9640_v56  ;;  %7219 = vmatpush1.bf16.msra.mxu0 %v9685_v57  ;;  %v9733_v56 = vcombine.low %v3327_v38, %v3331_v41  ;;  %v3288_v57 = vld [vmem:[#allocation9 + $0x6d0] sm:$0xff]  ;;  %v9742_v59 = vcombine.high %v3335_v51, %v3339_v53  ;;  %v3379_v38 = vld [vmem:[#allocation9 + $0x9a8] sm:$0xff] }
 0x360   :  { %7220 = vmatprep.subr.bf16.mxu0 %v9694_v62  ;;  %v9687_v62 = vcombine.low %v3280_v45, %v3284_v46  ;;  %v9696_v2 = vcombine.high %v3288_v57, %v3292_v58  ;;  %v3332_v45 = vld [vmem:[#allocation9 + $0x830] sm:$0xff] }
 0x362   :  { %7412 = vmatpush1.bf16.msra.mxu1 %v9639_v63  ;;  %v3343_v63 = vld [vmem:[#allocation9 + $0x888] sm:$0xff] }
 0x363   :  { %7413 = vmatprep.subr.bf16.mxu1 %v9648_v3  ;;  %7221 = vmatpush1.bf16.msra.mxu0 %v9693_v4  ;;  %v9741_v3 = vcombine.low %v3335_v51, %v3339_v53  ;;  %v3296_v4 = vld [vmem:[#allocation9 + $0x710] sm:$0xff]  ;;  %v9750_v6 = vcombine.high %v3343_v63, %v3347_v0  ;;  %v3387_v51 = vld [vmem:[#allocation9 + $0x9e8] sm:$0xff] }
 0x364   :  { %7222 = vmatprep.subr.bf16.mxu0 %v9702_v7  ;;  %v9695_v7 = vcombine.low %v3288_v57, %v3292_v58  ;;  %v9704_v16 = vcombine.high %v3296_v4, %v3300_v5  ;;  %v3340_v57 = vld [vmem:[#allocation9 + $0x870] sm:$0xff] }
 0x366   :  { %7414 = vmatpush1.bf16.msra.mxu1 %v9647_v8  ;;  %v3351_v8 = vld [vmem:[#allocation9 + $0x8c8] sm:$0xff] }
 0x367   :  { %7415 = vmatprep.subr.bf16.mxu1 %v9656_v9  ;;  %7223 = vmatpush1.bf16.msra.mxu0 %v9701_v10  ;;  %v9749_v9 = vcombine.low %v3343_v63, %v3347_v0  ;;  %v3304_v10 = vld [vmem:[#allocation9 + $0x750] sm:$0xff]  ;;  %v9758_v12 = vcombine.high %v3351_v8, %v3355_v49  ;;  %v3395_v63 = vld [vmem:[#allocation9 + $0xa28] sm:$0xff] }
 0x368   :  { %7224 = vmatprep.subr.bf16.mxu0 %v9710_v14  ;;  %v9703_v14 = vcombine.low %v3296_v4, %v3300_v5  ;;  %v9712_v19 = vcombine.high %v3304_v10, %v3308_v11  ;;  %v3348_v4 = vld [vmem:[#allocation9 + $0x8b0] sm:$0xff] }
 0x36a   :  { %7416 = vmatpush1.bf16.msra.mxu1 %v9655_v15  ;;  %v3359_v15 = vld [vmem:[#allocation9 + $0x908] sm:$0xff] }
 0x36b   :  { %7417 = vmatprep.subr.bf16.mxu1 %v9664_v20  ;;  %7225 = vmatpush1.bf16.msra.mxu0 %v9709_v21  ;;  %v9757_v20 = vcombine.low %v3351_v8, %v3355_v49  ;;  %v3312_v21 = vld [vmem:[#allocation9 + $0x790] sm:$0xff]  ;;  %v9766_v52 = vcombine.high %v3359_v15, %v3363_v18  ;;  %v3403_v8 = vld [vmem:[#allocation9 + $0xa68] sm:$0xff] }
 0x36c   :  { %7226 = vmatprep.subr.bf16.mxu0 %v9718_v22  ;;  %v9711_v22 = vcombine.low %v3304_v10, %v3308_v11  ;;  %v9720_v26 = vcombine.high %v3312_v21, %v3316_v61  ;;  %v3356_v10 = vld [vmem:[#allocation9 + $0x8f0] sm:$0xff] }
 0x36e   :  { %7418 = vmatpush1.bf16.msra.mxu1 %v9663_v24  ;;  %v3367_v24 = vld [vmem:[#allocation9 + $0x948] sm:$0xff] }
 0x36f   :  { %7419 = vmatprep.subr.bf16.mxu1 %v9672_v28  ;;  %7227 = vmatpush1.bf16.msra.mxu0 %v9717_v29  ;;  %v9765_v28 = vcombine.low %v3359_v15, %v3363_v18  ;;  %v3320_v29 = vld [vmem:[#allocation9 + $0x7d0] sm:$0xff]  ;;  %v9774_v31 = vcombine.high %v3367_v24, %v3371_v25  ;;  %v3411_v15 = vld [vmem:[#allocation9 + $0xaa8] sm:$0xff] }
 0x370   :  { %7228 = vmatprep.subr.bf16.mxu0 %v9726_v32  ;;  %v9719_v32 = vcombine.low %v3312_v21, %v3316_v61  ;;  %v9728_v41 = vcombine.high %v3320_v29, %v3324_v30  ;;  %v3364_v21 = vld [vmem:[#allocation9 + $0x930] sm:$0xff] }
 0x372   :  { %7420 = vmatpush1.bf16.msra.mxu1 %v9671_v36  ;;  %v3375_v36 = vld [vmem:[#allocation9 + $0x988] sm:$0xff] }
 0x373   :  { %7421 = vmatprep.subr.bf16.mxu1 %v9680_v43  ;;  %7229 = vmatpush1.bf16.msra.mxu0 %v9725_v44  ;;  %v9773_v43 = vcombine.low %v3367_v24, %v3371_v25  ;;  %v3328_v44 = vld [vmem:[#allocation9 + $0x810] sm:$0xff]  ;;  %v9782_v46 = vcombine.high %v3375_v36, %v3379_v38  ;;  %v3419_v24 = vld [vmem:[#allocation9 + $0xae8] sm:$0xff] }
 0x374   :  { %7239 = vmatprep.subr.bf16.mxu0 %v9734_v48  ;;  %v9727_v48 = vcombine.low %v3320_v29, %v3324_v30  ;;  %v9736_v53 = vcombine.high %v3328_v44, %v3332_v45  ;;  %v3372_v29 = vld [vmem:[#allocation9 + $0x970] sm:$0xff] }
 0x376   :  { %7422 = vmatpush1.bf16.msra.mxu1 %v9679_v50  ;;  %7231 = vmatmul.mubr.bf16.vlgmr.msra.gmra.mrb[8].mxu0 %v11709_v23  ;;  %v3383_v50 = vld [vmem:[#allocation9 + $0x9c8] sm:$0xff] }
 0x377   :  { %7423 = vmatprep.subr.bf16.mxu1 %v9688_v55  ;;  %7240 = vmatpush1.bf16.msra.mxu0 %v9733_v56  ;;  %v9781_v55 = vcombine.low %v3375_v36, %v3379_v38  ;;  %v3336_v56 = vld [vmem:[#allocation9 + $0x850] sm:$0xff]  ;;  %v9790_v58 = vcombine.high %v3383_v50, %v3387_v51  ;;  %v3427_v36 = vld [vmem:[#allocation9 + $0xb28] sm:$0xff] }
 0x378   :  { %7271 = vmatprep.mubr.bf16.mxu0 %v11712_v27  ;;  %7241 = vmatprep.subr.bf16.mxu0 %v9742_v59  ;;  %v9735_v59 = vcombine.low %v3328_v44, %v3332_v45  ;;  %v9744_v0 = vcombine.high %v3336_v56, %v3340_v57  ;;  %v3380_v44 = vld [vmem:[#allocation9 + $0x9b0] sm:$0xff] }
 0x37a   :  { %7424 = vmatpush1.bf16.msra.mxu1 %v9687_v62  ;;  %v3391_v62 = vld [vmem:[#allocation9 + $0xa08] sm:$0xff] }
 0x37b   :  { %7425 = vmatprep.subr.bf16.mxu1 %v9696_v2  ;;  %7242 = vmatpush1.bf16.msra.mxu0 %v9741_v3  ;;  %v9789_v2 = vcombine.low %v3383_v50, %v3387_v51  ;;  %v3344_v3 = vld [vmem:[#allocation9 + $0x890] sm:$0xff]  ;;  %v9798_v5 = vcombine.high %v3391_v62, %v3395_v63  ;;  %v3435_v50 = vld [vmem:[#allocation9 + $0xb68] sm:$0xff] }
 0x37c   :  { %7243 = vmatprep.subr.bf16.mxu0 %v9750_v6  ;;  %v9743_v6 = vcombine.low %v3336_v56, %v3340_v57  ;;  %v9752_v49 = vcombine.high %v3344_v3, %v3348_v4  ;;  %v3388_v56 = vld [vmem:[#allocation9 + $0x9f0] sm:$0xff] }
 0x37e   :  { %7426 = vmatpush1.bf16.msra.mxu1 %v9695_v7  ;;  %v3399_v7 = vld [vmem:[#allocation9 + $0xa48] sm:$0xff] }
 0x37f   :  { %7427 = vmatprep.subr.bf16.mxu1 %v9704_v16  ;;  %7244 = vmatpush1.bf16.msra.mxu0 %v9749_v9  ;;  %v9797_v16 = vcombine.low %v3391_v62, %v3395_v63  ;;  %v3352_v9 = vld [vmem:[#allocation9 + $0x8d0] sm:$0xff]  ;;  %v9806_v11 = vcombine.high %v3399_v7, %v3403_v8  ;;  %v3443_v62 = vld [vmem:[#allocation9 + $0xba8] sm:$0xff] }
 0x380   :  { %7245 = vmatprep.subr.bf16.mxu0 %v9758_v12  ;;  %v9751_v12 = vcombine.low %v3344_v3, %v3348_v4  ;;  %v9760_v18 = vcombine.high %v3352_v9, %v3356_v10  ;;  %v3396_v3 = vld [vmem:[#allocation9 + $0xa30] sm:$0xff] }
 0x382   :  { %7428 = vmatpush1.bf16.msra.mxu1 %v9703_v14  ;;  %v3407_v14 = vld [vmem:[#allocation9 + $0xa88] sm:$0xff] }
 0x383   :  { %7429 = vmatprep.subr.bf16.mxu1 %v9712_v19  ;;  %7246 = vmatpush1.bf16.msra.mxu0 %v9757_v20  ;;  %v9805_v19 = vcombine.low %v3399_v7, %v3403_v8  ;;  %v3360_v20 = vld [vmem:[#allocation9 + $0x910] sm:$0xff]  ;;  %v9814_v61 = vcombine.high %v3407_v14, %v3411_v15  ;;  %v3451_v7 = vld [vmem:[#allocation9 + $0xbe8] sm:$0xff] }
 0x384   :  { %7247 = vmatprep.subr.bf16.mxu0 %v9766_v52  ;;  %v9759_v52 = vcombine.low %v3352_v9, %v3356_v10  ;;  %v9768_v25 = vcombine.high %v3360_v20, %v3364_v21  ;;  %v3404_v9 = vld [vmem:[#allocation9 + $0xa70] sm:$0xff] }
 0x386   :  { %7430 = vmatpush1.bf16.msra.mxu1 %v9711_v22  ;;  %v3415_v22 = vld [vmem:[#allocation9 + $0xac8] sm:$0xff] }
 0x387   :  { %7431 = vmatprep.subr.bf16.mxu1 %v9720_v26  ;;  %7248 = vmatpush1.bf16.msra.mxu0 %v9765_v28  ;;  %v9813_v26 = vcombine.low %v3407_v14, %v3411_v15  ;;  %v3368_v28 = vld [vmem:[#allocation9 + $0x950] sm:$0xff]  ;;  %v9822_v30 = vcombine.high %v3415_v22, %v3419_v24  ;;  %v3459_v14 = vld [vmem:[#allocation9 + $0xc28] sm:$0xff] }
 0x388   :  { %7249 = vmatprep.subr.bf16.mxu0 %v9774_v31  ;;  %v9767_v31 = vcombine.low %v3360_v20, %v3364_v21  ;;  %v9776_v38 = vcombine.high %v3368_v28, %v3372_v29  ;;  %v3412_v20 = vld [vmem:[#allocation9 + $0xab0] sm:$0xff] }
 0x38a   :  { %7432 = vmatpush1.bf16.msra.mxu1 %v9719_v32  ;;  %v3423_v32 = vld [vmem:[#allocation9 + $0xb08] sm:$0xff] }
 0x38b   :  { %7433 = vmatprep.subr.bf16.mxu1 %v9728_v41  ;;  %7250 = vmatpush1.bf16.msra.mxu0 %v9773_v43  ;;  %v9821_v41 = vcombine.low %v3415_v22, %v3419_v24  ;;  %v3376_v43 = vld [vmem:[#allocation9 + $0x990] sm:$0xff]  ;;  %v9830_v45 = vcombine.high %v3423_v32, %v3427_v36  ;;  %v3467_v22 = vld [vmem:[#allocation9 + $0xc68] sm:$0xff] }
 0x38c   :  { %7251 = vmatprep.subr.bf16.mxu0 %v9782_v46  ;;  %v9775_v46 = vcombine.low %v3368_v28, %v3372_v29  ;;  %v9784_v51 = vcombine.high %v3376_v43, %v3380_v44  ;;  %v3420_v28 = vld [vmem:[#allocation9 + $0xaf0] sm:$0xff] }
 0x38e   :  { %7434 = vmatpush1.bf16.msra.mxu1 %v9727_v48  ;;  %v3431_v48 = vld [vmem:[#allocation9 + $0xb48] sm:$0xff] }
 0x38f   :  { %7444 = vmatprep.subr.bf16.mxu1 %v9736_v53  ;;  %7252 = vmatpush1.bf16.msra.mxu0 %v9781_v55  ;;  %v9829_v53 = vcombine.low %v3423_v32, %v3427_v36  ;;  %v3384_v55 = vld [vmem:[#allocation9 + $0x9d0] sm:$0xff]  ;;  %v9838_v57 = vcombine.high %v3431_v48, %v3435_v50  ;;  %v3475_v32 = vld [vmem:[#allocation9 + $0xca8] sm:$0xff] }
 0x390   :  { %7253 = vmatprep.subr.bf16.mxu0 %v9790_v58  ;;  %v9783_v58 = vcombine.low %v3376_v43, %v3380_v44  ;;  %v9792_v63 = vcombine.high %v3384_v55, %v3388_v56  ;;  %v3428_v43 = vld [vmem:[#allocation9 + $0xb30] sm:$0xff] }
 0x391   :  { %7436 = vmatmul.mubr.bf16.vlgmr.msra.gmra.mrb[8].mxu1 %v11709_v23 }
 0x392   :  { %7445 = vmatpush1.bf16.msra.mxu1 %v9735_v59  ;;  %7476 = vmatprep.mubr.bf16.mxu1 %v11712_v27  ;;  %v3439_v59 = vld [vmem:[#allocation9 + $0xb88] sm:$0xff] }
 0x393   :  { %7446 = vmatprep.subr.bf16.mxu1 %v9744_v0  ;;  %7254 = vmatpush1.bf16.msra.mxu0 %v9789_v2  ;;  %v9837_v0 = vcombine.low %v3431_v48, %v3435_v50  ;;  %v3392_v2 = vld [vmem:[#allocation9 + $0xa10] sm:$0xff]  ;;  %v9846_v4 = vcombine.high %v3439_v59, %v3443_v62  ;;  %v3483_v48 = vld [vmem:[#allocation9 + $0xce8] sm:$0xff] }
 0x394   :  { %7255 = vmatprep.subr.bf16.mxu0 %v9798_v5  ;;  %v9791_v5 = vcombine.low %v3384_v55, %v3388_v56  ;;  %v9800_v8 = vcombine.high %v3392_v2, %v3396_v3  ;;  %v3436_v55 = vld [vmem:[#allocation9 + $0xb70] sm:$0xff] }
 0x396   :  { %7447 = vmatpush1.bf16.msra.mxu1 %v9743_v6  ;;  %v3447_v6 = vld [vmem:[#allocation9 + $0xbc8] sm:$0xff] }
 0x397   :  { %7448 = vmatprep.subr.bf16.mxu1 %v9752_v49  ;;  %7256 = vmatpush1.bf16.msra.mxu0 %v9797_v16  ;;  %v9845_v49 = vcombine.low %v3439_v59, %v3443_v62  ;;  %v3400_v16 = vld [vmem:[#allocation9 + $0xa50] sm:$0xff]  ;;  %v9854_v10 = vcombine.high %v3447_v6, %v3451_v7  ;;  %v3491_v59 = vld [vmem:[#allocation9 + $0xd28] sm:$0xff] }
 0x398   :  { %7257 = vmatprep.subr.bf16.mxu0 %v9806_v11  ;;  %v9799_v11 = vcombine.low %v3392_v2, %v3396_v3  ;;  %v9808_v15 = vcombine.high %v3400_v16, %v3404_v9  ;;  %v3444_v2 = vld [vmem:[#allocation9 + $0xbb0] sm:$0xff] }
 0x39a   :  { %7449 = vmatpush1.bf16.msra.mxu1 %v9751_v12  ;;  %v3455_v12 = vld [vmem:[#allocation9 + $0xc08] sm:$0xff] }
 0x39b   :  { %7450 = vmatprep.subr.bf16.mxu1 %v9760_v18  ;;  %7258 = vmatpush1.bf16.msra.mxu0 %v9805_v19  ;;  %v9853_v18 = vcombine.low %v3447_v6, %v3451_v7  ;;  %v3408_v19 = vld [vmem:[#allocation9 + $0xa90] sm:$0xff]  ;;  %v9862_v21 = vcombine.high %v3455_v12, %v3459_v14  ;;  %v3499_v6 = vld [vmem:[#allocation9 + $0xd68] sm:$0xff] }
 0x39c   :  { %7259 = vmatprep.subr.bf16.mxu0 %v9814_v61  ;;  %v9807_v61 = vcombine.low %v3400_v16, %v3404_v9  ;;  %v9816_v24 = vcombine.high %v3408_v19, %v3412_v20  ;;  %v3452_v16 = vld [vmem:[#allocation9 + $0xbf0] sm:$0xff] }
 0x39e   :  { %7451 = vmatpush1.bf16.msra.mxu1 %v9759_v52  ;;  %v3463_v52 = vld [vmem:[#allocation9 + $0xc48] sm:$0xff] }
 0x39f   :  { %7452 = vmatprep.subr.bf16.mxu1 %v9768_v25  ;;  %7260 = vmatpush1.bf16.msra.mxu0 %v9813_v26  ;;  %v9861_v25 = vcombine.low %v3455_v12, %v3459_v14  ;;  %v3416_v26 = vld [vmem:[#allocation9 + $0xad0] sm:$0xff]  ;;  %v9870_v29 = vcombine.high %v3463_v52, %v3467_v22  ;;  %v3507_v12 = vld [vmem:[#allocation9 + $0xda8] sm:$0xff] }
 0x3a0   :  { %7261 = vmatprep.subr.bf16.mxu0 %v9822_v30  ;;  %v9815_v30 = vcombine.low %v3408_v19, %v3412_v20  ;;  %v9824_v36 = vcombine.high %v3416_v26, %v3420_v28  ;;  %v3460_v19 = vld [vmem:[#allocation9 + $0xc30] sm:$0xff] }
 0x3a2   :  { %7453 = vmatpush1.bf16.msra.mxu1 %v9767_v31  ;;  %v3471_v31 = vld [vmem:[#allocation9 + $0xc88] sm:$0xff] }
 0x3a3   :  { %7454 = vmatprep.subr.bf16.mxu1 %v9776_v38  ;;  %7262 = vmatpush1.bf16.msra.mxu0 %v9821_v41  ;;  %v9869_v38 = vcombine.low %v3463_v52, %v3467_v22  ;;  %v3424_v41 = vld [vmem:[#allocation9 + $0xb10] sm:$0xff]  ;;  %v9878_v44 = vcombine.high %v3471_v31, %v3475_v32  ;;  %v3511_v52 = vld [vmem:[#allocation9 + $0xdc8] sm:$0xff] }
 0x3a4   :  { %7263 = vmatprep.subr.bf16.mxu0 %v9830_v45  ;;  %v9823_v45 = vcombine.low %v3416_v26, %v3420_v28  ;;  %v9832_v50 = vcombine.high %v3424_v41, %v3428_v43  ;;  %v3515_v22 = vld [vmem:[#allocation9 + $0xde8] sm:$0xff] }
 0x3a6   :  { %7455 = vmatpush1.bf16.msra.mxu1 %v9775_v46  ;;  %v3479_v46 = vld [vmem:[#allocation9 + $0xcc8] sm:$0xff] }
 0x3a7   :  { %7456 = vmatprep.subr.bf16.mxu1 %v9784_v51  ;;  %7264 = vmatpush1.bf16.msra.mxu0 %v9829_v53  ;;  %v9877_v51 = vcombine.low %v3471_v31, %v3475_v32  ;;  %v3432_v53 = vld [vmem:[#allocation9 + $0xb50] sm:$0xff]  ;;  %v9886_v56 = vcombine.high %v3479_v46, %v3483_v48  ;;  %v9918_v32 = vcombine.high %v3511_v52, %v3515_v22 }
 0x3a8   :  { %7265 = vmatprep.subr.bf16.mxu0 %v9838_v57  ;;  %v9831_v57 = vcombine.low %v3424_v41, %v3428_v43  ;;  %v9840_v62 = vcombine.high %v3432_v53, %v3436_v55  ;;  %v3523_v41 = vld [vmem:[#allocation9 + $0xe28] sm:$0xff] }
 0x3aa   :  { %7457 = vmatpush1.bf16.msra.mxu1 %v9783_v58  ;;  %v3487_v58 = vld [vmem:[#allocation9 + $0xd08] sm:$0xff] }
 0x3ab   :  { %7458 = vmatprep.subr.bf16.mxu1 %v9792_v63  ;;  %7266 = vmatpush1.bf16.msra.mxu0 %v9837_v0  ;;  %v9885_v63 = vcombine.low %v3479_v46, %v3483_v48  ;;  %v3440_v0 = vld [vmem:[#allocation9 + $0xb90] sm:$0xff]  ;;  %v9894_v3 = vcombine.high %v3487_v58, %v3491_v59 }
 0x3ac   :  { %7267 = vmatprep.subr.bf16.mxu0 %v9846_v4  ;;  %v9839_v4 = vcombine.low %v3432_v53, %v3436_v55  ;;  %v9848_v7 = vcombine.high %v3440_v0, %v3444_v2  ;;  %v3476_v46 = vld [vmem:[#allocation9 + $0xcb0] sm:$0xff]  ;;  %v3531_v53 = vld [vmem:[#allocation9 + $0xe68] sm:$0xff] }
 0x3ae   :  { %7459 = vmatpush1.bf16.msra.mxu1 %v9791_v5  ;;  %v3495_v5 = vld [vmem:[#allocation9 + $0xd48] sm:$0xff] }
 0x3af   :  { %7460 = vmatprep.subr.bf16.mxu1 %v9800_v8  ;;  %7268 = vmatpush1.bf16.msra.mxu0 %v9845_v49  ;;  %v9893_v8 = vcombine.low %v3487_v58, %v3491_v59  ;;  %v3448_v49 = vld [vmem:[#allocation9 + $0xbd0] sm:$0xff]  ;;  %v9902_v9 = vcombine.high %v3495_v5, %v3499_v6 }
 0x3b0   :  { %7269 = vmatprep.subr.bf16.mxu0 %v9854_v10  ;;  %v9847_v10 = vcombine.low %v3440_v0, %v3444_v2  ;;  %v9856_v14 = vcombine.high %v3448_v49, %v3452_v16  ;;  %v3484_v58 = vld [vmem:[#allocation9 + $0xcf0] sm:$0xff]  ;;  %v3539_v0 = vld [vmem:[#allocation9 + $0xea8] sm:$0xff] }
 0x3b2   :  { %7461 = vmatpush1.bf16.msra.mxu1 %v9799_v11  ;;  %v3503_v11 = vld [vmem:[#allocation9 + $0xd88] sm:$0xff] }
 0x3b3   :  { %7462 = vmatprep.subr.bf16.mxu1 %v9808_v15  ;;  %7270 = vmatpush1.bf16.msra.mxu0 %v9853_v18  ;;  %v9901_v15 = vcombine.low %v3495_v5, %v3499_v6  ;;  %v3456_v18 = vld [vmem:[#allocation9 + $0xc10] sm:$0xff]  ;;  %v9910_v20 = vcombine.high %v3503_v11, %v3507_v12  ;;  %v9909_v28 = vcombine.low %v3503_v11, %v3507_v12 }
 0x3b4   :  { %7280 = vmatprep.subr.bf16.mxu0 %v9862_v21  ;;  %v3492_v5 = vld [vmem:[#allocation9 + $0xd30] sm:$0xff] }
 0x3b5   :  { %v3500_v11 = vld [vmem:[#allocation9 + $0xd70] sm:$0xff] }
 0x3b6   :  { %7463 = vmatpush1.bf16.msra.mxu1 %v9807_v61  ;;  %7272 = vmatmul.mubr.bf16.vlgmr.msra.gmra.mrb[8].mxu0 %v11720_v33  ;;  %v9855_v61 = vcombine.low %v3448_v49, %v3452_v16  ;;  %v3547_v49 = vld [vmem:[#allocation9 + $0xee8] sm:$0xff] }
 0x3b7   :  { %7464 = vmatprep.subr.bf16.mxu1 %v9816_v24  ;;  %7281 = vmatpush1.bf16.msra.mxu0 %v9861_v25  ;;  %v9864_v25 = vcombine.high %v3456_v18, %v3460_v19 }
 0x3b8   :  { %7312 = vmatprep.mubr.bf16.mxu0 %v11724_v37  ;;  %7282 = vmatprep.subr.bf16.mxu0 %v9870_v29  ;;  %v3464_v29 = vld [vmem:[#allocation9 + $0xc50] sm:$0xff] }
 0x3ba   :  { %7465 = vmatpush1.bf16.msra.mxu1 %v9815_v30  ;;  %v3468_v30 = vld [vmem:[#allocation9 + $0xc70] sm:$0xff] }
 0x3bb   :  { %7466 = vmatprep.subr.bf16.mxu1 %v9824_v36  ;;  %7283 = vmatpush1.bf16.msra.mxu0 %v9869_v38  ;;  %v9863_v36 = vcombine.low %v3456_v18, %v3460_v19  ;;  %v3519_v38 = vld [vmem:[#allocation9 + $0xe08] sm:$0xff]  ;;  %v9872_v43 = vcombine.high %v3464_v29, %v3468_v30 }
 0x3bc   :  { %7284 = vmatprep.subr.bf16.mxu0 %v9878_v44  ;;  %v9917_v44 = vcombine.low %v3511_v52, %v3515_v22  ;;  %v9926_v48 = vcombine.high %v3519_v38, %v3523_v41  ;;  %v3555_v18 = vld [vmem:[#allocation9 + $0xf28] sm:$0xff]  ;;  %v3508_v52 = vld [vmem:[#allocation9 + $0xdb0] sm:$0xff] }
 0x3be   :  { %7467 = vmatpush1.bf16.msra.mxu1 %v9823_v45  ;;  %v3472_v45 = vld [vmem:[#allocation9 + $0xc90] sm:$0xff] }
 0x3bf   :  { %7468 = vmatprep.subr.bf16.mxu1 %v9832_v50  ;;  %7285 = vmatpush1.bf16.msra.mxu0 %v9877_v51  ;;  %v9871_v50 = vcombine.low %v3464_v29, %v3468_v30  ;;  %v3527_v51 = vld [vmem:[#allocation9 + $0xe48] sm:$0xff]  ;;  %v9880_v55 = vcombine.high %v3472_v45, %v3476_v46 }
 0x3c0   :  { %7286 = vmatprep.subr.bf16.mxu0 %v9886_v56  ;;  %v9925_v56 = vcombine.low %v3519_v38, %v3523_v41  ;;  %v9934_v59 = vcombine.high %v3527_v51, %v3531_v53 }
 0x3c2   :  { %7469 = vmatpush1.bf16.msra.mxu1 %v9831_v57  ;;  %v3480_v57 = vld [vmem:[#allocation9 + $0xcd0] sm:$0xff] }
 0x3c3   :  { %7470 = vmatprep.subr.bf16.mxu1 %v9840_v62  ;;  %7287 = vmatpush1.bf16.msra.mxu0 %v9885_v63  ;;  %v9879_v62 = vcombine.low %v3472_v45, %v3476_v46  ;;  %v3535_v63 = vld [vmem:[#allocation9 + $0xe88] sm:$0xff]  ;;  %v9888_v2 = vcombine.high %v3480_v57, %v3484_v58 }
 0x3c4   :  { %7288 = vmatprep.subr.bf16.mxu0 %v9894_v3  ;;  %v9933_v3 = vcombine.low %v3527_v51, %v3531_v53  ;;  %v9942_v6 = vcombine.high %v3535_v63, %v3539_v0  ;;  %v3567_v45 = vld [vmem:[#allocation9 + $0xf88] sm:$0xff]  ;;  %v3520_v53 = vld [vmem:[#allocation9 + $0xe10] sm:$0xff] }
 0x3c5   :  { %v3571_v46 = vld [vmem:[#allocation9 + $0xfa8] sm:$0xff] }
 0x3c6   :  { %7471 = vmatpush1.bf16.msra.mxu1 %v9839_v4  ;;  %v3488_v4 = vld [vmem:[#allocation9 + $0xd10] sm:$0xff] }
 0x3c7   :  { %7472 = vmatprep.subr.bf16.mxu1 %v9848_v7  ;;  %7289 = vmatpush1.bf16.msra.mxu0 %v9893_v8  ;;  %v9887_v7 = vcombine.low %v3480_v57, %v3484_v58  ;;  %v3543_v8 = vld [vmem:[#allocation9 + $0xec8] sm:$0xff]  ;;  %v9896_v16 = vcombine.high %v3488_v4, %v3492_v5 }
 0x3c8   :  { %7290 = vmatprep.subr.bf16.mxu0 %v9902_v9  ;;  %v9941_v9 = vcombine.low %v3535_v63, %v3539_v0  ;;  %v9950_v12 = vcombine.high %v3543_v8, %v3547_v49  ;;  %v3575_v58 = vld [vmem:[#allocation9 + $0xfc8] sm:$0xff]  ;;  %v9973_v63 = vcombine.low %v3567_v45, %v3571_v46  ;;  %v3528_v0 = vld [vmem:[#allocation9 + $0xe50] sm:$0xff] }
 0x3c9   :  { %v11793_v21 = vpop.f32.mrb[4].mxu0 }
 0x3ca   :  { %7473 = vmatpush1.bf16.msra.mxu1 %v9847_v10  ;;  %v11795_v24 = vpop.f32.mrb[5].mxu0  ;;  %v3496_v10 = vld [vmem:[#allocation9 + $0xd50] sm:$0xff] }
 0x3cb   :  { %7474 = vmatprep.subr.bf16.mxu1 %v9856_v14  ;;  %v3063_v26 = vpop.f32.mrb[6].mxu0  ;;  %7291 = vmatpush1.bf16.msra.mxu0 %v9901_v15  ;;  %v9895_v14 = vcombine.low %v3488_v4, %v3492_v5  ;;  %v3551_v15 = vld [vmem:[#allocation9 + $0xf08] sm:$0xff]  ;;  %v9904_v19 = vcombine.high %v3496_v10, %v3500_v11 }
 0x3cc   :  { %v3064_v31 = vpop.f32.mrb[7].mxu0  ;;  %7292 = vmatprep.subr.bf16.mxu0 %v9910_v20  ;;  %v9949_v20 = vcombine.low %v3543_v8, %v3547_v49  ;;  %v9958_v22 = vcombine.high %v3551_v15, %v3555_v18  ;;  %v3559_v26 = vld [vmem:[#allocation9 + $0xf48] sm:$0xff]  ;;  %v3536_v49 = vld [vmem:[#allocation9 + $0xe90] sm:$0xff] }
 0x3cd   :  { %v9957_v31 = vcombine.low %v3551_v15, %v3555_v18  ;;  %v3583_v5 = vld [vmem:[#allocation9 + $0x1008] sm:$0xff]  ;;  %v3544_v18 = vld [vmem:[#allocation9 + $0xed0] sm:$0xff] }
 0x3ce   :  { %7475 = vmatpush1.bf16.msra.mxu1 %v9855_v61  ;;  %v3504_v61 = vld [vmem:[#allocation9 + $0xd90] sm:$0xff] }
 0x3cf   :  { %7485 = vmatprep.subr.bf16.mxu1 %v9864_v25  ;;  %7293 = vmatpush1.bf16.msra.mxu0 %v9909_v28  ;;  %v9903_v25 = vcombine.low %v3496_v10, %v3500_v11  ;;  %v3563_v28 = vld [vmem:[#allocation9 + $0xf68] sm:$0xff]  ;;  %v9912_v29 = vcombine.high %v3504_v61, %v3508_v52 }
 0x3d0   :  { %7294 = vmatprep.subr.bf16.mxu0 %v9918_v32  ;;  %v3512_v32 = vld [vmem:[#allocation9 + $0xdd0] sm:$0xff]  ;;  %v9966_v41 = vcombine.high %v3559_v26, %v3563_v28  ;;  %v9965_v51 = vcombine.low %v3559_v26, %v3563_v28  ;;  %v3591_v11 = vld [vmem:[#allocation9 + $0x1048] sm:$0xff] }
 0x3d1   :  { %7477 = vmatmul.mubr.bf16.vlgmr.msra.gmra.mrb[8].mxu1 %v11720_v33  ;;  %v3552_v28 = vld [vmem:[#allocation9 + $0xf10] sm:$0xff] }
 0x3d2   :  { %7486 = vmatpush1.bf16.msra.mxu1 %v9863_v36  ;;  %7517 = vmatprep.mubr.bf16.mxu1 %v11724_v37  ;;  %v3516_v36 = vld [vmem:[#allocation9 + $0xdf0] sm:$0xff] }
 0x3d3   :  { %7487 = vmatprep.subr.bf16.mxu1 %v9872_v43  ;;  %7295 = vmatpush1.bf16.msra.mxu0 %v9917_v44  ;;  %v9911_v44 = vcombine.low %v3504_v61, %v3508_v52  ;;  %v9919_v57 = vcombine.low %v3512_v32, %v3516_v36  ;;  %v3599_v52 = vld [vmem:[#allocation9 + $0x1088] sm:$0xff] }
 0x3d4   :  { %7296 = vmatprep.subr.bf16.mxu0 %v9926_v48 }
 0x3d6   :  { %7488 = vmatpush1.bf16.msra.mxu1 %v9871_v50  ;;  %v9920_v50 = vcombine.high %v3512_v32, %v3516_v36  ;;  %v3607_v36 = vld [vmem:[#allocation9 + $0x10c8] sm:$0xff] }
 0x3d7   :  { %7489 = vmatprep.subr.bf16.mxu1 %v9880_v55  ;;  %7297 = vmatpush1.bf16.msra.mxu0 %v9925_v56  ;;  %v3524_v55 = vld [vmem:[#allocation9 + $0xe30] sm:$0xff]  ;;  %v9974_v56 = vcombine.high %v3567_v45, %v3571_v46 }
 0x3d8   :  { %7298 = vmatprep.subr.bf16.mxu0 %v9934_v59  ;;  %v3579_v59 = vld [vmem:[#allocation9 + $0xfe8] sm:$0xff]  ;;  %v9927_v4 = vcombine.low %v3520_v53, %v3524_v55  ;;  %v3560_v45 = vld [vmem:[#allocation9 + $0xf50] sm:$0xff] }
 0x3d9   :  { %v9981_v8 = vcombine.low %v3575_v58, %v3579_v59  ;;  %v3564_v46 = vld [vmem:[#allocation9 + $0xf70] sm:$0xff] }
 0x3da   :  { %7490 = vmatpush1.bf16.msra.mxu1 %v9879_v62  ;;  %v9928_v62 = vcombine.high %v3520_v53, %v3524_v55  ;;  %v3619_v53 = vld [vmem:[#allocation9 + $0x1128] sm:$0xff]  ;;  %v9968_v55 = vcombine.high %v3560_v45, %v3564_v46 }
 0x3db   :  { %7491 = vmatprep.subr.bf16.mxu1 %v9888_v2  ;;  %7299 = vmatpush1.bf16.msra.mxu0 %v9933_v3  ;;  %v3532_v2 = vld [vmem:[#allocation9 + $0xe70] sm:$0xff]  ;;  %v9982_v3 = vcombine.high %v3575_v58, %v3579_v59 }
 0x3dc   :  { %7300 = vmatprep.subr.bf16.mxu0 %v9942_v6  ;;  %v3587_v6 = vld [vmem:[#allocation9 + $0x1028] sm:$0xff]  ;;  %v9935_v10 = vcombine.low %v3528_v0, %v3532_v2  ;;  %v3572_v58 = vld [vmem:[#allocation9 + $0xfb0] sm:$0xff] }
 0x3dd   :  { %v9989_v15 = vcombine.low %v3583_v5, %v3587_v6 }
 0x3de   :  { %7492 = vmatpush1.bf16.msra.mxu1 %v9887_v7  ;;  %v9936_v7 = vcombine.high %v3528_v0, %v3532_v2  ;;  %v3627_v0 = vld [vmem:[#allocation9 + $0x1168] sm:$0xff] }
 0x3df   :  { %7493 = vmatprep.subr.bf16.mxu1 %v9896_v16  ;;  %7301 = vmatpush1.bf16.msra.mxu0 %v9941_v9  ;;  %v3540_v16 = vld [vmem:[#allocation9 + $0xeb0] sm:$0xff]  ;;  %v9990_v9 = vcombine.high %v3583_v5, %v3587_v6 }
 0x3e0   :  { %7302 = vmatprep.subr.bf16.mxu0 %v9950_v12  ;;  %v3595_v12 = vld [vmem:[#allocation9 + $0x1068] sm:$0xff]  ;;  %v9943_v61 = vcombine.low %v3536_v49, %v3540_v16  ;;  %v3580_v5 = vld [vmem:[#allocation9 + $0xff0] sm:$0xff] }
 0x3e1   :  { %v9997_v26 = vcombine.low %v3591_v11, %v3595_v12 }
 0x3e2   :  { %7494 = vmatpush1.bf16.msra.mxu1 %v9895_v14  ;;  %v9944_v14 = vcombine.high %v3536_v49, %v3540_v16  ;;  %v3635_v49 = vld [vmem:[#allocation9 + $0x11a8] sm:$0xff] }
 0x3e3   :  { %7495 = vmatprep.subr.bf16.mxu1 %v9904_v19  ;;  %7303 = vmatpush1.bf16.msra.mxu0 %v9949_v20  ;;  %v3548_v19 = vld [vmem:[#allocation9 + $0xef0] sm:$0xff]  ;;  %v9998_v20 = vcombine.high %v3591_v11, %v3595_v12 }
 0x3e4   :  { %v11799_v30 = vpop.f32.mrb[4].mxu1  ;;  %7304 = vmatprep.subr.bf16.mxu0 %v9958_v22  ;;  %v3603_v22 = vld [vmem:[#allocation9 + $0x10a8] sm:$0xff]  ;;  %v9951_v32 = vcombine.low %v3544_v18, %v3548_v19  ;;  %v3588_v11 = vld [vmem:[#allocation9 + $0x1030] sm:$0xff] }
 0x3e5   :  { %v11801_v38 = vpop.f32.mrb[5].mxu1 }
 0x3e6   :  { %v7154_v43 = vpop.f32.mrb[6].mxu1  ;;  %7496 = vmatpush1.bf16.msra.mxu1 %v9903_v25  ;;  %v9952_v25 = vcombine.high %v3544_v18, %v3548_v19  ;;  %v3643_v18 = vld [vmem:[#allocation9 + $0x11e8] sm:$0xff] }
 0x3e7   :  { %v7155_v48 = vpop.f32.mrb[7].mxu1  ;;  %7497 = vmatprep.subr.bf16.mxu1 %v9912_v29  ;;  %7305 = vmatpush1.bf16.msra.mxu0 %v9957_v31  ;;  %v3556_v29 = vld [vmem:[#allocation9 + $0xf30] sm:$0xff]  ;;  %v10006_v31 = vcombine.high %v3599_v52, %v3603_v22 }
 0x3e8   :  { %7306 = vmatprep.subr.bf16.mxu0 %v9966_v41  ;;  %v3611_v41 = vld [vmem:[#allocation9 + $0x10e8] sm:$0xff]  ;;  %v9960_v43 = vcombine.high %v3552_v28, %v3556_v29 }
 0x3e9   :  { %v10014_v48 = vcombine.high %v3607_v36, %v3611_v41 }
 0x3ea   :  { %7498 = vmatpush1.bf16.msra.mxu1 %v9911_v44  ;;  %v10005_v44 = vcombine.low %v3599_v52, %v3603_v22  ;;  %v3596_v52 = vld [vmem:[#allocation9 + $0x1070] sm:$0xff] }
 0x3eb   :  { %7499 = vmatprep.subr.bf16.mxu1 %v9920_v50  ;;  %7307 = vmatpush1.bf16.msra.mxu0 %v9965_v51  ;;  %v9959_v50 = vcombine.low %v3552_v28, %v3556_v29  ;;  %v3615_v51 = vld [vmem:[#allocation9 + $0x1108] sm:$0xff] }
 0x3ec   :  { %7308 = vmatprep.subr.bf16.mxu0 %v9974_v56  ;;  %v10013_v56 = vcombine.low %v3607_v36, %v3611_v41  ;;  %v10022_v59 = vcombine.high %v3615_v51, %v3619_v53  ;;  %v3651_v28 = vld [vmem:[#allocation9 + $0x1228] sm:$0xff]  ;;  %v3604_v36 = vld [vmem:[#allocation9 + $0x10b0] sm:$0xff] }
 0x3ee   :  { %7500 = vmatpush1.bf16.msra.mxu1 %v9919_v57  ;;  %v3568_v57 = vld [vmem:[#allocation9 + $0xf90] sm:$0xff] }
 0x3ef   :  { %7501 = vmatprep.subr.bf16.mxu1 %v9928_v62  ;;  %7309 = vmatpush1.bf16.msra.mxu0 %v9973_v63  ;;  %v9967_v62 = vcombine.low %v3560_v45, %v3564_v46  ;;  %v3623_v63 = vld [vmem:[#allocation9 + $0x1148] sm:$0xff]  ;;  %v9976_v2 = vcombine.high %v3568_v57, %v3572_v58 }
 0x3f0   :  { %7310 = vmatprep.subr.bf16.mxu0 %v9982_v3  ;;  %v10021_v3 = vcombine.low %v3615_v51, %v3619_v53  ;;  %v10030_v6 = vcombine.high %v3623_v63, %v3627_v0  ;;  %v3659_v45 = vld [vmem:[#allocation9 + $0x1268] sm:$0xff]  ;;  %v3612_v51 = vld [vmem:[#allocation9 + $0x10f0] sm:$0xff] }
 0x3f2   :  { %7502 = vmatpush1.bf16.msra.mxu1 %v9927_v4  ;;  %v3576_v4 = vld [vmem:[#allocation9 + $0xfd0] sm:$0xff] }
 0x3f3   :  { %7503 = vmatprep.subr.bf16.mxu1 %v9936_v7  ;;  %7311 = vmatpush1.bf16.msra.mxu0 %v9981_v8  ;;  %v9975_v7 = vcombine.low %v3568_v57, %v3572_v58  ;;  %v3631_v8 = vld [vmem:[#allocation9 + $0x1188] sm:$0xff]  ;;  %v9984_v16 = vcombine.high %v3576_v4, %v3580_v5 }
 0x3f4   :  { %7321 = vmatprep.subr.bf16.mxu0 %v9990_v9  ;;  %v10029_v9 = vcombine.low %v3623_v63, %v3627_v0  ;;  %v10038_v12 = vcombine.high %v3631_v8, %v3635_v49  ;;  %v3667_v57 = vld [vmem:[#allocation9 + $0x12a8] sm:$0xff]  ;;  %v3620_v63 = vld [vmem:[#allocation9 + $0x1130] sm:$0xff] }
 0x3f6   :  { %7504 = vmatpush1.bf16.msra.mxu1 %v9935_v10  ;;  %7313 = vmatmul.mubr.bf16.vlgmr.msra.gmra.mrb[8].mxu0 %v11739_v47  ;;  %v3584_v10 = vld [vmem:[#allocation9 + $0x1010] sm:$0xff] }
 0x3f7   :  { %7505 = vmatprep.subr.bf16.mxu1 %v9944_v14  ;;  %7322 = vmatpush1.bf16.msra.mxu0 %v9989_v15  ;;  %v9983_v14 = vcombine.low %v3576_v4, %v3580_v5  ;;  %v3639_v15 = vld [vmem:[#allocation9 + $0x11c8] sm:$0xff]  ;;  %v9992_v19 = vcombine.high %v3584_v10, %v3588_v11 }
 0x3f8   :  { %7353 = vmatprep.mubr.bf16.mxu0 %v11742_v54  ;;  %7323 = vmatprep.subr.bf16.mxu0 %v9998_v20  ;;  %v10037_v20 = vcombine.low %v3631_v8, %v3635_v49  ;;  %v10046_v22 = vcombine.high %v3639_v15, %v3643_v18  ;;  %v3675_v4 = vld [vmem:[#allocation9 + $0x12e8] sm:$0xff]  ;;  %v3628_v8 = vld [vmem:[#allocation9 + $0x1170] sm:$0xff] }
 0x3fa   :  { %7506 = vmatpush1.bf16.msra.mxu1 %v9943_v61  ;;  %v3592_v61 = vld [vmem:[#allocation9 + $0x1050] sm:$0xff] }
 0x3fb   :  { %7507 = vmatprep.subr.bf16.mxu1 %v9952_v25  ;;  %7324 = vmatpush1.bf16.msra.mxu0 %v9997_v26  ;;  %v9991_v25 = vcombine.low %v3584_v10, %v3588_v11  ;;  %v3647_v26 = vld [vmem:[#allocation9 + $0x1208] sm:$0xff]  ;;  %v10000_v29 = vcombine.high %v3592_v61, %v3596_v52 }
 0x3fc   :  { %7325 = vmatprep.subr.bf16.mxu0 %v10006_v31  ;;  %v10045_v31 = vcombine.low %v3639_v15, %v3643_v18  ;;  %v10054_v41 = vcombine.high %v3647_v26, %v3651_v28  ;;  %v3683_v10 = vld [vmem:[#allocation9 + $0x1328] sm:$0xff]  ;;  %v3636_v15 = vld [vmem:[#allocation9 + $0x11b0] sm:$0xff] }
 0x3fe   :  { %7508 = vmatpush1.bf16.msra.mxu1 %v9951_v32  ;;  %v3600_v32 = vld [vmem:[#allocation9 + $0x1090] sm:$0xff] }
 0x3ff   :  { %7509 = vmatprep.subr.bf16.mxu1 %v9960_v43  ;;  %7326 = vmatpush1.bf16.msra.mxu0 %v10005_v44  ;;  %v9999_v43 = vcombine.low %v3592_v61, %v3596_v52  ;;  %v3655_v44 = vld [vmem:[#allocation9 + $0x1248] sm:$0xff]  ;;  %v10008_v46 = vcombine.high %v3600_v32, %v3604_v36 }
 0x400   :  { %7327 = vmatprep.subr.bf16.mxu0 %v10014_v48  ;;  %v10053_v48 = vcombine.low %v3647_v26, %v3651_v28  ;;  %v10062_v53 = vcombine.high %v3655_v44, %v3659_v45  ;;  %v3691_v61 = vld [vmem:[#allocation9 + $0x1368] sm:$0xff]  ;;  %v3644_v26 = vld [vmem:[#allocation9 + $0x11f0] sm:$0xff] }
 0x402   :  { %7510 = vmatpush1.bf16.msra.mxu1 %v9959_v50  ;;  %v3608_v50 = vld [vmem:[#allocation9 + $0x10d0] sm:$0xff] }
 0x403   :  { %7511 = vmatprep.subr.bf16.mxu1 %v9968_v55  ;;  %7328 = vmatpush1.bf16.msra.mxu0 %v10013_v56  ;;  %v10007_v55 = vcombine.low %v3600_v32, %v3604_v36  ;;  %v3663_v56 = vld [vmem:[#allocation9 + $0x1288] sm:$0xff]  ;;  %v10016_v58 = vcombine.high %v3608_v50, %v3612_v51 }
 0x404   :  { %7329 = vmatprep.subr.bf16.mxu0 %v10022_v59  ;;  %v10061_v59 = vcombine.low %v3655_v44, %v3659_v45  ;;  %v10070_v0 = vcombine.high %v3663_v56, %v3667_v57  ;;  %v3699_v32 = vld [vmem:[#allocation9 + $0x13a8] sm:$0xff]  ;;  %v3652_v44 = vld [vmem:[#allocation9 + $0x1230] sm:$0xff] }
 0x406   :  { %7512 = vmatpush1.bf16.msra.mxu1 %v9967_v62  ;;  %v3616_v62 = vld [vmem:[#allocation9 + $0x1110] sm:$0xff] }
 0x407   :  { %7513 = vmatprep.subr.bf16.mxu1 %v9976_v2  ;;  %7330 = vmatpush1.bf16.msra.mxu0 %v10021_v3  ;;  %v10015_v2 = vcombine.low %v3608_v50, %v3612_v51  ;;  %v3671_v3 = vld [vmem:[#allocation9 + $0x12c8] sm:$0xff]  ;;  %v10024_v5 = vcombine.high %v3616_v62, %v3620_v63 }
 0x408   :  { %7331 = vmatprep.subr.bf16.mxu0 %v10030_v6  ;;  %v10069_v6 = vcombine.low %v3663_v56, %v3667_v57  ;;  %v10078_v49 = vcombine.high %v3671_v3, %v3675_v4  ;;  %v3707_v50 = vld [vmem:[#allocation9 + $0x13e8] sm:$0xff]  ;;  %v3660_v56 = vld [vmem:[#allocation9 + $0x1270] sm:$0xff] }
 0x40a   :  { %7514 = vmatpush1.bf16.msra.mxu1 %v9975_v7  ;;  %v3624_v7 = vld [vmem:[#allocation9 + $0x1150] sm:$0xff] }
 0x40b   :  { %7515 = vmatprep.subr.bf16.mxu1 %v9984_v16  ;;  %7332 = vmatpush1.bf16.msra.mxu0 %v10029_v9  ;;  %v10023_v16 = vcombine.low %v3616_v62, %v3620_v63  ;;  %v3679_v9 = vld [vmem:[#allocation9 + $0x1308] sm:$0xff]  ;;  %v10032_v11 = vcombine.high %v3624_v7, %v3628_v8  ;;  %v3077_v62 = vld [vmem:[#allocation9 + $0x38] sm:$0xff] }
 0x40c   :  { %7333 = vmatprep.subr.bf16.mxu0 %v10038_v12  ;;  %v10077_v12 = vcombine.low %v3671_v3, %v3675_v4  ;;  %v10086_v18 = vcombine.high %v3679_v9, %v3683_v10  ;;  %v3668_v3 = vld [vmem:[#allocation9 + $0x12b0] sm:$0xff] }
 0x40e   :  { %7516 = vmatpush1.bf16.msra.mxu1 %v9983_v14  ;;  %v3632_v14 = vld [vmem:[#allocation9 + $0x1190] sm:$0xff] }
 0x40f   :  { %7526 = vmatprep.subr.bf16.mxu1 %v9992_v19  ;;  %7334 = vmatpush1.bf16.msra.mxu0 %v10037_v20  ;;  %v10031_v19 = vcombine.low %v3624_v7, %v3628_v8  ;;  %v3687_v20 = vld [vmem:[#allocation9 + $0x1348] sm:$0xff]  ;;  %v10040_v52 = vcombine.high %v3632_v14, %v3636_v15  ;;  %v3085_v7 = vld [vmem:[#allocation9 + $0x78] sm:$0xff] }
 0x410   :  { %7335 = vmatprep.subr.bf16.mxu0 %v10046_v22  ;;  %v10085_v22 = vcombine.low %v3679_v9, %v3683_v10  ;;  %v10094_v28 = vcombine.high %v3687_v20, %v3691_v61  ;;  %v3676_v9 = vld [vmem:[#allocation9 + $0x12f0] sm:$0xff] }
 0x411   :  { %7518 = vmatmul.mubr.bf16.vlgmr.msra.gmra.mrb[8].mxu1 %v11739_v47 }
 0x412   :  { %7527 = vmatpush1.bf16.msra.mxu1 %v9991_v25  ;;  %7558 = vmatprep.mubr.bf16.mxu1 %v11742_v54  ;;  %v3640_v25 = vld [vmem:[#allocation9 + $0x11d0] sm:$0xff] }
 0x413   :  { %7528 = vmatprep.subr.bf16.mxu1 %v10000_v29  ;;  %7336 = vmatpush1.bf16.msra.mxu0 %v10045_v31  ;;  %v10039_v29 = vcombine.low %v3632_v14, %v3636_v15  ;;  %v3695_v31 = vld [vmem:[#allocation9 + $0x1388] sm:$0xff]  ;;  %v10048_v36 = vcombine.high %v3640_v25, %v3644_v26  ;;  %v3093_v14 = vld [vmem:[#allocation9 + $0xb8] sm:$0xff] }
 0x414   :  { %7337 = vmatprep.subr.bf16.mxu0 %v10054_v41  ;;  %v10093_v41 = vcombine.low %v3687_v20, %v3691_v61  ;;  %v10102_v45 = vcombine.high %v3695_v31, %v3699_v32  ;;  %v3680_v20 = vld [vmem:[#allocation9 + $0x1310] sm:$0xff] }
 0x415   :  { %v3684_v61 = vld [vmem:[#allocation9 + $0x1330] sm:$0xff] }
 0x416   :  { %7529 = vmatpush1.bf16.msra.mxu1 %v9999_v43  ;;  %v3648_v43 = vld [vmem:[#allocation9 + $0x1210] sm:$0xff] }
 0x417   :  { %7530 = vmatprep.subr.bf16.mxu1 %v10008_v46  ;;  %7338 = vmatpush1.bf16.msra.mxu0 %v10053_v48  ;;  %v10047_v46 = vcombine.low %v3640_v25, %v3644_v26  ;;  %v3703_v48 = vld [vmem:[#allocation9 + $0x13c8] sm:$0xff]  ;;  %v10056_v51 = vcombine.high %v3648_v43, %v3652_v44  ;;  %v3097_v25 = vld [vmem:[#allocation9 + $0xd8] sm:$0xff] }
 0x418   :  { %7339 = vmatprep.subr.bf16.mxu0 %v10062_v53  ;;  %v10101_v53 = vcombine.low %v3695_v31, %v3699_v32  ;;  %v10110_v57 = vcombine.high %v3703_v48, %v3707_v50  ;;  %v3101_v26 = vld [vmem:[#allocation9 + $0xf8] sm:$0xff]  ;;  %v3688_v32 = vld [vmem:[#allocation9 + $0x1350] sm:$0xff] }
 0x41a   :  { %7531 = vmatpush1.bf16.msra.mxu1 %v10007_v55  ;;  %v3656_v55 = vld [vmem:[#allocation9 + $0x1250] sm:$0xff] }
 0x41b   :  { %7532 = vmatprep.subr.bf16.mxu1 %v10016_v58  ;;  %7340 = vmatpush1.bf16.msra.mxu0 %v10061_v59  ;;  %v10055_v58 = vcombine.low %v3648_v43, %v3652_v44  ;;  %v3073_v59 = vld [vmem:[#allocation9 + $0x18] sm:$0xff]  ;;  %v10064_v63 = vcombine.high %v3656_v55, %v3660_v56  ;;  %v10087_v43 = vcombine.low %v3680_v20, %v3684_v61 }
 0x41c   :  { %7341 = vmatprep.subr.bf16.mxu0 %v10070_v0  ;;  %v10109_v0 = vcombine.low %v3703_v48, %v3707_v50  ;;  %v9482_v4 = vcombine.high %v3073_v59, %v3077_v62  ;;  %v3109_v44 = vld [vmem:[#allocation9 + $0x138] sm:$0xff]  ;;  %v9505_v48 = vcombine.low %v3097_v25, %v3101_v26  ;;  %v3696_v50 = vld [vmem:[#allocation9 + $0x1390] sm:$0xff] }
 0x41e   :  { %7533 = vmatpush1.bf16.msra.mxu1 %v10015_v2  ;;  %v3664_v2 = vld [vmem:[#allocation9 + $0x1290] sm:$0xff] }
 0x41f   :  { %7534 = vmatprep.subr.bf16.mxu1 %v10024_v5  ;;  %7342 = vmatpush1.bf16.msra.mxu0 %v10069_v6  ;;  %v10063_v5 = vcombine.low %v3656_v55, %v3660_v56  ;;  %v3081_v6 = vld [vmem:[#allocation9 + $0x58] sm:$0xff]  ;;  %v10072_v8 = vcombine.high %v3664_v2, %v3668_v3 }
 0x420   :  { %7343 = vmatprep.subr.bf16.mxu0 %v10078_v49  ;;  %v9481_v49 = vcombine.low %v3073_v59, %v3077_v62  ;;  %v9490_v10 = vcombine.high %v3081_v6, %v3085_v7  ;;  %v3113_v56 = vld [vmem:[#allocation9 + $0x158] sm:$0xff]  ;;  %v3704_v62 = vld [vmem:[#allocation9 + $0x13d0] sm:$0xff] }
 0x422   :  { %7535 = vmatpush1.bf16.msra.mxu1 %v10023_v16  ;;  %v3672_v16 = vld [vmem:[#allocation9 + $0x12d0] sm:$0xff] }
 0x423   :  { %7536 = vmatprep.subr.bf16.mxu1 %v10032_v11  ;;  %7344 = vmatpush1.bf16.msra.mxu0 %v10077_v12  ;;  %v10071_v11 = vcombine.low %v3664_v2, %v3668_v3  ;;  %v3089_v12 = vld [vmem:[#allocation9 + $0x98] sm:$0xff]  ;;  %v10080_v15 = vcombine.high %v3672_v16, %v3676_v9 }
 0x424   :  { %7345 = vmatprep.subr.bf16.mxu0 %v10086_v18  ;;  %v11808_v18 = vld [vmem:[#allocation10] sm:$0xff]  ;;  %v9497_v31 = vcombine.low %v3089_v12, %v3093_v14  ;;  %v3121_v2 = vld [vmem:[#allocation9 + $0x198] sm:$0xff] }
 0x425   :  { %v3125_v3 = vld [vmem:[#allocation9 + $0x1b8] sm:$0xff] }
 0x426   :  { %7537 = vmatpush1.bf16.msra.mxu1 %v10031_v19  ;;  %v9489_v19 = vcombine.low %v3081_v6, %v3085_v7  ;;  %v9530_v6 = vcombine.high %v3121_v2, %v3125_v3 }
 0x427   :  { %7538 = vmatprep.subr.bf16.mxu1 %v10040_v52  ;;  %7346 = vmatpush1.bf16.msra.mxu0 %v10085_v22  ;;  %v9498_v52 = vcombine.high %v3089_v12, %v3093_v14  ;;  %v10079_v22 = vcombine.low %v3672_v16, %v3676_v9  ;;  %v11042_v16 = vld [vmem:[#allocation12 + $0x4] ss:$8 sps:$4 sm:$0xff]   ;;  %v9529_v9 = vcombine.low %v3121_v2, %v3125_v3  ;;  %v11040_v12 = vld [vmem:[#allocation12] ss:$8 sps:$4 sm:$0xff]   ;;  %v3137_v14 = vld [vmem:[#allocation9 + $0x218] sm:$0xff] }
 0x428   :  { %7347 = vmatprep.subr.bf16.mxu0 %v10094_v28  ;;  %v3719_v28 = vrot.slane %v11808_v18, %v11766_v39  ;;  %v11060_v2 = vld [vmem:[#allocation12 + $0x64] ss:$8 sps:$4 sm:$0xff]  }
 0x42a   :  { %7539 = vmatpush1.bf16.msra.mxu1 %v10039_v29  ;;  %v10088_v29 = vcombine.high %v3680_v20, %v3684_v61 }
 0x42b   :  { %7540 = vmatprep.subr.bf16.mxu1 %v10048_v36  ;;  %7348 = vmatpush1.bf16.msra.mxu0 %v10093_v41  ;;  %v3692_v36 = vld [vmem:[#allocation9 + $0x1370] sm:$0xff]  ;;  %v9506_v41 = vcombine.high %v3097_v25, %v3101_v26  ;;  %v3145_v25 = vld [vmem:[#allocation9 + $0x258] sm:$0xff] }
 0x42c   :  { %7349 = vmatprep.subr.bf16.mxu0 %v10102_v45  ;;  %v10327_v45 = vadd.f32 %v11801_v38, %v3719_v28  ;;  %v10095_v55 = vcombine.low %v3688_v32, %v3692_v36  ;;  %v3149_v26 = vld [vmem:[#allocation9 + $0x278] sm:$0xff]  ;;  %v11048_v28 = vld [vmem:[#allocation12 + $0x24] ss:$8 sps:$4 sm:$0xff]  }
 0x42e   :  { %7541 = vmatpush1.bf16.msra.mxu1 %v10047_v46  ;;  %v10096_v46 = vcombine.high %v3688_v32, %v3692_v36  ;;  %11272 = vtanh.f32 %v10327_v45  ;;  %v11046_v32 = vld [vmem:[#allocation12 + $0x20] ss:$8 sps:$4 sm:$0xff]   ;;  %v3153_v36 = vld [vmem:[#allocation9 + $0x298] sm:$0xff] }
 0x42f   :  { %7542 = vmatprep.subr.bf16.mxu1 %v10056_v51  ;;  %7350 = vmatpush1.bf16.msra.mxu0 %v10101_v53  ;;  %v3700_v51 = vld [vmem:[#allocation9 + $0x13b0] sm:$0xff]  ;;  %v11049_v45 = vld [vmem:[#allocation12 + $0x30] ss:$8 sps:$4 sm:$0xff]  }
 0x430   :  { %7351 = vmatprep.subr.bf16.mxu0 %v10110_v57  ;;  %v3117_v57 = vld [vmem:[#allocation9 + $0x178] sm:$0xff] }
 0x431   :  { %v9522_v38 = vcombine.high %v3113_v56, %v3117_v57 }
 0x432   :  { %7543 = vmatpush1.bf16.msra.mxu1 %v10055_v58  ;;  %v10104_v58 = vcombine.high %v3696_v50, %v3700_v51 }
 0x433   :  { %7544 = vmatprep.subr.bf16.mxu1 %v10064_v63  ;;  %7352 = vmatpush1.bf16.msra.mxu0 %v10109_v0  ;;  %v3708_v63 = vld [vmem:[#allocation9 + $0x13f0] sm:$0xff]  ;;  %v10103_v0 = vcombine.low %v3696_v50, %v3700_v51 }
 0x434   :  { %7567 = vmatprep.subr.bf16.mxu0 %v9482_v4  ;;  %v10112_v4 = vcombine.high %v3704_v62, %v3708_v63  ;;  %v10111_v7 = vcombine.low %v3704_v62, %v3708_v63  ;;  %v11054_v50 = vld [vmem:[#allocation12 + $0x44] ss:$8 sps:$4 sm:$0xff]   ;;  %v11055_v63 = vld [vmem:[#allocation12 + $0x50] ss:$8 sps:$4 sm:$0xff]  }
 0x436   :  { %7545 = vmatpush1.bf16.msra.mxu1 %v10063_v5  ;;  %7354 = vmatmul.mubr.bf16.vlgmr.msra.gmra.mrb[8].mxu0 %v11750_v1  ;;  %v9521_v5 = vcombine.low %v3113_v56, %v3117_v57  ;;  %v3169_v56 = vld [vmem:[#allocation9 + $0x318] sm:$0xff] }
 0x437   :  { %7546 = vmatprep.subr.bf16.mxu1 %v10072_v8  ;;  %7568 = vmatpush1.bf16.msra.mxu0 %v9481_v49  ;;  %v3129_v8 = vld [vmem:[#allocation9 + $0x1d8] sm:$0xff] }
 0x438   :  { %7599 = vmatprep.mubr.bf16.mxu0 %v11685_v60  ;;  %7569 = vmatprep.subr.bf16.mxu0 %v9490_v10  ;;  %v3105_v60 = vld [vmem:[#allocation9 + $0x118] sm:$0xff]  ;;  %v11273_v10 = vpop.eup %11272 }
 0x439   :  { %v9514_v53 = vcombine.high %v3105_v60, %v3109_v44  ;;  %v9513_v59 = vcombine.low %v3105_v60, %v3109_v44  ;;  %v3133_v49 = vld [vmem:[#allocation9 + $0x1f8] sm:$0xff]  ;;  %v7781_v20 = vpack.c.bf16 %v11273_v10, %v11273_v10  ;;  %v9553_v60 = vcombine.low %v3145_v25, %v3149_v26 }
 0x43a   :  { %7547 = vmatpush1.bf16.msra.mxu1 %v10071_v11  ;;  %v9538_v11 = vcombine.high %v3129_v8, %v3133_v49  ;;  %v9537_v61 = vcombine.low %v3129_v8, %v3133_v49  ;;  %v3173_v57 = vld [vmem:[#allocation9 + $0x338] sm:$0xff] }
 0x43b   :  { %7548 = vmatprep.subr.bf16.mxu1 %v10080_v15  ;;  %7570 = vmatpush1.bf16.msra.mxu0 %v9489_v19  ;;  %v3141_v15 = vld [vmem:[#allocation9 + $0x238] sm:$0xff]  ;;  %v9578_v62 = vcombine.high %v3169_v56, %v3173_v57  ;;  %v9577_v3 = vcombine.low %v3169_v56, %v3173_v57 }
 0x43c   :  { %7571 = vmatprep.subr.bf16.mxu0 %v9498_v52  ;;  %v11045_v19 = vld [vmem:[#allocation12 + $0x14] ss:$8 sps:$4 sm:$0xff]   ;;  %v9546_v52 = vcombine.high %v3137_v14, %v3141_v15 }
 0x43d   :  { %v11063_v8 = vld [vmem:[#allocation12 + $0x74] ss:$8 sps:$4 sm:$0xff]  }
 0x43e   :  { %7549 = vmatpush1.bf16.msra.mxu1 %v10079_v22  ;;  %v11043_v22 = vld [vmem:[#allocation12 + $0x10] ss:$8 sps:$4 sm:$0xff]  }
 0x43f   :  { %7550 = vmatprep.subr.bf16.mxu1 %v10088_v29  ;;  %7572 = vmatpush1.bf16.msra.mxu0 %v9497_v31  ;;  %v9545_v29 = vcombine.low %v3137_v14, %v3141_v15  ;;  %v9554_v31 = vcombine.high %v3145_v25, %v3149_v26  ;;  %v3193_v10 = vld [vmem:[#allocation9 + $0x3d8] sm:$0xff] }
 0x440   :  { %7573 = vmatprep.subr.bf16.mxu0 %v9506_v41  ;;  %v3157_v41 = vld [vmem:[#allocation9 + $0x2b8] sm:$0xff] }
 0x441   :  { %v9562_v44 = vcombine.high %v3153_v36, %v3157_v41  ;;  %v9561_v51 = vcombine.low %v3153_v36, %v3157_v41  ;;  %v11067_v26 = vld [vmem:[#allocation12 + $0x90] ss:$8 sps:$4 sm:$0xff]   ;;  %v11070_v41 = vld [vmem:[#allocation12 + $0xa0] ss:$8 sps:$4 sm:$0xff]  }
 0x442   :  { %7551 = vmatpush1.bf16.msra.mxu1 %v10087_v43  ;;  %v11051_v43 = vld [vmem:[#allocation12 + $0x34] ss:$8 sps:$4 sm:$0xff]  }
 0x443   :  { %7552 = vmatprep.subr.bf16.mxu1 %v10096_v46  ;;  %7574 = vmatpush1.bf16.msra.mxu0 %v9505_v48  ;;  %v3161_v46 = vld [vmem:[#allocation9 + $0x2d8] sm:$0xff] }
 0x444   :  { %7575 = vmatprep.subr.bf16.mxu0 %v9514_v53  ;;  %v3165_v48 = vld [vmem:[#allocation9 + $0x2f8] sm:$0xff] }
 0x445   :  { %v9570_v53 = vcombine.high %v3161_v46, %v3165_v48 }
 0x446   :  { %7553 = vmatpush1.bf16.msra.mxu1 %v10095_v55  ;;  %v11052_v55 = vld [vmem:[#allocation12 + $0x40] ss:$8 sps:$4 sm:$0xff]  }
 0x447   :  { %7554 = vmatprep.subr.bf16.mxu1 %v10104_v58  ;;  %7576 = vmatpush1.bf16.msra.mxu0 %v9513_v59  ;;  %v11057_v58 = vld [vmem:[#allocation12 + $0x54] ss:$8 sps:$4 sm:$0xff]   ;;  %v9569_v59 = vcombine.low %v3161_v46, %v3165_v48  ;;  %v3715_v48 = vrot.slane %v11808_v18, %v11762_v34 }
 0x448   :  { %7577 = vmatprep.subr.bf16.mxu0 %v9522_v38  ;;  %v3177_v38 = vld [vmem:[#allocation9 + $0x358] sm:$0xff] }
 0x449   :  { %v10326_v57 = vadd.f32 %v11799_v30, %v3715_v48  ;;  %v11099_v48 = vld [vmem:[#allocation12 + $0x134] ss:$8 sps:$4 sm:$0xff]  }
 0x44a   :  { %7555 = vmatpush1.bf16.msra.mxu1 %v10103_v0  ;;  %v3181_v0 = vld [vmem:[#allocation9 + $0x378] sm:$0xff] }
 0x44b   :  { %7556 = vmatprep.subr.bf16.mxu1 %v10112_v4  ;;  %7578 = vmatpush1.bf16.msra.mxu0 %v9521_v5  ;;  %v9586_v4 = vcombine.high %v3177_v38, %v3181_v0  ;;  %v11058_v5 = vld [vmem:[#allocation12 + $0x60] ss:$8 sps:$4 sm:$0xff]   ;;  %v9585_v49 = vcombine.low %v3177_v38, %v3181_v0  ;;  %11274 = vtanh.f32 %v10326_v57  ;;  %v11079_v0 = vld [vmem:[#allocation12 + $0xd0] ss:$8 sps:$4 sm:$0xff]  }
 0x44c   :  { %7579 = vmatprep.subr.bf16.mxu0 %v9530_v6  ;;  %v3185_v6 = vld [vmem:[#allocation9 + $0x398] sm:$0xff] }
 0x44e   :  { %7557 = vmatpush1.bf16.msra.mxu1 %v10111_v7  ;;  %v3189_v7 = vld [vmem:[#allocation9 + $0x3b8] sm:$0xff] }
 0x44f   :  { %8568 = vmatprep.subr.bf16.mxu1 %v11042_v16  ;;  %7580 = vmatpush1.bf16.msra.mxu0 %v9529_v9  ;;  %v9594_v16 = vcombine.high %v3185_v6, %v3189_v7  ;;  %v11061_v9 = vld [vmem:[#allocation12 + $0x70] ss:$8 sps:$4 sm:$0xff]   ;;  %v9593_v14 = vcombine.low %v3185_v6, %v3189_v7  ;;  %v11082_v6 = vld [vmem:[#allocation12 + $0xe0] ss:$8 sps:$4 sm:$0xff]  }
 0x450   :  { %7581 = vmatprep.subr.bf16.mxu0 %v9538_v11  ;;  %v3197_v11 = vld [vmem:[#allocation9 + $0x3f8] sm:$0xff] }
 0x451   :  { %7559 = vmatmul.mubr.bf16.vlgmr.msra.gmra.mrb[8].mxu1 %v11750_v1  ;;  %v9602_v15 = vcombine.high %v3193_v10, %v3197_v11  ;;  %v3249_v7 = vld [vmem:[#allocation9 + $0x598] sm:$0xff] }
 0x452   :  { %8569 = vmatpush1.bf16.msra.mxu1 %v11040_v12  ;;  %8600 = vmatprep.mubr.bf16.mxu1 %v7781_v20  ;;  %v11066_v12 = vld [vmem:[#allocation12 + $0x84] ss:$8 sps:$4 sm:$0xff]   ;;  %v3201_v20 = vld [vmem:[#allocation9 + $0x418] sm:$0xff] }
 0x453   :  { %8570 = vmatprep.subr.bf16.mxu1 %v11045_v19  ;;  %7582 = vmatpush1.bf16.msra.mxu0 %v9537_v61  ;;  %v11064_v19 = vld [vmem:[#allocation12 + $0x80] ss:$8 sps:$4 sm:$0xff]   ;;  %v3205_v61 = vld [vmem:[#allocation9 + $0x438] sm:$0xff] }
 0x454   :  { %7583 = vmatprep.subr.bf16.mxu0 %v9546_v52  ;;  %v11069_v52 = vld [vmem:[#allocation12 + $0x94] ss:$8 sps:$4 sm:$0xff]   ;;  %v9610_v25 = vcombine.high %v3201_v20, %v3205_v61 }
 0x456   :  { %8571 = vmatpush1.bf16.msra.mxu1 %v11043_v22  ;;  %v9601_v22 = vcombine.low %v3193_v10, %v3197_v11  ;;  %v11085_v10 = vld [vmem:[#allocation12 + $0xf0] ss:$8 sps:$4 sm:$0xff]  }
 0x457   :  { %8572 = vmatprep.subr.bf16.mxu1 %v11048_v28  ;;  %7584 = vmatpush1.bf16.msra.mxu0 %v9545_v29  ;;  %v3209_v28 = vld [vmem:[#allocation9 + $0x458] sm:$0xff] }
 0x458   :  { %7585 = vmatprep.subr.bf16.mxu0 %v9554_v31  ;;  %v3213_v29 = vld [vmem:[#allocation9 + $0x478] sm:$0xff]  ;;  %v11072_v31 = vld [vmem:[#allocation12 + $0xa4] ss:$8 sps:$4 sm:$0xff]  }
 0x459   :  { %v9618_v36 = vcombine.high %v3209_v28, %v3213_v29  ;;  %v3257_v11 = vld [vmem:[#allocation9 + $0x5d8] sm:$0xff] }
 0x45a   :  { %8573 = vmatpush1.bf16.msra.mxu1 %v11046_v32  ;;  %v9609_v32 = vcombine.low %v3201_v20, %v3205_v61  ;;  %v3265_v61 = vld [vmem:[#allocation9 + $0x618] sm:$0xff] }
 0x45b   :  { %8574 = vmatprep.subr.bf16.mxu1 %v11051_v43  ;;  %7586 = vmatpush1.bf16.msra.mxu0 %v9553_v60  ;;  %v3217_v43 = vld [vmem:[#allocation9 + $0x498] sm:$0xff] }
 0x45c   :  { %7587 = vmatprep.subr.bf16.mxu0 %v9562_v44  ;;  %v3221_v60 = vld [vmem:[#allocation9 + $0x4b8] sm:$0xff] }
 0x45d   :  { %v11075_v44 = vld [vmem:[#allocation12 + $0xb4] ss:$8 sps:$4 sm:$0xff]   ;;  %v9626_v46 = vcombine.high %v3217_v43, %v3221_v60  ;;  %v9625_v56 = vcombine.low %v3217_v43, %v3221_v60 }
 0x45e   :  { %8575 = vmatpush1.bf16.msra.mxu1 %v11049_v45  ;;  %v9617_v45 = vcombine.low %v3209_v28, %v3213_v29 }
 0x45f   :  { %8576 = vmatprep.subr.bf16.mxu1 %v11054_v50  ;;  %7588 = vmatpush1.bf16.msra.mxu0 %v9561_v51  ;;  %v11073_v50 = vld [vmem:[#allocation12 + $0xb0] ss:$8 sps:$4 sm:$0xff]  }
 0x460   :  { %7589 = vmatprep.subr.bf16.mxu0 %v9570_v53  ;;  %v3225_v51 = vld [vmem:[#allocation9 + $0x4d8] sm:$0xff] }
 0x461   :  { %v3229_v53 = vld [vmem:[#allocation9 + $0x4f8] sm:$0xff] }
 0x462   :  { %8577 = vmatpush1.bf16.msra.mxu1 %v11052_v55  ;;  %v11078_v55 = vld [vmem:[#allocation12 + $0xc4] ss:$8 sps:$4 sm:$0xff]  }
 0x463   :  { %8578 = vmatprep.subr.bf16.mxu1 %v11057_v58  ;;  %7590 = vmatpush1.bf16.msra.mxu0 %v9569_v59  ;;  %v11076_v58 = vld [vmem:[#allocation12 + $0xc0] ss:$8 sps:$4 sm:$0xff]   ;;  %v3237_v59 = vld [vmem:[#allocation9 + $0x538] sm:$0xff] }
 0x464   :  { %7591 = vmatprep.subr.bf16.mxu0 %v9578_v62  ;;  %v11081_v62 = vld [vmem:[#allocation12 + $0xd4] ss:$8 sps:$4 sm:$0xff]  }
 0x466   :  { %8579 = vmatpush1.bf16.msra.mxu1 %v11055_v63  ;;  %v9633_v63 = vcombine.low %v3225_v51, %v3229_v53 }
 0x467   :  { %8580 = vmatprep.subr.bf16.mxu1 %v11060_v2  ;;  %7592 = vmatpush1.bf16.msra.mxu0 %v9577_v3  ;;  %v3241_v2 = vld [vmem:[#allocation9 + $0x558] sm:$0xff] }
 0x468   :  { %7593 = vmatprep.subr.bf16.mxu0 %v9586_v4  ;;  %v3245_v3 = vld [vmem:[#allocation9 + $0x578] sm:$0xff]  ;;  %v11084_v4 = vld [vmem:[#allocation12 + $0xe4] ss:$8 sps:$4 sm:$0xff]  }
 0x469   :  { %v9650_v30 = vcombine.high %v3241_v2, %v3245_v3 }
 0x46a   :  { %8581 = vmatpush1.bf16.msra.mxu1 %v11058_v5 }
 0x46b   :  { %8582 = vmatprep.subr.bf16.mxu1 %v11063_v8  ;;  %7594 = vmatpush1.bf16.msra.mxu0 %v9585_v49  ;;  %v3253_v8 = vld [vmem:[#allocation9 + $0x5b8] sm:$0xff] }
 0x46c   :  { %7595 = vmatprep.subr.bf16.mxu0 %v9594_v16  ;;  %v11087_v49 = vld [vmem:[#allocation12 + $0xf4] ss:$8 sps:$4 sm:$0xff]   ;;  %v9649_v16 = vcombine.low %v3241_v2, %v3245_v3 }
 0x46d   :  { %v3305_v2 = vld [vmem:[#allocation9 + $0x758] sm:$0xff] }
 0x46e   :  { %8583 = vmatpush1.bf16.msra.mxu1 %v11061_v9  ;;  %v9658_v9 = vcombine.high %v3249_v7, %v3253_v8  ;;  %v3309_v3 = vld [vmem:[#allocation9 + $0x778] sm:$0xff] }
 0x46f   :  { %8584 = vmatprep.subr.bf16.mxu1 %v11066_v12  ;;  %7596 = vmatpush1.bf16.msra.mxu0 %v9593_v14  ;;  %v3261_v12 = vld [vmem:[#allocation9 + $0x5f8] sm:$0xff]  ;;  %v11090_v14 = vld [vmem:[#allocation12 + $0x104] ss:$8 sps:$4 sm:$0xff]  }
 0x470   :  { %7597 = vmatprep.subr.bf16.mxu0 %v9602_v15  ;;  %v11275_v15 = vpop.eup %11274  ;;  %v9666_v20 = vcombine.high %v3257_v11, %v3261_v12  ;;  %v9665_v28 = vcombine.low %v3257_v11, %v3261_v12  ;;  %v3321_v11 = vld [vmem:[#allocation9 + $0x7d8] sm:$0xff] }
 0x471   :  { %v3325_v12 = vld [vmem:[#allocation9 + $0x7f8] sm:$0xff] }
 0x472   :  { %8585 = vmatpush1.bf16.msra.mxu1 %v11064_v19  ;;  %v9657_v19 = vcombine.low %v3249_v7, %v3253_v8  ;;  %v3313_v7 = vld [vmem:[#allocation9 + $0x798] sm:$0xff] }
 0x473   :  { %8586 = vmatprep.subr.bf16.mxu1 %v11069_v52  ;;  %7598 = vmatpush1.bf16.msra.mxu0 %v9601_v22  ;;  %v3269_v52 = vld [vmem:[#allocation9 + $0x638] sm:$0xff]  ;;  %v11088_v22 = vld [vmem:[#allocation12 + $0x100] ss:$8 sps:$4 sm:$0xff]  }
 0x474   :  { %7608 = vmatprep.subr.bf16.mxu0 %v9610_v25  ;;  %v7780_v25 = vpack.c.bf16 %v11275_v15, %v11275_v15  ;;  %v9674_v29 = vcombine.high %v3265_v61, %v3269_v52  ;;  %v9673_v43 = vcombine.low %v3265_v61, %v3269_v52  ;;  %v3317_v8 = vld [vmem:[#allocation9 + $0x7b8] sm:$0xff]  ;;  %v11114_v15 = vld [vmem:[#allocation12 + $0x184] ss:$8 sps:$4 sm:$0xff]  }
 0x475   :  { %v3329_v61 = vld [vmem:[#allocation9 + $0x818] sm:$0xff] }
 0x476   :  { %8587 = vmatpush1.bf16.msra.mxu1 %v11067_v26  ;;  %7600 = vmatmul.mubr.bf16.vlgmr.msra.gmra.mrb[12].mxu0 %v11690_v13  ;;  %v9634_v13 = vcombine.high %v3225_v51, %v3229_v53  ;;  %v11093_v26 = vld [vmem:[#allocation12 + $0x114] ss:$8 sps:$4 sm:$0xff]  }
 0x477   :  { %8588 = vmatprep.subr.bf16.mxu1 %v11072_v31  ;;  %7609 = vmatpush1.bf16.msra.mxu0 %v9609_v32  ;;  %v3273_v31 = vld [vmem:[#allocation9 + $0x658] sm:$0xff] }
 0x478   :  { %7640 = vmatprep.mubr.bf16.mxu0 %v11694_v17  ;;  %7610 = vmatprep.subr.bf16.mxu0 %v9618_v36  ;;  %v3233_v17 = vld [vmem:[#allocation9 + $0x518] sm:$0xff] }
 0x479   :  { %v9642_v38 = vcombine.high %v3233_v17, %v3237_v59  ;;  %v9641_v5 = vcombine.low %v3233_v17, %v3237_v59  ;;  %v3277_v32 = vld [vmem:[#allocation9 + $0x678] sm:$0xff] }
 0x47a   :  { %8589 = vmatpush1.bf16.msra.mxu1 %v11070_v41  ;;  %v11091_v36 = vld [vmem:[#allocation12 + $0x110] ss:$8 sps:$4 sm:$0xff]   ;;  %v11096_v41 = vld [vmem:[#allocation12 + $0x124] ss:$8 sps:$4 sm:$0xff]   ;;  %v9682_v60 = vcombine.high %v3273_v31, %v3277_v32 }
 0x47b   :  { %8590 = vmatprep.subr.bf16.mxu1 %v11075_v44  ;;  %7611 = vmatpush1.bf16.msra.mxu0 %v9617_v45  ;;  %v3281_v44 = vld [vmem:[#allocation9 + $0x698] sm:$0xff] }
 0x47c   :  { %7612 = vmatprep.subr.bf16.mxu0 %v9626_v46  ;;  %v3285_v45 = vld [vmem:[#allocation9 + $0x6b8] sm:$0xff]  ;;  %v11094_v46 = vld [vmem:[#allocation12 + $0x120] ss:$8 sps:$4 sm:$0xff]  }
 0x47d   :  { %v9690_v51 = vcombine.high %v3281_v44, %v3285_v45  ;;  %v3289_v53 = vld [vmem:[#allocation9 + $0x6d8] sm:$0xff]  ;;  %v9689_v57 = vcombine.low %v3281_v44, %v3285_v45  ;;  %v11118_v45 = vld [vmem:[#allocation12 + $0x1a0] ss:$8 sps:$4 sm:$0xff]  }
 0x47e   :  { %8591 = vmatpush1.bf16.msra.mxu1 %v11073_v50  ;;  %v9681_v50 = vcombine.low %v3273_v31, %v3277_v32  ;;  %v3297_v17 = vld [vmem:[#allocation9 + $0x718] sm:$0xff] }
 0x47f   :  { %8592 = vmatprep.subr.bf16.mxu1 %v11078_v55  ;;  %7613 = vmatpush1.bf16.msra.mxu0 %v9625_v56  ;;  %v3293_v55 = vld [vmem:[#allocation9 + $0x6f8] sm:$0xff] }
 0x480   :  { %7614 = vmatprep.subr.bf16.mxu0 %v9634_v13  ;;  %v11097_v56 = vld [vmem:[#allocation12 + $0x130] ss:$8 sps:$4 sm:$0xff]   ;;  %v11102_v13 = vld [vmem:[#allocation12 + $0x144] ss:$8 sps:$4 sm:$0xff]  }
 0x481   :  { %v3301_v59 = vld [vmem:[#allocation9 + $0x738] sm:$0xff] }
 0x482   :  { %8593 = vmatpush1.bf16.msra.mxu1 %v11076_v58  ;;  %v9698_v58 = vcombine.high %v3289_v53, %v3293_v55  ;;  %v3333_v52 = vld [vmem:[#allocation9 + $0x838] sm:$0xff] }
 0x483   :  { %8594 = vmatprep.subr.bf16.mxu1 %v11081_v62  ;;  %7615 = vmatpush1.bf16.msra.mxu0 %v9633_v63  ;;  %v11100_v62 = vld [vmem:[#allocation12 + $0x140] ss:$8 sps:$4 sm:$0xff]   ;;  %v11105_v63 = vld [vmem:[#allocation12 + $0x154] ss:$8 sps:$4 sm:$0xff]   ;;  %v11115_v32 = vld [vmem:[#allocation12 + $0x190] ss:$8 sps:$4 sm:$0xff]  }
 0x484   :  { %7616 = vmatprep.subr.bf16.mxu0 %v9642_v38  ;;  %v9697_v38 = vcombine.low %v3289_v53, %v3293_v55  ;;  %v3341_v31 = vld [vmem:[#allocation9 + $0x878] sm:$0xff] }
 0x485   :  { %v3349_v44 = vld [vmem:[#allocation9 + $0x8b8] sm:$0xff] }
 0x486   :  { %8595 = vmatpush1.bf16.msra.mxu1 %v11079_v0  ;;  %v9706_v0 = vcombine.high %v3297_v17, %v3301_v59  ;;  %v3357_v53 = vld [vmem:[#allocation9 + $0x8f8] sm:$0xff] }
 0x487   :  { %8596 = vmatprep.subr.bf16.mxu1 %v11084_v4  ;;  %7617 = vmatpush1.bf16.msra.mxu0 %v9641_v5  ;;  %v11103_v4 = vld [vmem:[#allocation12 + $0x150] ss:$8 sps:$4 sm:$0xff]   ;;  %v11108_v5 = vld [vmem:[#allocation12 + $0x164] ss:$8 sps:$4 sm:$0xff]  }
 0x488   :  { %7618 = vmatprep.subr.bf16.mxu0 %v9650_v30  ;;  %v9705_v30 = vcombine.low %v3297_v17, %v3301_v59  ;;  %v11121_v55 = vld [vmem:[#allocation12 + $0x1b0] ss:$8 sps:$4 sm:$0xff]   ;;  %v11124_v17 = vld [vmem:[#allocation12 + $0x1c0] ss:$8 sps:$4 sm:$0xff]   ;;  %v11129_v59 = vld [vmem:[#allocation12 + $0x1d4] ss:$8 sps:$4 sm:$0xff]  }
 0x48a   :  { %8597 = vmatpush1.bf16.msra.mxu1 %v11082_v6  ;;  %v9714_v6 = vcombine.high %v3305_v2, %v3309_v3 }
 0x48b   :  { %8598 = vmatprep.subr.bf16.mxu1 %v11087_v49  ;;  %7619 = vmatpush1.bf16.msra.mxu0 %v9649_v16  ;;  %v11106_v49 = vld [vmem:[#allocation12 + $0x160] ss:$8 sps:$4 sm:$0xff]   ;;  %v11111_v16 = vld [vmem:[#allocation12 + $0x174] ss:$8 sps:$4 sm:$0xff]  }
 0x48c   :  { %7620 = vmatprep.subr.bf16.mxu0 %v9658_v9  ;;  %v9713_v9 = vcombine.low %v3305_v2, %v3309_v3  ;;  %v11132_v2 = vld [vmem:[#allocation12 + $0x1e4] ss:$8 sps:$4 sm:$0xff]  }
 0x48e   :  { %8599 = vmatpush1.bf16.msra.mxu1 %v11085_v10  ;;  %v9722_v10 = vcombine.high %v3313_v7, %v3317_v8 }
 0x48f   :  { %8609 = vmatprep.subr.bf16.mxu1 %v11090_v14  ;;  %7621 = vmatpush1.bf16.msra.mxu0 %v9657_v19  ;;  %v11109_v14 = vld [vmem:[#allocation12 + $0x170] ss:$8 sps:$4 sm:$0xff]   ;;  %v9721_v19 = vcombine.low %v3313_v7, %v3317_v8  ;;  %v11135_v7 = vld [vmem:[#allocation12 + $0x1f4] ss:$8 sps:$4 sm:$0xff]  }
 0x490   :  { %7622 = vmatprep.subr.bf16.mxu0 %v9666_v20  ;;  %v9730_v20 = vcombine.high %v3321_v11, %v3325_v12 }
 0x491   :  { %8601 = vmatmul.mubr.bf16.vlgmr.msra.gmra.mrb[12].mxu1 %v7780_v25  ;;  %v11117_v25 = vld [vmem:[#allocation12 + $0x194] ss:$8 sps:$4 sm:$0xff]  }
 0x492   :  { %8610 = vmatpush1.bf16.msra.mxu1 %v11088_v22  ;;  %v11112_v22 = vld [vmem:[#allocation12 + $0x180] ss:$8 sps:$4 sm:$0xff]  }
 0x493   :  { %8611 = vmatprep.subr.bf16.mxu1 %v11093_v26  ;;  %7623 = vmatpush1.bf16.msra.mxu0 %v9665_v28  ;;  %v9729_v26 = vcombine.low %v3321_v11, %v3325_v12  ;;  %v9738_v28 = vcombine.high %v3329_v61, %v3333_v52  ;;  %v11138_v11 = vld [vmem:[#allocation12 + $0x204] ss:$8 sps:$4 sm:$0xff]  }
 0x494   :  { %7624 = vmatprep.subr.bf16.mxu0 %v9674_v29  ;;  %v3337_v29 = vld [vmem:[#allocation9 + $0x858] sm:$0xff] }
 0x496   :  { %8612 = vmatpush1.bf16.msra.mxu1 %v11091_v36  ;;  %v11120_v36 = vld [vmem:[#allocation12 + $0x1a4] ss:$8 sps:$4 sm:$0xff]  }
 0x497   :  { %8613 = vmatprep.subr.bf16.mxu1 %v11096_v41  ;;  %7625 = vmatpush1.bf16.msra.mxu0 %v9673_v43  ;;  %v9737_v41 = vcombine.low %v3329_v61, %v3333_v52  ;;  %v9746_v43 = vcombine.high %v3337_v29, %v3341_v31  ;;  %v3401_v52 = vld [vmem:[#allocation9 + $0xa58] sm:$0xff] }
 0x498   :  { %7626 = vmatprep.subr.bf16.mxu0 %v9682_v60  ;;  %v3345_v60 = vld [vmem:[#allocation9 + $0x898] sm:$0xff] }
 0x49a   :  { %8614 = vmatpush1.bf16.msra.mxu1 %v11094_v46  ;;  %v11123_v46 = vld [vmem:[#allocation12 + $0x1b4] ss:$8 sps:$4 sm:$0xff]  }
 0x49b   :  { %8615 = vmatprep.subr.bf16.mxu1 %v11099_v48  ;;  %7627 = vmatpush1.bf16.msra.mxu0 %v9681_v50  ;;  %v9745_v48 = vcombine.low %v3337_v29, %v3341_v31  ;;  %v9754_v50 = vcombine.high %v3345_v60, %v3349_v44  ;;  %v3413_v29 = vld [vmem:[#allocation9 + $0xab8] sm:$0xff] }
 0x49c   :  { %7628 = vmatprep.subr.bf16.mxu0 %v9690_v51  ;;  %v3353_v51 = vld [vmem:[#allocation9 + $0x8d8] sm:$0xff] }
 0x49e   :  { %8616 = vmatpush1.bf16.msra.mxu1 %v11097_v56  ;;  %v11126_v56 = vld [vmem:[#allocation12 + $0x1c4] ss:$8 sps:$4 sm:$0xff]  }
 0x49f   :  { %8617 = vmatprep.subr.bf16.mxu1 %v11102_v13  ;;  %7629 = vmatpush1.bf16.msra.mxu0 %v9689_v57  ;;  %v9753_v13 = vcombine.low %v3345_v60, %v3349_v44  ;;  %v9762_v57 = vcombine.high %v3353_v51, %v3357_v53  ;;  %v3425_v44 = vld [vmem:[#allocation9 + $0xb18] sm:$0xff] }
 0x4a0   :  { %7630 = vmatprep.subr.bf16.mxu0 %v9698_v58  ;;  %v3361_v58 = vld [vmem:[#allocation9 + $0x918] sm:$0xff] }
 0x4a2   :  { %8618 = vmatpush1.bf16.msra.mxu1 %v11100_v62 }
 0x4a3   :  { %8619 = vmatprep.subr.bf16.mxu1 %v11105_v63  ;;  %7631 = vmatpush1.bf16.msra.mxu0 %v9697_v38  ;;  %v3369_v63 = vld [vmem:[#allocation9 + $0x958] sm:$0xff] }
 0x4a4   :  { %7632 = vmatprep.subr.bf16.mxu0 %v9706_v0  ;;  %v3373_v38 = vld [vmem:[#allocation9 + $0x978] sm:$0xff] }
 0x4a5   :  { %v11127_v0 = vld [vmem:[#allocation12 + $0x1d0] ss:$8 sps:$4 sm:$0xff]   ;;  %v9777_v8 = vcombine.low %v3369_v63, %v3373_v38 }
 0x4a6   :  { %8620 = vmatpush1.bf16.msra.mxu1 %v11103_v4  ;;  %v9778_v4 = vcombine.high %v3369_v63, %v3373_v38  ;;  %v3461_v63 = vld [vmem:[#allocation9 + $0xc38] sm:$0xff] }
 0x4a7   :  { %8621 = vmatprep.subr.bf16.mxu1 %v11108_v5  ;;  %7633 = vmatpush1.bf16.msra.mxu0 %v9705_v30  ;;  %v3377_v5 = vld [vmem:[#allocation9 + $0x998] sm:$0xff] }
 0x4a8   :  { %7634 = vmatprep.subr.bf16.mxu0 %v9714_v6  ;;  %v3381_v30 = vld [vmem:[#allocation9 + $0x9b8] sm:$0xff]  ;;  %v11130_v6 = vld [vmem:[#allocation12 + $0x1e0] ss:$8 sps:$4 sm:$0xff]  }
 0x4a9   :  { %v9785_v12 = vcombine.low %v3377_v5, %v3381_v30 }
 0x4aa   :  { %8622 = vmatpush1.bf16.msra.mxu1 %v11106_v49  ;;  %v9786_v49 = vcombine.high %v3377_v5, %v3381_v30  ;;  %v3473_v30 = vld [vmem:[#allocation9 + $0xc98] sm:$0xff] }
 0x4ab   :  { %8623 = vmatprep.subr.bf16.mxu1 %v11111_v16  ;;  %7635 = vmatpush1.bf16.msra.mxu0 %v9713_v9  ;;  %v3385_v16 = vld [vmem:[#allocation9 + $0x9d8] sm:$0xff] }
 0x4ac   :  { %7636 = vmatprep.subr.bf16.mxu0 %v9722_v10  ;;  %v3389_v9 = vld [vmem:[#allocation9 + $0x9f8] sm:$0xff] }
 0x4ad   :  { %v11133_v10 = vld [vmem:[#allocation12 + $0x1f0] ss:$8 sps:$4 sm:$0xff]  }
 0x4ae   :  { %8624 = vmatpush1.bf16.msra.mxu1 %v11109_v14  ;;  %v9794_v14 = vcombine.high %v3385_v16, %v3389_v9 }
 0x4af   :  { %8625 = vmatprep.subr.bf16.mxu1 %v11114_v15  ;;  %7637 = vmatpush1.bf16.msra.mxu0 %v9721_v19  ;;  %v3393_v15 = vld [vmem:[#allocation9 + $0xa18] sm:$0xff] }
 0x4b0   :  { %7638 = vmatprep.subr.bf16.mxu0 %v9730_v20  ;;  %v3397_v19 = vld [vmem:[#allocation9 + $0xa38] sm:$0xff]  ;;  %v9793_v20 = vcombine.low %v3385_v16, %v3389_v9 }
 0x4b1   :  { %v9802_v61 = vcombine.high %v3393_v15, %v3397_v19  ;;  %v3485_v16 = vld [vmem:[#allocation9 + $0xcf8] sm:$0xff] }
 0x4b2   :  { %8626 = vmatpush1.bf16.msra.mxu1 %v11112_v22  ;;  %v3405_v22 = vld [vmem:[#allocation9 + $0xa78] sm:$0xff] }
 0x4b3   :  { %8627 = vmatprep.subr.bf16.mxu1 %v11117_v25  ;;  %7639 = vmatpush1.bf16.msra.mxu0 %v9729_v26  ;;  %v9801_v25 = vcombine.low %v3393_v15, %v3397_v19  ;;  %v9810_v26 = vcombine.high %v3401_v52, %v3405_v22  ;;  %v9809_v31 = vcombine.low %v3401_v52, %v3405_v22  ;;  %v3497_v19 = vld [vmem:[#allocation9 + $0xd58] sm:$0xff] }
 0x4b4   :  { %7649 = vmatprep.subr.bf16.mxu0 %v9738_v28  ;;  %v3409_v28 = vld [vmem:[#allocation9 + $0xa98] sm:$0xff]  ;;  %v3723_v22 = vrot.slane %v11808_v18, %v477_v35 }
 0x4b5   :  { %v3509_v52 = vld [vmem:[#allocation9 + $0xdb8] sm:$0xff] }
 0x4b6   :  { %8628 = vmatpush1.bf16.msra.mxu1 %v11115_v32  ;;  %7641 = vmatmul.mubr.bf16.vlgmr.msra.gmra.mrb[12].mxu0 %v11709_v23  ;;  %v3365_v23 = vld [vmem:[#allocation9 + $0x938] sm:$0xff]  ;;  %v9818_v32 = vcombine.high %v3409_v28, %v3413_v29 }
 0x4b7   :  { %8629 = vmatprep.subr.bf16.mxu1 %v11120_v36  ;;  %7650 = vmatpush1.bf16.msra.mxu0 %v9737_v41  ;;  %v9770_v62 = vcombine.high %v3361_v58, %v3365_v23  ;;  %v9769_v3 = vcombine.low %v3361_v58, %v3365_v23  ;;  %v3417_v36 = vld [vmem:[#allocation9 + $0xad8] sm:$0xff] }
 0x4b8   :  { %7681 = vmatprep.mubr.bf16.mxu0 %v11712_v27  ;;  %7651 = vmatprep.subr.bf16.mxu0 %v9746_v43  ;;  %v9761_v27 = vcombine.low %v3353_v51, %v3357_v53  ;;  %v3421_v41 = vld [vmem:[#allocation9 + $0xaf8] sm:$0xff]  ;;  %v9817_v43 = vcombine.low %v3409_v28, %v3413_v29 }
 0x4b9   :  { %v9826_v60 = vcombine.high %v3417_v36, %v3421_v41  ;;  %v3437_v51 = vld [vmem:[#allocation9 + $0xb78] sm:$0xff] }
 0x4ba   :  { %8630 = vmatpush1.bf16.msra.mxu1 %v11118_v45  ;;  %v3429_v45 = vld [vmem:[#allocation9 + $0xb38] sm:$0xff] }
 0x4bb   :  { %8631 = vmatprep.subr.bf16.mxu1 %v11123_v46  ;;  %7652 = vmatpush1.bf16.msra.mxu0 %v9745_v48  ;;  %v9825_v46 = vcombine.low %v3417_v36, %v3421_v41  ;;  %v9834_v48 = vcombine.high %v3425_v44, %v3429_v45  ;;  %v9833_v53 = vcombine.low %v3425_v44, %v3429_v45  ;;  %v3449_v23 = vld [vmem:[#allocation9 + $0xbd8] sm:$0xff] }
 0x4bc   :  { %7653 = vmatprep.subr.bf16.mxu0 %v9754_v50  ;;  %v3433_v50 = vld [vmem:[#allocation9 + $0xb58] sm:$0xff] }
 0x4be   :  { %8632 = vmatpush1.bf16.msra.mxu1 %v11121_v55  ;;  %v9842_v55 = vcombine.high %v3433_v50, %v3437_v51 }
 0x4bf   :  { %8633 = vmatprep.subr.bf16.mxu1 %v11126_v56  ;;  %7654 = vmatpush1.bf16.msra.mxu0 %v9753_v13  ;;  %v3441_v56 = vld [vmem:[#allocation9 + $0xb98] sm:$0xff] }
 0x4c0   :  { %7655 = vmatprep.subr.bf16.mxu0 %v9762_v57  ;;  %v3445_v13 = vld [vmem:[#allocation9 + $0xbb8] sm:$0xff]  ;;  %v9841_v57 = vcombine.low %v3433_v50, %v3437_v51 }
 0x4c1   :  { %v9850_v58 = vcombine.high %v3441_v56, %v3445_v13  ;;  %v3529_v50 = vld [vmem:[#allocation9 + $0xe58] sm:$0xff] }
 0x4c2   :  { %8634 = vmatpush1.bf16.msra.mxu1 %v11124_v17  ;;  %v3453_v17 = vld [vmem:[#allocation9 + $0xbf8] sm:$0xff] }
 0x4c3   :  { %8635 = vmatprep.subr.bf16.mxu1 %v11129_v59  ;;  %7656 = vmatpush1.bf16.msra.mxu0 %v9761_v27  ;;  %v9849_v59 = vcombine.low %v3441_v56, %v3445_v13  ;;  %v9858_v27 = vcombine.high %v3449_v23, %v3453_v17  ;;  %v9857_v38 = vcombine.low %v3449_v23, %v3453_v17  ;;  %v3533_v51 = vld [vmem:[#allocation9 + $0xe78] sm:$0xff] }
 0x4c4   :  { %7657 = vmatprep.subr.bf16.mxu0 %v9770_v62  ;;  %v3457_v62 = vld [vmem:[#allocation9 + $0xc18] sm:$0xff]  ;;  %v9937_v23 = vcombine.low %v3529_v50, %v3533_v51 }
 0x4c5   :  { %v3537_v56 = vld [vmem:[#allocation9 + $0xe98] sm:$0xff] }
 0x4c6   :  { %8636 = vmatpush1.bf16.msra.mxu1 %v11127_v0  ;;  %v9866_v0 = vcombine.high %v3457_v62, %v3461_v63  ;;  %v3541_v13 = vld [vmem:[#allocation9 + $0xeb8] sm:$0xff] }
 0x4c7   :  { %8637 = vmatprep.subr.bf16.mxu1 %v11132_v2  ;;  %7658 = vmatpush1.bf16.msra.mxu0 %v9769_v3  ;;  %v3465_v2 = vld [vmem:[#allocation9 + $0xc58] sm:$0xff] }
 0x4c8   :  { %7659 = vmatprep.subr.bf16.mxu0 %v9778_v4  ;;  %v3469_v3 = vld [vmem:[#allocation9 + $0xc78] sm:$0xff]  ;;  %v9865_v4 = vcombine.low %v3457_v62, %v3461_v63 }
 0x4c9   :  { %v9874_v5 = vcombine.high %v3465_v2, %v3469_v3  ;;  %v11141_v63 = vld [vmem:[#allocation12 + $0x214] ss:$8 sps:$4 sm:$0xff]  }
 0x4ca   :  { %8638 = vmatpush1.bf16.msra.mxu1 %v11130_v6  ;;  %v3477_v6 = vld [vmem:[#allocation9 + $0xcb8] sm:$0xff] }
 0x4cb   :  { %8639 = vmatprep.subr.bf16.mxu1 %v11135_v7  ;;  %7660 = vmatpush1.bf16.msra.mxu0 %v9777_v8  ;;  %v9873_v7 = vcombine.low %v3465_v2, %v3469_v3  ;;  %v9882_v8 = vcombine.high %v3473_v30, %v3477_v6  ;;  %v9881_v9 = vcombine.low %v3473_v30, %v3477_v6  ;;  %v11139_v3 = vld [vmem:[#allocation12 + $0x210] ss:$8 sps:$4 sm:$0xff]   ;;  %v3734_v30 = vsub.s32 5, %v11672_v42 }
 0x4cc   :  { %7661 = vmatprep.subr.bf16.mxu0 %v9786_v49  ;;  %v3481_v49 = vld [vmem:[#allocation9 + $0xcd8] sm:$0xff]  ;;  %v9945_v2 = vcombine.low %v3537_v56, %v3541_v13 }
 0x4cd   :  { %v3553_v6 = vld [vmem:[#allocation9 + $0xf18] sm:$0xff] }
 0x4ce   :  { %8640 = vmatpush1.bf16.msra.mxu1 %v11133_v10  ;;  %v9890_v10 = vcombine.high %v3481_v49, %v3485_v16 }
 0x4cf   :  { %8650 = vmatprep.subr.bf16.mxu1 %v11138_v11  ;;  %7662 = vmatpush1.bf16.msra.mxu0 %v9785_v12  ;;  %v3489_v11 = vld [vmem:[#allocation9 + $0xd18] sm:$0xff] }
 0x4d0   :  { %7663 = vmatprep.subr.bf16.mxu0 %v9794_v14  ;;  %v3493_v12 = vld [vmem:[#allocation9 + $0xd38] sm:$0xff]  ;;  %v9889_v14 = vcombine.low %v3481_v49, %v3485_v16  ;;  %v11142_v49 = vld [vmem:[#allocation12 + $0x220] ss:$8 sps:$4 sm:$0xff]  }
 0x4d1   :  { %v9898_v15 = vcombine.high %v3489_v11, %v3493_v12 }
 0x4d3   :  { %7664 = vmatpush1.bf16.msra.mxu0 %v9793_v20  ;;  %v9897_v20 = vcombine.low %v3489_v11, %v3493_v12  ;;  %v11147_v11 = vld [vmem:[#allocation12 + $0x234] ss:$8 sps:$4 sm:$0xff]  }
 0x4d4   :  { %7665 = vmatprep.subr.bf16.mxu0 %v9802_v61  ;;  %v3505_v61 = vld [vmem:[#allocation9 + $0xd98] sm:$0xff] }
 0x4d5   :  { %v9914_v28 = vcombine.high %v3505_v61, %v3509_v52  ;;  %v9913_v44 = vcombine.low %v3505_v61, %v3509_v52  ;;  %v3561_v12 = vld [vmem:[#allocation9 + $0xf58] sm:$0xff] }
 0x4d7   :  { %7666 = vmatpush1.bf16.msra.mxu0 %v9801_v25  ;;  %v3727_v25 = vrot.slane %v11808_v18, %v481_v40 }
 0x4d8   :  { %7667 = vmatprep.subr.bf16.mxu0 %v9810_v26 }
 0x4db   :  { %7668 = vmatpush1.bf16.msra.mxu0 %v9809_v31  ;;  %v3513_v31 = vld [vmem:[#allocation9 + $0xdd8] sm:$0xff] }
 0x4dc   :  { %7669 = vmatprep.subr.bf16.mxu0 %v9818_v32  ;;  %v3517_v32 = vld [vmem:[#allocation9 + $0xdf8] sm:$0xff] }
 0x4dd   :  { %v9922_v35 = vcombine.high %v3513_v31, %v3517_v32  ;;  %v9921_v40 = vcombine.low %v3513_v31, %v3517_v32  ;;  %v11148_v31 = vld [vmem:[#allocation12 + $0x240] ss:$8 sps:$4 sm:$0xff]  }
 0x4df   :  { %7670 = vmatpush1.bf16.msra.mxu0 %v9817_v43 }
 0x4e0   :  { %7671 = vmatprep.subr.bf16.mxu0 %v9826_v60 }
 0x4e3   :  { %7672 = vmatpush1.bf16.msra.mxu0 %v9825_v46  ;;  %v3521_v46 = vld [vmem:[#allocation9 + $0xe18] sm:$0xff] }
 0x4e4   :  { %7673 = vmatprep.subr.bf16.mxu0 %v9834_v48  ;;  %v3525_v48 = vld [vmem:[#allocation9 + $0xe38] sm:$0xff] }
 0x4e5   :  { %v9930_v18 = vcombine.high %v3521_v46, %v3525_v48 }
 0x4e7   :  { %7674 = vmatpush1.bf16.msra.mxu0 %v9833_v53  ;;  %v9929_v53 = vcombine.low %v3521_v46, %v3525_v48  ;;  %v3585_v46 = vld [vmem:[#allocation9 + $0x1018] sm:$0xff] }
 0x4e8   :  { %7675 = vmatprep.subr.bf16.mxu0 %v9842_v55  ;;  %v9938_v55 = vcombine.high %v3529_v50, %v3533_v51  ;;  %v3589_v48 = vld [vmem:[#allocation9 + $0x1038] sm:$0xff] }
 0x4e9   :  { %v9994_v50 = vcombine.high %v3585_v46, %v3589_v48 }
 0x4eb   :  { %7676 = vmatpush1.bf16.msra.mxu0 %v9841_v57 }
 0x4ec   :  { %7677 = vmatprep.subr.bf16.mxu0 %v9850_v58 }
 0x4ef   :  { %7678 = vmatpush1.bf16.msra.mxu0 %v9849_v59  ;;  %v11136_v59 = vld [vmem:[#allocation12 + $0x200] ss:$8 sps:$4 sm:$0xff]  }
 0x4f0   :  { %7679 = vmatprep.subr.bf16.mxu0 %v9858_v27  ;;  %v9946_v27 = vcombine.high %v3537_v56, %v3541_v13  ;;  %v3597_v56 = vld [vmem:[#allocation9 + $0x1078] sm:$0xff] }
 0x4f3   :  { %7680 = vmatpush1.bf16.msra.mxu0 %v9857_v38  ;;  %v3545_v38 = vld [vmem:[#allocation9 + $0xed8] sm:$0xff] }
 0x4f4   :  { %7690 = vmatprep.subr.bf16.mxu0 %v9866_v0  ;;  %v3549_v0 = vld [vmem:[#allocation9 + $0xef8] sm:$0xff] }
 0x4f6   :  { %7682 = vmatmul.mubr.bf16.vlgmr.msra.gmra.mrb[12].mxu0 %v11720_v33  ;;  %v3501_v33 = vld [vmem:[#allocation9 + $0xd78] sm:$0xff] }
 0x4f7   :  { %7691 = vmatpush1.bf16.msra.mxu0 %v9865_v4  ;;  %7722 = vmatprep.mubr.bf16.mxu0 %v11724_v37  ;;  %v9906_v37 = vcombine.high %v3497_v19, %v3501_v33  ;;  %v9905_v26 = vcombine.low %v3497_v19, %v3501_v33  ;;  %v9954_v4 = vcombine.high %v3545_v38, %v3549_v0 }
 0x4f8   :  { %7692 = vmatprep.subr.bf16.mxu0 %v9874_v5  ;;  %v11144_v5 = vld [vmem:[#allocation12 + $0x224] ss:$8 sps:$4 sm:$0xff]  }
 0x4fb   :  { %7693 = vmatpush1.bf16.msra.mxu0 %v9873_v7  ;;  %v3557_v7 = vld [vmem:[#allocation9 + $0xf38] sm:$0xff] }
 0x4fc   :  { %7694 = vmatprep.subr.bf16.mxu0 %v9882_v8  ;;  %v9953_v8 = vcombine.low %v3545_v38, %v3549_v0  ;;  %v9962_v16 = vcombine.high %v3553_v6, %v3557_v7  ;;  %v9961_v19 = vcombine.low %v3553_v6, %v3557_v7  ;;  %v11165_v0 = vld [vmem:[#allocation12 + $0x294] ss:$8 sps:$4 sm:$0xff]  }
 0x4fd   :  { %v3617_v6 = vld [vmem:[#allocation9 + $0x1118] sm:$0xff] }
 0x4fe   :  { %v3621_v7 = vld [vmem:[#allocation9 + $0x1138] sm:$0xff] }
 0x4ff   :  { %7695 = vmatpush1.bf16.msra.mxu0 %v9881_v9  ;;  %v11831_v9 = vld [vmem:[#allocation10] sm:$0xff] }
 0x500   :  { %7696 = vmatprep.subr.bf16.mxu0 %v9890_v10  ;;  %v3735_v10 = vrot.slane %v11831_v9, %v3734_v30 }
 0x503   :  { %7697 = vmatpush1.bf16.msra.mxu0 %v9889_v14  ;;  %v3565_v14 = vld [vmem:[#allocation9 + $0xf78] sm:$0xff] }
 0x504   :  { %7698 = vmatprep.subr.bf16.mxu0 %v9898_v15 }
 0x507   :  { %7699 = vmatpush1.bf16.msra.mxu0 %v9897_v20  ;;  %v11145_v20 = vld [vmem:[#allocation12 + $0x230] ss:$8 sps:$4 sm:$0xff]  }
 0x508   :  { %7700 = vmatprep.subr.bf16.mxu0 %v9906_v37  ;;  %v9970_v37 = vcombine.high %v3561_v12, %v3565_v14 }
 0x509   :  { %v7355_v29 = vpop.f32.mrb[8].mxu0 }
 0x50a   :  { %v10328_v36 = vadd.f32 %v7355_v29, %v3723_v22  ;;  %v7357_v41 = vpop.f32.mrb[9].mxu0  ;;  %v11150_v22 = vld [vmem:[#allocation12 + $0x244] ss:$8 sps:$4 sm:$0xff]   ;;  %v9969_v29 = vcombine.low %v3561_v12, %v3565_v14  ;;  %v3629_v12 = vld [vmem:[#allocation9 + $0x1178] sm:$0xff]  ;;  %v10025_v14 = vcombine.low %v3617_v6, %v3621_v7 }
 0x50b   :  { %v10329_v43 = vadd.f32 %v7357_v41, %v3727_v25  ;;  %v7359_v60 = vpop.f32.mrb[10].mxu0  ;;  %7701 = vmatpush1.bf16.msra.mxu0 %v9905_v26  ;;  %v3569_v25 = vld [vmem:[#allocation9 + $0xf98] sm:$0xff] }
 0x50c   :  { %11276 = vtanh.f32 %v10328_v36  ;;  %v7360_v45 = vpop.f32.mrb[11].mxu0  ;;  %7702 = vmatprep.subr.bf16.mxu0 %v9914_v28  ;;  %v3573_v26 = vld [vmem:[#allocation9 + $0xfb8] sm:$0xff] }
 0x50d   :  { %11278 = vtanh.f32 %v10329_v43  ;;  %v9978_v32 = vcombine.high %v3569_v25, %v3573_v26  ;;  %v11153_v36 = vld [vmem:[#allocation12 + $0x254] ss:$8 sps:$4 sm:$0xff]   ;;  %v9977_v60 = vcombine.low %v3569_v25, %v3573_v26  ;;  %v11172_v26 = vld [vmem:[#allocation12 + $0x2c0] ss:$8 sps:$4 sm:$0xff]  }
 0x50e   :  { %v3577_v41 = vld [vmem:[#allocation9 + $0xfd8] sm:$0xff] }
 0x50f   :  { %7703 = vmatpush1.bf16.msra.mxu0 %v9913_v44  ;;  %v3581_v43 = vld [vmem:[#allocation9 + $0xff8] sm:$0xff] }
 0x510   :  { %7704 = vmatprep.subr.bf16.mxu0 %v9922_v35  ;;  %v11151_v44 = vld [vmem:[#allocation12 + $0x250] ss:$8 sps:$4 sm:$0xff]   ;;  %v9986_v45 = vcombine.high %v3577_v41, %v3581_v43  ;;  %v11156_v35 = vld [vmem:[#allocation12 + $0x264] ss:$8 sps:$4 sm:$0xff]  }
 0x513   :  { %7705 = vmatpush1.bf16.msra.mxu0 %v9921_v40  ;;  %v9985_v40 = vcombine.low %v3577_v41, %v3581_v43  ;;  %v11175_v41 = vld [vmem:[#allocation12 + $0x2d0] ss:$8 sps:$4 sm:$0xff]  }
 0x514   :  { %7706 = vmatprep.subr.bf16.mxu0 %v9930_v18  ;;  %v11154_v18 = vld [vmem:[#allocation12 + $0x260] ss:$8 sps:$4 sm:$0xff]  }
 0x516   :  { %v11277_v57 = vpop.eup %11276 }
 0x517   :  { %v11279_v58 = vpop.eup %11278  ;;  %7707 = vmatpush1.bf16.msra.mxu0 %v9929_v53  ;;  %v7782_v62 = vpack.c.bf16 %v11277_v57, %v11277_v57  ;;  %v11159_v53 = vld [vmem:[#allocation12 + $0x274] ss:$8 sps:$4 sm:$0xff]   ;;  %v9993_v57 = vcombine.low %v3585_v46, %v3589_v48 }
 0x518   :  { %v7783_v17 = vpack.c.bf16 %v11279_v58, %v11279_v58  ;;  %7708 = vmatprep.subr.bf16.mxu0 %v9938_v55  ;;  %v3593_v55 = vld [vmem:[#allocation9 + $0x1058] sm:$0xff] }
 0x519   :  { %v11157_v58 = vld [vmem:[#allocation12 + $0x270] ss:$8 sps:$4 sm:$0xff]   ;;  %v11183_v48 = vld [vmem:[#allocation12 + $0x2f4] ss:$8 sps:$4 sm:$0xff]  }
 0x51a   :  { %8641 = vmatprep.mubr.bf16.mxu1 %v7783_v17  ;;  %v11162_v17 = vld [vmem:[#allocation12 + $0x284] ss:$8 sps:$4 sm:$0xff]  }
 0x51b   :  { %7709 = vmatpush1.bf16.msra.mxu0 %v9937_v23  ;;  %8642 = vmatmul.mubr.bf16.vlgmr.msra.gmra.mrb[12].mxu1 %v7782_v62  ;;  %v10002_v23 = vcombine.high %v3593_v55, %v3597_v56  ;;  %v10001_v62 = vcombine.low %v3593_v55, %v3597_v56  ;;  %v3665_v55 = vld [vmem:[#allocation9 + $0x1298] sm:$0xff] }
 0x51c   :  { %8651 = vmatpush1.bf16.msra.mxu1 %v11136_v59  ;;  %7710 = vmatprep.subr.bf16.mxu0 %v9946_v27  ;;  %v3601_v59 = vld [vmem:[#allocation9 + $0x1098] sm:$0xff] }
 0x51d   :  { %8652 = vmatprep.subr.bf16.mxu1 %v11141_v63  ;;  %v3605_v27 = vld [vmem:[#allocation9 + $0x10b8] sm:$0xff]  ;;  %v11160_v63 = vld [vmem:[#allocation12 + $0x280] ss:$8 sps:$4 sm:$0xff]  }
 0x51e   :  { %v10010_v38 = vcombine.high %v3601_v59, %v3605_v27  ;;  %v3669_v56 = vld [vmem:[#allocation9 + $0x12b8] sm:$0xff] }
 0x51f   :  { %7711 = vmatpush1.bf16.msra.mxu0 %v9945_v2  ;;  %v3609_v2 = vld [vmem:[#allocation9 + $0x10d8] sm:$0xff] }
 0x520   :  { %8653 = vmatpush1.bf16.msra.mxu1 %v11139_v3  ;;  %7712 = vmatprep.subr.bf16.mxu0 %v9954_v4  ;;  %v3613_v3 = vld [vmem:[#allocation9 + $0x10f8] sm:$0xff]  ;;  %v10009_v4 = vcombine.low %v3601_v59, %v3605_v27 }
 0x521   :  { %8654 = vmatprep.subr.bf16.mxu1 %v11144_v5  ;;  %v11163_v5 = vld [vmem:[#allocation12 + $0x290] ss:$8 sps:$4 sm:$0xff]   ;;  %v10018_v30 = vcombine.high %v3609_v2, %v3613_v3 }
 0x522   :  { %v3673_v27 = vld [vmem:[#allocation9 + $0x12d8] sm:$0xff] }
 0x523   :  { %7713 = vmatpush1.bf16.msra.mxu0 %v9953_v8  ;;  %v3730_v8 = vsub.s32 4, %v11672_v42 }
 0x524   :  { %v11834_v15 = vpop.f32.mrb[8].mxu1  ;;  %8655 = vmatpush1.bf16.msra.mxu1 %v11142_v49  ;;  %7714 = vmatprep.subr.bf16.mxu0 %v9962_v16  ;;  %v11166_v49 = vld [vmem:[#allocation12 + $0x2a0] ss:$8 sps:$4 sm:$0xff]   ;;  %v10026_v16 = vcombine.high %v3617_v6, %v3621_v7  ;;  %v3689_v7 = vld [vmem:[#allocation9 + $0x1358] sm:$0xff] }
 0x525   :  { %v7562_v33 = vpop.f32.mrb[9].mxu1  ;;  %8656 = vmatprep.subr.bf16.mxu1 %v11147_v11  ;;  %v3625_v11 = vld [vmem:[#allocation9 + $0x1158] sm:$0xff]  ;;  %v11190_v6 = vld [vmem:[#allocation12 + $0x320] ss:$8 sps:$4 sm:$0xff]  }
 0x526   :  { %v10331_v61 = vadd.f32 %v7562_v33, %v3735_v10  ;;  %v7564_v52 = vpop.f32.mrb[10].mxu1  ;;  %v11171_v10 = vld [vmem:[#allocation12 + $0x2b4] ss:$8 sps:$4 sm:$0xff]   ;;  %v11169_v33 = vld [vmem:[#allocation12 + $0x2b0] ss:$8 sps:$4 sm:$0xff]  }
 0x527   :  { %v7565_v28 = vpop.f32.mrb[11].mxu1  ;;  %7715 = vmatpush1.bf16.msra.mxu0 %v9961_v19  ;;  %v3731_v19 = vrot.slane %v11831_v9, %v3730_v8  ;;  %v3637_v52 = vld [vmem:[#allocation9 + $0x11b8] sm:$0xff] }
 0x528   :  { %11280 = vtanh.f32 %v10331_v61  ;;  %8657 = vmatpush1.bf16.msra.mxu1 %v11145_v20  ;;  %7716 = vmatprep.subr.bf16.mxu0 %v9970_v37  ;;  %v10034_v20 = vcombine.high %v3625_v11, %v3629_v12  ;;  %v11174_v37 = vld [vmem:[#allocation12 + $0x2c4] ss:$8 sps:$4 sm:$0xff]   ;;  %v3633_v61 = vld [vmem:[#allocation9 + $0x1198] sm:$0xff] }
 0x529   :  { %8658 = vmatprep.subr.bf16.mxu1 %v11150_v22  ;;  %v10033_v22 = vcombine.low %v3625_v11, %v3629_v12  ;;  %v10330_v25 = vadd.f32 %v11834_v15, %v3731_v19  ;;  %v10042_v28 = vcombine.high %v3633_v61, %v3637_v52  ;;  %v11195_v8 = vld [vmem:[#allocation12 + $0x334] ss:$8 sps:$4 sm:$0xff]  }
 0x52a   :  { %v3697_v11 = vld [vmem:[#allocation9 + $0x1398] sm:$0xff] }
 0x52b   :  { %7717 = vmatpush1.bf16.msra.mxu0 %v9969_v29  ;;  %v11177_v29 = vld [vmem:[#allocation12 + $0x2d4] ss:$8 sps:$4 sm:$0xff]   ;;  %11282 = vtanh.f32 %v10330_v25 }
 0x52c   :  { %8659 = vmatpush1.bf16.msra.mxu1 %v11148_v31  ;;  %7718 = vmatprep.subr.bf16.mxu0 %v9978_v32  ;;  %v3641_v31 = vld [vmem:[#allocation9 + $0x11d8] sm:$0xff] }
 0x52d   :  { %8660 = vmatprep.subr.bf16.mxu1 %v11153_v36  ;;  %v3645_v32 = vld [vmem:[#allocation9 + $0x11f8] sm:$0xff]  ;;  %v10041_v36 = vcombine.low %v3633_v61, %v3637_v52 }
 0x52e   :  { %v10050_v43 = vcombine.high %v3641_v31, %v3645_v32  ;;  %v10049_v15 = vcombine.low %v3641_v31, %v3645_v32  ;;  %v3701_v12 = vld [vmem:[#allocation9 + $0x13b8] sm:$0xff]  ;;  %v11202_v31 = vld [vmem:[#allocation12 + $0x360] ss:$8 sps:$4 sm:$0xff]  }
 0x52f   :  { %7719 = vmatpush1.bf16.msra.mxu0 %v9977_v60  ;;  %v11180_v60 = vld [vmem:[#allocation12 + $0x2e4] ss:$8 sps:$4 sm:$0xff]   ;;  %v3709_v61 = vld [vmem:[#allocation9 + $0x13f8] sm:$0xff] }
 0x530   :  { %8661 = vmatpush1.bf16.msra.mxu1 %v11151_v44  ;;  %7720 = vmatprep.subr.bf16.mxu0 %v9986_v45  ;;  %v3649_v44 = vld [vmem:[#allocation9 + $0x1218] sm:$0xff] }
 0x531   :  { %8662 = vmatprep.subr.bf16.mxu1 %v11156_v35  ;;  %v3653_v45 = vld [vmem:[#allocation9 + $0x1238] sm:$0xff]  ;;  %v11178_v35 = vld [vmem:[#allocation12 + $0x2e0] ss:$8 sps:$4 sm:$0xff]  }
 0x532   :  { %v11281_v51 = vpop.eup %11280  ;;  %v10058_v46 = vcombine.high %v3649_v44, %v3653_v45  ;;  %v11201_v52 = vld [vmem:[#allocation12 + $0x354] ss:$8 sps:$4 sm:$0xff]  }
 0x533   :  { %v7785_v13 = vpack.c.bf16 %v11281_v51, %v11281_v51  ;;  %7721 = vmatpush1.bf16.msra.mxu0 %v9985_v40  ;;  %v3657_v40 = vld [vmem:[#allocation9 + $0x1258] sm:$0xff] }
 0x534   :  { %8663 = vmatpush1.bf16.msra.mxu1 %v11154_v18  ;;  %7731 = vmatprep.subr.bf16.mxu0 %v9994_v50  ;;  %v3661_v18 = vld [vmem:[#allocation9 + $0x1278] sm:$0xff]  ;;  %v10057_v50 = vcombine.low %v3649_v44, %v3653_v45  ;;  %v11216_v45 = vld [vmem:[#allocation12 + $0x3a4] ss:$8 sps:$4 sm:$0xff]  }
 0x535   :  { %8664 = vmatprep.subr.bf16.mxu1 %v11159_v53  ;;  %8682 = vmatprep.mubr.bf16.mxu1 %v7785_v13  ;;  %v11181_v51 = vld [vmem:[#allocation12 + $0x2f0] ss:$8 sps:$4 sm:$0xff]   ;;  %v10066_v53 = vcombine.high %v3657_v40, %v3661_v18  ;;  %v11186_v13 = vld [vmem:[#allocation12 + $0x304] ss:$8 sps:$4 sm:$0xff]   ;;  %v11207_v32 = vld [vmem:[#allocation12 + $0x374] ss:$8 sps:$4 sm:$0xff]  }
 0x536   :  { %7723 = vmatmul.mubr.bf16.vlgmr.msra.gmra.mrb[12].mxu0 %v11739_v47  ;;  %v11168_v47 = vld [vmem:[#allocation12 + $0x2a4] ss:$8 sps:$4 sm:$0xff]   ;;  %v11211_v44 = vld [vmem:[#allocation12 + $0x390] ss:$8 sps:$4 sm:$0xff]  }
 0x537   :  { %7732 = vmatpush1.bf16.msra.mxu0 %v9993_v57  ;;  %7763 = vmatprep.mubr.bf16.mxu0 %v11742_v54  ;;  %v10017_v54 = vcombine.low %v3609_v2, %v3613_v3  ;;  %v11283_v57 = vpop.eup %11282  ;;  %v11187_v2 = vld [vmem:[#allocation12 + $0x310] ss:$8 sps:$4 sm:$0xff]  }
 0x538   :  { %8665 = vmatpush1.bf16.msra.mxu1 %v11157_v58  ;;  %7733 = vmatprep.subr.bf16.mxu0 %v10002_v23  ;;  %v10065_v58 = vcombine.low %v3657_v40, %v3661_v18  ;;  %v10074_v23 = vcombine.high %v3665_v55, %v3669_v56  ;;  %v7784_v59 = vpack.c.bf16 %v11283_v57, %v11283_v57  ;;  %v3681_v3 = vld [vmem:[#allocation9 + $0x1318] sm:$0xff]  ;;  %v11220_v40 = vld [vmem:[#allocation12 + $0x3c0] ss:$8 sps:$4 sm:$0xff]  }
 0x539   :  { %8666 = vmatprep.subr.bf16.mxu1 %v11162_v17  ;;  %v11184_v17 = vld [vmem:[#allocation12 + $0x300] ss:$8 sps:$4 sm:$0xff]   ;;  %v11223_v18 = vld [vmem:[#allocation12 + $0x3d0] ss:$8 sps:$4 sm:$0xff]  }
 0x53a   :  { %v11234_v57 = vld [vmem:[%s11964_s10 + $0x48] sm:$0xff]  }
 0x53b   :  { %7734 = vmatpush1.bf16.msra.mxu0 %v10001_v62  ;;  %v3677_v62 = vld [vmem:[#allocation9 + $0x12f8] sm:$0xff] }
 0x53c   :  { %8667 = vmatpush1.bf16.msra.mxu1 %v11160_v63  ;;  %7735 = vmatprep.subr.bf16.mxu0 %v10010_v38  ;;  %v11189_v63 = vld [vmem:[#allocation12 + $0x314] ss:$8 sps:$4 sm:$0xff]   ;;  %v10073_v38 = vcombine.low %v3665_v55, %v3669_v56  ;;  %v11229_v55 = vld [vmem:[#allocation12 + $0x3f0] ss:$8 sps:$4 sm:$0xff]  }
 0x53d   :  { %8668 = vmatprep.subr.bf16.mxu1 %v11165_v0  ;;  %v10082_v0 = vcombine.high %v3673_v27, %v3677_v62  ;;  %v11232_v56 = vld [vmem:[%s11964_s10 + $0x40] sm:$0xff]  }
 0x53f   :  { %7736 = vmatpush1.bf16.msra.mxu0 %v10009_v4  ;;  %v3685_v4 = vld [vmem:[#allocation9 + $0x1338] sm:$0xff] }
 0x540   :  { %8669 = vmatpush1.bf16.msra.mxu1 %v11163_v5  ;;  %7737 = vmatprep.subr.bf16.mxu0 %v10018_v30  ;;  %v11192_v5 = vld [vmem:[#allocation12 + $0x324] ss:$8 sps:$4 sm:$0xff]   ;;  %v10081_v30 = vcombine.low %v3673_v27, %v3677_v62  ;;  %v3738_v62 = vsub.s32 6, %v11672_v42 }
 0x541   :  { %8670 = vmatprep.subr.bf16.mxu1 %v11168_v47  ;;  %v10090_v47 = vcombine.high %v3681_v3, %v3685_v4  ;;  %v11239_v27 = vld [vmem:[%s11964_s10 + $0x18] sm:$0xff]  }
 0x543   :  { %7738 = vmatpush1.bf16.msra.mxu0 %v10017_v54  ;;  %v3693_v54 = vld [vmem:[#allocation9 + $0x1378] sm:$0xff] }
 0x544   :  { %8671 = vmatpush1.bf16.msra.mxu1 %v11166_v49  ;;  %7739 = vmatprep.subr.bf16.mxu0 %v10026_v16  ;;  %v10089_v49 = vcombine.low %v3681_v3, %v3685_v4  ;;  %v10098_v16 = vcombine.high %v3689_v7, %v3693_v54  ;;  %v10097_v19 = vcombine.low %v3689_v7, %v3693_v54 }
 0x545   :  { %8672 = vmatprep.subr.bf16.mxu1 %v11171_v10  ;;  %v11193_v10 = vld [vmem:[#allocation12 + $0x330] ss:$8 sps:$4 sm:$0xff]  }
 0x547   :  { %7740 = vmatpush1.bf16.msra.mxu0 %v10025_v14  ;;  %v11198_v14 = vld [vmem:[#allocation12 + $0x344] ss:$8 sps:$4 sm:$0xff]  }
 0x548   :  { %8673 = vmatpush1.bf16.msra.mxu1 %v11169_v33  ;;  %7741 = vmatprep.subr.bf16.mxu0 %v10034_v20  ;;  %v10106_v33 = vcombine.high %v3697_v11, %v3701_v12  ;;  %v11196_v20 = vld [vmem:[#allocation12 + $0x340] ss:$8 sps:$4 sm:$0xff]  }
 0x549   :  { %8674 = vmatprep.subr.bf16.mxu1 %v11174_v37  ;;  %v3705_v37 = vld [vmem:[#allocation9 + $0x13d8] sm:$0xff] }
 0x54a   :  { %v10114_v25 = vcombine.high %v3705_v37, %v3709_v61 }
 0x54b   :  { %7742 = vmatpush1.bf16.msra.mxu0 %v10033_v22  ;;  %v10105_v22 = vcombine.low %v3697_v11, %v3701_v12  ;;  %v11245_v11 = vld [vmem:[%s11964_s10 + $0x30] sm:$0xff]   ;;  %v11246_v12 = vld [vmem:[%s11964_s10 + $0x78] sm:$0xff]  }
 0x54c   :  { %8675 = vmatpush1.bf16.msra.mxu1 %v11172_v26  ;;  %7743 = vmatprep.subr.bf16.mxu0 %v10042_v28  ;;  %v11199_v26 = vld [vmem:[#allocation12 + $0x350] ss:$8 sps:$4 sm:$0xff]   ;;  %v11204_v28 = vld [vmem:[#allocation12 + $0x364] ss:$8 sps:$4 sm:$0xff]  }
 0x54d   :  { %8676 = vmatprep.subr.bf16.mxu1 %v11177_v29  ;;  %v10113_v29 = vcombine.low %v3705_v37, %v3709_v61  ;;  %v7916_v37 = vld [vmem:[#allocation13] sm:$0x3] }
 0x54e   :  { %v7921_v61 = vrot.slane %v7916_v37, %v11762_v34 }
 0x54f   :  { %7744 = vmatpush1.bf16.msra.mxu0 %v10041_v36  ;;  %v11205_v36 = vld [vmem:[#allocation12 + $0x370] ss:$8 sps:$4 sm:$0xff]  }
 0x550   :  { %8677 = vmatpush1.bf16.msra.mxu1 %v11175_v41  ;;  %7745 = vmatprep.subr.bf16.mxu0 %v10050_v43  ;;  %v11210_v41 = vld [vmem:[#allocation12 + $0x384] ss:$8 sps:$4 sm:$0xff]   ;;  %v11208_v43 = vld [vmem:[#allocation12 + $0x380] ss:$8 sps:$4 sm:$0xff]  }
 0x551   :  { %8678 = vmatprep.subr.bf16.mxu1 %v11180_v60  ;;  %v11213_v60 = vld [vmem:[#allocation12 + $0x394] ss:$8 sps:$4 sm:$0xff]  }
 0x553   :  { %7746 = vmatpush1.bf16.msra.mxu0 %v10049_v15  ;;  %v11214_v15 = vld [vmem:[#allocation12 + $0x3a0] ss:$8 sps:$4 sm:$0xff]  }
 0x554   :  { %8679 = vmatpush1.bf16.msra.mxu1 %v11178_v35  ;;  %7747 = vmatprep.subr.bf16.mxu0 %v10058_v46  ;;  %v11219_v35 = vld [vmem:[#allocation12 + $0x3b4] ss:$8 sps:$4 sm:$0xff]   ;;  %v11217_v46 = vld [vmem:[#allocation12 + $0x3b0] ss:$8 sps:$4 sm:$0xff]  }
 0x555   :  { %8680 = vmatprep.subr.bf16.mxu1 %v11183_v48  ;;  %v11222_v48 = vld [vmem:[#allocation12 + $0x3c4] ss:$8 sps:$4 sm:$0xff]  }
 0x557   :  { %7748 = vmatpush1.bf16.msra.mxu0 %v10057_v50  ;;  %v11228_v50 = vld [vmem:[#allocation12 + $0x3e4] ss:$8 sps:$4 sm:$0xff]  }
 0x558   :  { %8681 = vmatpush1.bf16.msra.mxu1 %v11181_v51  ;;  %7749 = vmatprep.subr.bf16.mxu0 %v10066_v53  ;;  %v11226_v51 = vld [vmem:[#allocation12 + $0x3e0] ss:$8 sps:$4 sm:$0xff]   ;;  %v11231_v53 = vld [vmem:[#allocation12 + $0x3f4] ss:$8 sps:$4 sm:$0xff]  }
 0x559   :  { %8691 = vmatprep.subr.bf16.mxu1 %v11186_v13  ;;  %v11233_v13 = vld [vmem:[%s11964_s10] sm:$0xff]  }
 0x55b   :  { %8683 = vmatmul.mubr.bf16.vlgmr.msra.gmra.mrb[12].mxu1 %v7784_v59  ;;  %7750 = vmatpush1.bf16.msra.mxu0 %v10065_v58  ;;  %v11235_v58 = vld [vmem:[%s11964_s10 + $0x8] sm:$0xff]   ;;  %v11238_v59 = vld [vmem:[%s11964_s10 + $0x58] sm:$0xff]  }
 0x55c   :  { %7751 = vmatprep.subr.bf16.mxu0 %v10074_v23  ;;  %8692 = vmatpush1.bf16.msra.mxu1 %v11184_v17  ;;  %v11236_v23 = vld [vmem:[%s11964_s10 + $0x50] sm:$0xff]  }
 0x55d   :  { %8693 = vmatprep.subr.bf16.mxu1 %v11189_v63  ;;  %v11237_v17 = vld [vmem:[%s11964_s10 + $0x10] sm:$0xff]   ;;  %v3742_v63 = vsub.s32 7, %v11672_v42  ;;  %v11240_v42 = vld [vmem:[%s11964_s10 + $0x60] sm:$0xff]  }
 0x55f   :  { %7752 = vmatpush1.bf16.msra.mxu0 %v10073_v38  ;;  %v3739_v38 = vrot.slane %v11831_v9, %v3738_v62 }
 0x560   :  { %7753 = vmatprep.subr.bf16.mxu0 %v10082_v0  ;;  %8694 = vmatpush1.bf16.msra.mxu1 %v11187_v2  ;;  %v3743_v0 = vrot.slane %v11831_v9, %v3742_v63  ;;  %v11241_v9 = vld [vmem:[%s11964_s10 + $0x20] sm:$0xff]  }
 0x561   :  { %8695 = vmatprep.subr.bf16.mxu1 %v11192_v5 }
 0x563   :  { %7754 = vmatpush1.bf16.msra.mxu0 %v10081_v30 }
 0x564   :  { %7755 = vmatprep.subr.bf16.mxu0 %v10090_v47  ;;  %8696 = vmatpush1.bf16.msra.mxu1 %v11190_v6 }
 0x565   :  { %8697 = vmatprep.subr.bf16.mxu1 %v11195_v8 }
 0x567   :  { %7756 = vmatpush1.bf16.msra.mxu0 %v10089_v49  ;;  %v11242_v49 = vld [vmem:[%s11964_s10 + $0x68] sm:$0xff]  }
 0x568   :  { %7757 = vmatprep.subr.bf16.mxu0 %v10098_v16  ;;  %8698 = vmatpush1.bf16.msra.mxu1 %v11193_v10  ;;  %v11243_v16 = vld [vmem:[%s11964_s10 + $0x28] sm:$0xff]   ;;  %v11244_v10 = vld [vmem:[%s11964_s10 + $0x70] sm:$0xff]  }
 0x569   :  { %8699 = vmatprep.subr.bf16.mxu1 %v11198_v14  ;;  %v11247_v14 = vld [vmem:[%s11964_s10 + $0x38] sm:$0xff]  }
 0x56b   :  { %7758 = vmatpush1.bf16.msra.mxu0 %v10097_v19  ;;  %v11248_v19 = vld [vmem:[%s11963_s9 + $0x40] sm:$0xff]  }
 0x56c   :  { %7759 = vmatprep.subr.bf16.mxu0 %v10106_v33  ;;  %8700 = vmatpush1.bf16.msra.mxu1 %v11196_v20  ;;  %v2652_v33 = vld [vmem:[#allocation7] sm:$0x3] }
 0x56d   :  { %8701 = vmatprep.subr.bf16.mxu1 %v11201_v52  ;;  %v2661_v20 = vrot.slane %v2652_v33, %v11766_v39 }
 0x56f   :  { %7760 = vmatpush1.bf16.msra.mxu0 %v10105_v22  ;;  %v10325_v52 = vadd.f32 %v11795_v24, %v2661_v20  ;;  %v7925_v22 = vrot.slane %v7916_v37, %v11766_v39  ;;  %v11250_v39 = vld [vmem:[%s11963_s9 + $0x48] sm:$0xff]  }
 0x570   :  { %7761 = vmatprep.subr.bf16.mxu0 %v10114_v25  ;;  %8702 = vmatpush1.bf16.msra.mxu1 %v11199_v26 }
 0x571   :  { %8703 = vmatprep.subr.bf16.mxu1 %v11204_v28 }
 0x573   :  { %7762 = vmatpush1.bf16.msra.mxu0 %v10113_v29 }
 0x574   :  { %8704 = vmatpush1.bf16.msra.mxu1 %v11202_v31  ;;  %10276 = vmatprep.subr.bf16.mxu0 %v11232_v56  ;;  %v11262_v56 = vld [vmem:[%s11963_s9 + $0x78] sm:$0xff]  }
 0x575   :  { %8705 = vmatprep.subr.bf16.mxu1 %v11207_v32 }
 0x576   :  { %7764 = vmatmul.mubr.bf16.vlgmr.msra.gmra.mrb[12].mxu0 %v11750_v1  ;;  %v11225_v1 = vld [vmem:[#allocation12 + $0x3d4] ss:$8 sps:$4 sm:$0xff]  }
 0x577   :  { %10277 = vmatpush3.bf16.msra.mxu0 %v11233_v13  ;;  %v11263_v13 = vld [vmem:[%s11963_s9 + $0x38] sm:$0xff]  }
 0x578   :  { %8706 = vmatpush1.bf16.msra.mxu1 %v11205_v36  ;;  %10278 = vmatprep.subr.bf16.mxu0 %v11234_v57 }
 0x579   :  { %8707 = vmatprep.subr.bf16.mxu1 %v11210_v41 }
 0x57b   :  { %10279 = vmatpush3.bf16.msra.mxu0 %v11235_v58 }
 0x57c   :  { %8708 = vmatpush1.bf16.msra.mxu1 %v11208_v43  ;;  %10280 = vmatprep.subr.bf16.mxu0 %v11236_v23 }
 0x57d   :  { %8709 = vmatprep.subr.bf16.mxu1 %v11213_v60 }
 0x57f   :  { %10281 = vmatpush3.bf16.msra.mxu0 %v11237_v17 }
 0x580   :  { %8710 = vmatpush1.bf16.msra.mxu1 %v11211_v44  ;;  %10282 = vmatprep.subr.bf16.mxu0 %v11238_v59  ;;  %v11249_v44 = vld [vmem:[%s11963_s9] sm:$0xff]  }
 0x581   :  { %8711 = vmatprep.subr.bf16.mxu1 %v11216_v45 }
 0x583   :  { %10283 = vmatpush3.bf16.msra.mxu0 %v11239_v27 }
 0x584   :  { %8712 = vmatpush1.bf16.msra.mxu1 %v11214_v15  ;;  %10284 = vmatprep.subr.bf16.mxu0 %v11240_v42  ;;  %v11251_v15 = vld [vmem:[%s11963_s9 + $0x8] sm:$0xff]  }
 0x585   :  { %8713 = vmatprep.subr.bf16.mxu1 %v11219_v35  ;;  %v11252_v35 = vld [vmem:[%s11963_s9 + $0x50] sm:$0xff]  }
 0x587   :  { %10285 = vmatpush3.bf16.msra.mxu0 %v11241_v9 }
 0x588   :  { %8714 = vmatpush1.bf16.msra.mxu1 %v11217_v46  ;;  %10286 = vmatprep.subr.bf16.mxu0 %v11242_v49  ;;  %v11253_v46 = vld [vmem:[%s11963_s9 + $0x10] sm:$0xff]  }
 0x589   :  { %8715 = vmatprep.subr.bf16.mxu1 %v11222_v48  ;;  %v11254_v48 = vld [vmem:[%s11963_s9 + $0x58] sm:$0xff]  }
 0x58b   :  { %10287 = vmatpush3.bf16.msra.mxu0 %v11243_v16 }
 0x58c   :  { %8716 = vmatpush1.bf16.msra.mxu1 %v11220_v40  ;;  %10288 = vmatprep.subr.bf16.mxu0 %v11244_v10  ;;  %v2657_v40 = vrot.slane %v2652_v33, %v11762_v34  ;;  %v11258_v34 = vld [vmem:[%s11963_s9 + $0x68] sm:$0xff]  }
 0x58d   :  { %8717 = vmatprep.subr.bf16.mxu1 %v11225_v1  ;;  %v11255_v1 = vld [vmem:[%s11963_s9 + $0x18] sm:$0xff]  }
 0x58f   :  { %10289 = vmatpush3.bf16.msra.mxu0 %v11245_v11 }
 0x590   :  { %8718 = vmatpush1.bf16.msra.mxu1 %v11223_v18  ;;  %10290 = vmatprep.subr.bf16.mxu0 %v11246_v12  ;;  %v11256_v18 = vld [vmem:[%s11963_s9 + $0x60] sm:$0xff]  }
 0x591   :  { %8719 = vmatprep.subr.bf16.mxu1 %v11228_v50  ;;  %v10324_v50 = vadd.f32 %v11793_v21, %v2657_v40  ;;  %v11260_v21 = vld [vmem:[%s11963_s9 + $0x70] sm:$0xff]  }
 0x593   :  { %10291 = vmatpush3.bf16.msra.mxu0 %v11247_v14 }
 0x594   :  { %8720 = vmatpush1.bf16.msra.mxu1 %v11226_v51  ;;  %10298 = vmatprep.subr.bf16.mxu0 %v11248_v19  ;;  %v11257_v51 = vld [vmem:[%s11963_s9 + $0x20] sm:$0xff]  }
 0x595   :  { %8721 = vmatprep.subr.bf16.mxu1 %v11231_v53  ;;  %v11259_v53 = vld [vmem:[%s11963_s9 + $0x28] sm:$0xff]  }
 0x598   :  { %8722 = vmatpush1.bf16.msra.mxu1 %v11229_v55  ;;  %v11261_v55 = vld [vmem:[%s11963_s9 + $0x30] sm:$0xff]  }
 0x649   :  { %v7765_v2 = vpop.f32.mrb[12].mxu0 }
 0x64a   :  { %v10332_v3 = vadd.f32 %v7765_v2, %v3739_v38  ;;  %v7767_v4 = vpop.f32.mrb[13].mxu0 }
 0x64b   :  { %v10333_v5 = vadd.f32 %v7767_v4, %v3743_v0  ;;  %v7769_v30 = vpop.f32.mrb[14].mxu0 }
 0x64c   :  { %11284 = vtanh.f32 %v10332_v3  ;;  %v7770_v47 = vpop.f32.mrb[15].mxu0  ;;  %v10275_v3 = vld [vmem:[%s11965_s11] ss:$0 sm:$0xff] }
 0x64d   :  { %11286 = vtanh.f32 %v10333_v5 }
 0x64e   :  { %11288 = vtanh.f32 %v10325_v52 }
 0x656   :  { %v11285_v6 = vpop.eup %11284 }
 0x657   :  { %v11287_v7 = vpop.eup %11286  ;;  %v7786_v8 = vpack.c.bf16 %v11285_v6, %v11285_v6 }
 0x658   :  { %v7787_v54 = vpack.c.bf16 %v11287_v7, %v11287_v7  ;;  %v11289_v36 = vpop.eup %11288 }
 0x659   :  { %v3069_v45 = vpack.c.bf16 %v11289_v36, %v11289_v36 }
 0x65a   :  { %8723 = vmatprep.mubr.bf16.mxu1 %v7787_v54 }
 0x65b   :  { %8724 = vmatmul.mubr.bf16.vlgmr.msra.gmra.mrb[12].mxu1 %v7786_v8 }
 0x72e   :  { %v8725_v25 = vpop.f32.mrb[12].mxu1 }
 0x72f   :  { %v10334_v26 = vadd.f32 %v8725_v25, %v7921_v61  ;;  %v8727_v28 = vpop.f32.mrb[13].mxu1 }
 0x730   :  { %v10335_v29 = vadd.f32 %v8727_v28, %v7925_v22  ;;  %v8729_v31 = vpop.f32.mrb[14].mxu1 }
 0x731   :  { %11290 = vtanh.f32 %v10334_v26  ;;  %v8730_v32 = vpop.f32.mrb[15].mxu1 }
 0x732   :  { %11292 = vtanh.f32 %v10335_v29 }
 0x733   :  { %11294 = vtanh.f32 %v10324_v50 }
 0x73b   :  { %v11291_v41 = vpop.eup %11290 }
 0x73c   :  { %v11293_v43 = vpop.eup %11292  ;;  %v8734_v24 = vpack.c.bf16 %v11291_v41, %v11291_v41 }
 0x73d   :  { %v8735_v60 = vpack.c.bf16 %v11293_v43, %v11293_v43  ;;  %v11295_v57 = vpop.eup %11294 }
 0x73e   :  { %v3068_v58 = vpack.c.bf16 %v11295_v57, %v11295_v57 }
 0x73f   :  { %8928 = vmatprep.mubr.bf16.mxu0 %v8735_v60 }
 0x740   :  { %8929 = vmatmul.mubr.bf16.vlgmr.msra.gmra.mrb[16].mxu0 %v8734_v24 }
 0x741   :  { %10299 = vmatpush3.bf16.msra.mxu0 %v11249_v44  ;;  %9064 = vmatprep.mubr.bf16.mxu0 %v3069_v45 }
 0x742   :  { %10300 = vmatprep.subr.bf16.mxu0 %v11250_v39 }
 0x745   :  { %10301 = vmatpush3.bf16.msra.mxu0 %v11251_v15 }
 0x746   :  { %10302 = vmatprep.subr.bf16.mxu0 %v11252_v35 }
 0x749   :  { %10303 = vmatpush3.bf16.msra.mxu0 %v11253_v46 }
 0x74a   :  { %10304 = vmatprep.subr.bf16.mxu0 %v11254_v48 }
 0x74d   :  { %10305 = vmatpush3.bf16.msra.mxu0 %v11255_v1 }
 0x74e   :  { %10306 = vmatprep.subr.bf16.mxu0 %v11256_v18 }
 0x751   :  { %10307 = vmatpush3.bf16.msra.mxu0 %v11257_v51 }
 0x752   :  { %10308 = vmatprep.subr.bf16.mxu0 %v11258_v34 }
 0x755   :  { %10309 = vmatpush3.bf16.msra.mxu0 %v11259_v53 }
 0x756   :  { %10310 = vmatprep.subr.bf16.mxu0 %v11260_v21 }
 0x759   :  { %10311 = vmatpush3.bf16.msra.mxu0 %v11261_v55 }
 0x75a   :  { %10312 = vmatprep.subr.bf16.mxu0 %v11262_v56 }
 0x75d   :  { %10313 = vmatpush3.bf16.msra.mxu0 %v11263_v13 }
 0x760   :  { %9065 = vmatmul.mubr.bf16.vlgmr.msra.gmra.mrb[20].mxu0 %v3068_v58 }
 0x813   :  { %v10292_v23 = vpop.f32.mrb[16].mxu0 }
 0x814   :  { %v10293_v17 = vpop.f32.mrb[17].mxu0 }
 0x815   :  { %v10294_v59 = vadd.f32 %v10293_v17, %v10292_v23  ;;  %v10295_v27 = vpop.f32.mrb[18].mxu0 }
 0x816   :  { %v10296_v62 = vpop.f32.mrb[19].mxu0 }
 0x833   :  { %v10314_v63 = vpop.f32.mrb[20].mxu0 }
 0x834   :  { %v10315_v38 = vpop.f32.mrb[21].mxu0 }
 0x835   :  { %v10316_v0 = vadd.f32 %v10315_v38, %v10314_v63  ;;  %v10317_v2 = vpop.f32.mrb[22].mxu0 }
 0x836   :  { %v10318_v4 = vpop.f32.mrb[23].mxu0 }
 0x837   :  { %v9067_v5 = vadd.f32 %v10316_v0, %v10294_v59 }
 0x839   :  { %v9079_v30 = vadd.f32 %v10275_v3, %v9067_v5 }
 0x83b   :  { %9080 = vst [vmem:[%s11966_s12] sm:$0x3] %v9079_v30 }
 0x83c   :  { %9085 = vsyncpa [#allocation3], 1 }
 0x83d   :  { %9086 = vsyncpa [#allocation5], 1 }
 0x83e   :  { %9087 = vsyncpa [#allocation8], 1 }
 0x83f   :  { %9088 = vsyncpa [#allocation11], 1 }
 0x840   :  { %9089 = vsyncpa [#allocation14], 1 }

</bundles_post_ra>
